<compile_context>
chip_gen: v7x
topology: tpu7x:2x2x1
jax: 0.10.0
libtpu: 0.0.40
codegen_flags: <defaults>
</compile_context>

<pallas_src>
import jax
import jax.numpy as jnp
from jax.experimental import pallas as pl
from jax.experimental.pallas import tpu as pltpu

EPS = 1e-5
LANES = 128


def head_kernel(x_ref, bn1s_ref, bn1b_ref, w1_ref, b1_ref, w2_ref, b2_ref,
                out_ref):
    # x: (B, 2048) f32 -- whole problem fits in VMEM (w1 is 4 MiB in bf16).
    x = x_ref[...]

    # bn1 (folded running stats -> per-feature affine) + ReLU; Dropout = id.
    h = jnp.maximum(x * bn1s_ref[...] + bn1b_ref[...], 0.0)

    # fc1 (+ folded BatchNorm1d): bf16 operands on the MXU, f32 accumulation.
    z = jnp.dot(h.astype(jnp.bfloat16), w1_ref[...],
                preferred_element_type=jnp.float32) + b1_ref[...]
    z = jnp.maximum(z, 0.0)

    # fc2: Linear(1024, classes_padded) kept in f32 (tiny; preserves logits).
    out = jnp.dot(z, w2_ref[...], preferred_element_type=jnp.float32) + b2_ref[...]
    out_ref[...] = out.astype(out_ref.dtype)


def recognition_head(feat_nchw, params):
    """feat_nchw: (B, 2048, 1, 1) backbone features (NCHW). Returns (B, classes)."""
    B = feat_nchw.shape[0]
    x = feat_nchw.reshape(B, -1).astype(jnp.float32)          # Flatten (glue)

    # Fold BatchNorm running statistics into per-feature scale/bias (glue).
    def fold_bn(gamma, beta, mean, var):
        scale = gamma / jnp.sqrt(var + EPS)
        bias = beta - mean * scale
        return scale, bias

    bn1s, bn1b = fold_bn(params["bn1_gamma"], params["bn1_beta"],
                         params["bn1_mean"], params["bn1_var"])
    bn2s, bn2b = fold_bn(params["bn2_gamma"], params["bn2_beta"],
                         params["bn2_mean"], params["bn2_var"])

    # Fold BatchNorm1d(1024) into fc1 (valid: ReLU comes after the BN).
    w1f = (params["w1"] * bn2s[None, :]).astype(jnp.bfloat16)   # (2048, 1024) bf16
    b1f = (params["b1"] * bn2s + bn2b)[None, :]                 # (1, 1024) f32

    # Pad the class dim to a lane-dense multiple of 128.
    classes = params["w2"].shape[1]
    cpad = max(LANES, ((classes + LANES - 1) // LANES) * LANES)
    w2p = jnp.zeros((1024, cpad), jnp.float32).at[:, :classes].set(params["w2"])
    b2p = jnp.zeros((1, cpad), jnp.float32).at[0, :classes].set(params["b2"])

    bn1s = bn1s[None, :]
    bn1b = bn1b[None, :]

    # CostEstimate requires integer fields.
    flops = 2 * B * 2048 * 1024 + 2 * B * 1024 * cpad
    bytes_accessed = (w1f.size * 2 + w2p.size * 4 + x.size * 4 +
                      B * cpad * 4 +
                      (bn1s.size + bn1b.size + b1f.size + b2p.size) * 4)
    cost = pl.CostEstimate(flops=int(flops), transcendentals=0,
                           bytes_accessed=int(bytes_accessed))

    vmem = pl.BlockSpec(memory_space=pltpu.MemorySpace.VMEM)
    out_padded = pl.pallas_call(
        head_kernel,
        out_shape=jax.ShapeDtypeStruct((B, cpad), jnp.float32),
        in_specs=[vmem] * 7,
        out_specs=vmem,
        cost_estimate=cost,
    )(x, bn1s, bn1b, w1f, b1f, w2p, b2p)
    return out_padded[:, :classes]


def reference_head(feat_nchw, params):
    """Pure-JAX f32 reference of the head (eval-mode PyTorch semantics)."""
    B = feat_nchw.shape[0]
    x = feat_nchw.reshape(B, -1).astype(jnp.float32)
    s1 = params["bn1_gamma"] / jnp.sqrt(params["bn1_var"] + EPS)
    h = jnp.maximum(x * s1 + (params["bn1_beta"] - params["bn1_mean"] * s1), 0.0)
    z = h @ params["w1"] + params["b1"]
    s2 = params["bn2_gamma"] / jnp.sqrt(params["bn2_var"] + EPS)
    z = jnp.maximum(z * s2 + (params["bn2_beta"] - params["bn2_mean"] * s2), 0.0)
    return z @ params["w2"] + params["b2"]


def init_params(key, classes):
    ks = jax.random.split(key, 12)
    p = {}
    # BatchNorm2d(2048) parameters + running stats (deterministic, non-trivial)
    p["bn1_gamma"] = 1.0 + 0.1 * jax.random.normal(ks[0], (2048,), jnp.float32)
    p["bn1_beta"] = 0.1 * jax.random.normal(ks[1], (2048,), jnp.float32)
    p["bn1_mean"] = 0.1 * jax.random.normal(ks[2], (2048,), jnp.float32)
    p["bn1_var"] = jax.random.uniform(ks[3], (2048,), jnp.float32, 0.5, 1.5)
    # fc1: Linear(2048, 1024)   (stored as (in, out) so the kernel does x @ W)
    p["w1"] = jax.random.normal(ks[4], (2048, 1024), jnp.float32) * (2048 ** -0.5)
    p["b1"] = 0.01 * jax.random.normal(ks[5], (1024,), jnp.float32)
    # BatchNorm1d(1024)
    p["bn2_gamma"] = 1.0 + 0.1 * jax.random.normal(ks[6], (1024,), jnp.float32)
    p["bn2_beta"] = 0.1 * jax.random.normal(ks[7], (1024,), jnp.float32)
    p["bn2_mean"] = 0.1 * jax.random.normal(ks[8], (1024,), jnp.float32)
    p["bn2_var"] = jax.random.uniform(ks[9], (1024,), jnp.float32, 0.5, 1.5)
    # fc2: Linear(1024, classes)
    p["w2"] = jax.random.normal(ks[10], (1024, classes), jnp.float32) * (1024 ** -0.5)
    p["b2"] = 0.01 * jax.random.normal(ks[11], (classes,), jnp.float32)
    return p


if __name__ == "__main__":
    key = jax.random.PRNGKey(0)
    k_feat, k_params = jax.random.split(key)

    B, classes = 2, 7
    # Backbone output for 32x32 images: (B, 2048, 1, 1) NCHW features.
    feat = jax.random.normal(k_feat, (B, 2048, 1, 1), jnp.float32)
    params = init_params(k_params, classes)

    out = recognition_head(feat, params)
    out = jax.block_until_ready(out)
    assert out.shape == (B, classes) and out.dtype == jnp.float32

    # Sanity-check against the f32 reference (generous tolerance for bf16 w1).
    ref = jax.block_until_ready(reference_head(feat, params))
    assert jnp.allclose(out, ref, rtol=5e-2, atol=5e-2)

    print("KERNEL_OK")
</pallas_src>

<mosaic_0001>
module attributes {stable_mosaic.version = 11 : i64} {
  func.func @head_kernel(%arg0: memref<2x2048xf32, #tpu.memory_space<vmem>>, %arg1: memref<1x2048xf32, #tpu.memory_space<vmem>>, %arg2: memref<1x2048xf32, #tpu.memory_space<vmem>>, %arg3: memref<2048x1024xbf16, #tpu.memory_space<vmem>>, %arg4: memref<1x1024xf32, #tpu.memory_space<vmem>>, %arg5: memref<1024x128xf32, #tpu.memory_space<vmem>>, %arg6: memref<1x128xf32, #tpu.memory_space<vmem>>, %arg7: memref<2x128xf32, #tpu.memory_space<vmem>>) attributes {dimension_semantics = [], scalar_prefetch = 0 : i64, scratch_operands = 0 : i64, tpu.core_type = #tpu.core_type<tc>} {
    %c0 = arith.constant 0 : index
    %c0_0 = arith.constant 0 : index
    %0 = vector.load %arg0[%c0, %c0_0] : memref<2x2048xf32, #tpu.memory_space<vmem>>, vector<2x2048xf32>
    %c0_1 = arith.constant 0 : index
    %c0_2 = arith.constant 0 : index
    %1 = vector.load %arg1[%c0_1, %c0_2] : memref<1x2048xf32, #tpu.memory_space<vmem>>, vector<1x2048xf32>
    %2 = vector.broadcast %1 : vector<1x2048xf32> to vector<2x2048xf32>
    %3 = arith.mulf %0, %2 : vector<2x2048xf32>
    %c0_3 = arith.constant 0 : index
    %c0_4 = arith.constant 0 : index
    %4 = vector.load %arg2[%c0_3, %c0_4] : memref<1x2048xf32, #tpu.memory_space<vmem>>, vector<1x2048xf32>
    %5 = vector.broadcast %4 : vector<1x2048xf32> to vector<2x2048xf32>
    %6 = arith.addf %3, %5 : vector<2x2048xf32>
    %cst = arith.constant 0.000000e+00 : f32
    %7 = vector.broadcast %cst : f32 to vector<2x2048xf32>
    %8 = arith.maximumf %6, %7 : vector<2x2048xf32>
    %9 = arith.truncf %8 : vector<2x2048xf32> to vector<2x2048xbf16>
    %c0_5 = arith.constant 0 : index
    %c0_6 = arith.constant 0 : index
    %10 = vector.load %arg3[%c0_5, %c0_6] : memref<2048x1024xbf16, #tpu.memory_space<vmem>>, vector<2048x1024xbf16>
    %cst_7 = arith.constant dense<0.000000e+00> : vector<2x1024xf32>
    %11 = tpu.matmul %9, %10, %cst_7 {dimension_numbers = #tpu.dot_dimension_numbers<[1], [0], [0], [1], [0, 0, 1, 1], [], []>} : vector<2x2048xbf16>, vector<2048x1024xbf16>, vector<2x1024xf32> -> vector<2x1024xf32>
    %c0_8 = arith.constant 0 : index
    %c0_9 = arith.constant 0 : index
    %12 = vector.load %arg4[%c0_8, %c0_9] : memref<1x1024xf32, #tpu.memory_space<vmem>>, vector<1x1024xf32>
    %13 = vector.broadcast %12 : vector<1x1024xf32> to vector<2x1024xf32>
    %14 = arith.addf %11, %13 : vector<2x1024xf32>
    %cst_10 = arith.constant 0.000000e+00 : f32
    %15 = vector.broadcast %cst_10 : f32 to vector<2x1024xf32>
    %16 = arith.maximumf %14, %15 : vector<2x1024xf32>
    %c0_11 = arith.constant 0 : index
    %c0_12 = arith.constant 0 : index
    %17 = vector.load %arg5[%c0_11, %c0_12] : memref<1024x128xf32, #tpu.memory_space<vmem>>, vector<1024x128xf32>
    %cst_13 = arith.constant dense<0.000000e+00> : vector<2x128xf32>
    %18 = tpu.matmul %16, %17, %cst_13 {dimension_numbers = #tpu.dot_dimension_numbers<[1], [0], [0], [1], [0, 0, 1, 1], [], []>} : vector<2x1024xf32>, vector<1024x128xf32>, vector<2x128xf32> -> vector<2x128xf32>
    %c0_14 = arith.constant 0 : index
    %c0_15 = arith.constant 0 : index
    %19 = vector.load %arg6[%c0_14, %c0_15] : memref<1x128xf32, #tpu.memory_space<vmem>>, vector<1x128xf32>
    %20 = vector.broadcast %19 : vector<1x128xf32> to vector<2x128xf32>
    %21 = arith.addf %18, %20 : vector<2x128xf32>
    %c0_16 = arith.constant 0 : index
    %c0_17 = arith.constant 0 : index
    %22 = vector.load %arg7[%c0_16, %c0_17] : memref<2x128xf32, #tpu.memory_space<vmem>>, vector<2x128xf32>
    tpu.vector_store %arg7[%c0_16, %c0_17], %21 {strides = array<i32>} : memref<2x128xf32, #tpu.memory_space<vmem>>, vector<2x128xf32>,
    return
  }
}

</mosaic_0001>

<bundles_post_ra>
// kernel: tpu_custom_call.1
= control target key start
LH: loop header
LB: loop body
LE: loop exit
PB: predicated region body
PF: predicated region fallthrough
CT: control target
= control target key end

     0   :  { %12 = vsyncpa [#allocation3], 0  ;;  %s10542_s0 = inlined_call_operand.hbm [shape: f32[2,2048], index: 0, kind: input, shape index: {}]   ;;  %s10543_s1 = inlined_call_operand.hbm [shape: f32[1,2048], index: 1, kind: input, shape index: {}]   ;;  %s10544_s2 = inlined_call_operand.hbm [shape: f32[1,2048], index: 2, kind: input, shape index: {}]   ;;  %s10545_s3 = inlined_call_operand.hbm [shape: bf16[2048,1024], index: 3, kind: input, shape index: {}]   ;;  %s10546_s4 = inlined_call_operand.hbm [shape: f32[1,1024], index: 4, kind: input, shape index: {}]   ;;  %s10547_s5 = inlined_call_operand.hbm [shape: f32[1024,128], index: 5, kind: input, shape index: {}]   ;;  %s10548_s6 = inlined_call_operand.hbm [shape: f32[1,128], index: 6, kind: input, shape index: {}]   ;;  %s10549_s7 = inlined_call_operand.hbm [shape: f32[2,128], index: 7, kind: output, shape index: {}]  }
   0x1   :  { %13 = vsyncpa [#allocation6], 0 }
   0x2   :  { %14 = vsyncpa [#allocation9], 0 }
   0x3   :  { %15 = vsyncpa [#allocation12], 0 }
   0x4   :  { %16 = vsyncpa [#allocation4], 0  ;;  %s10064_s24 = smov [#allocation5]   ;;  %s10065_s26 = smov [#allocation8]  }
   0x5   :  { %s33_s25 = sshll.u32 %s10064_s24, 4  ;;  %s52_s27 = sshll.u32 %s10065_s26, 4  ;;  %s34_s25 = int_to_ptr.vmem [resolvable:$true] %s33_s25  ;;  %s10117_s27 = int_to_ptr.vmem [resolvable:$true] %s52_s27 }
   0x6   :  { %s9878_s30 = scalar_lea.hbm %s10543_s1, 256 }
   0x7   :  { %p9879_p0 = scmp.ne.s32.totalorder %s10543_s1, %s9878_s30  ;;  %p9882_p1 = scmp.lt.u32.totalorder %s9878_s30, %s10543_s1 }
   0x9   :  { %p9884_p2 = pnand %p9882_p1, %p9879_p0 }
   0xb   :  { %9887 = shalt.err (!%p9884_p2)
}
   0xc   :  { %s9888_s12 = scalar_lea.vmem %s34_s25, 256  ;;  %p9893_p4 = scmp.lt.s32.totalorder %s34_s25, %s34_s25 }
   0xd   :  { %p9889_p3 = scmp.ne.s32.totalorder %s34_s25, %s9888_s12  ;;  %p9894_p5 = scmp.lt.s32.totalorder %s9888_s12, %s9888_s12 }
   0xf   :  { %p9895_p6 = por %p9894_p5, %p9893_p4 }
  0x11   :  { %p9896_p7 = pnand %p9895_p6, %p9889_p3 }
  0x13   :  { %9899 = shalt.err (!%p9896_p7)
}
  0x14   :  { %36 = dma.hbm_to_vmem [thread:$0]  %s10543_s1, 256, %s34_s25, [#allocation6]  }
  0x15   :  { %s9900_s17 = scalar_lea.hbm %s10545_s3, 131072 }
  0x16   :  { %p9901_p8 = scmp.ne.s32.totalorder %s10545_s3, %s9900_s17  ;;  %p9904_p9 = scmp.lt.u32.totalorder %s9900_s17, %s10545_s3 }
  0x18   :  { %p9906_p10 = pnand %p9904_p9, %p9901_p8 }
  0x1a   :  { %9909 = shalt.err (!%p9906_p10)
}
  0x1b   :  { %s9910_s22 = scalar_lea.vmem %s10117_s27, 131072  ;;  %p9915_p12 = scmp.lt.s32.totalorder %s10117_s27, %s10117_s27 }
  0x1c   :  { %p9911_p11 = scmp.ne.s32.totalorder %s10117_s27, %s9910_s22  ;;  %p9916_p13 = scmp.lt.s32.totalorder %s9910_s22, %s9910_s22 }
  0x1e   :  { %p9917_p0 = por %p9916_p13, %p9915_p12 }
  0x20   :  { %p9918_p1 = pnand %p9917_p0, %p9911_p11 }
  0x22   :  { %9921 = shalt.err (!%p9918_p1)
}
  0x23   :  { %s10066_s1 = smov 512   ;;  %s10067_s23 = smov 32  }
  0x24   :  { %58 = dma.hbm_to_vmem [thread:$0]  %s10545_s3, 131072, %s10117_s27, [#allocation9], %s10066_s1, %s10066_s1, %s10067_s23  }
  0x25   :  { %s10068_s26 = smov [#allocation11]   ;;  %s9922_s8 = scalar_lea.hbm %s10547_s5, 16384 }
  0x26   :  { %s74_s28 = sshll.u32 %s10068_s26, 4  ;;  %p9923_p2 = scmp.ne.s32.totalorder %s10547_s5, %s9922_s8  ;;  %s75_s28 = int_to_ptr.vmem [resolvable:$true] %s74_s28 }
  0x27   :  { %p9926_p3 = scmp.lt.u32.totalorder %s9922_s8, %s10547_s5 }
  0x29   :  { %p9928_p4 = pnand %p9926_p3, %p9923_p2 }
  0x2b   :  { %9931 = shalt.err (!%p9928_p4)
}
  0x2c   :  { %s9932_s13 = scalar_lea.vmem %s75_s28, 16384  ;;  %p9937_p6 = scmp.lt.s32.totalorder %s75_s28, %s75_s28 }
  0x2d   :  { %p9933_p5 = scmp.ne.s32.totalorder %s75_s28, %s9932_s13  ;;  %p9938_p7 = scmp.lt.s32.totalorder %s9932_s13, %s9932_s13 }
  0x2f   :  { %p9939_p8 = por %p9938_p7, %p9937_p6 }
  0x31   :  { %p9940_p9 = pnand %p9939_p8, %p9933_p5 }
  0x33   :  { %9943 = shalt.err (!%p9940_p9)
}
  0x34   :  { %s10069_s3 = smov 128   ;;  %s10070_s27 = smov 8  }
  0x35   :  { %80 = dma.hbm_to_vmem [thread:$0]  %s10547_s5, 16384, %s75_s28, [#allocation12], %s10069_s3, %s10069_s3, %s10070_s27  }
  0x36   :  { %s10071_s16 = smov [#allocation2]   ;;  %s10072_s18 = smov [#allocation7]  }
  0x37   :  { %s23_s17 = sshll.u32 %s10071_s16, 4  ;;  %s43_s19 = sshll.u32 %s10072_s18, 4  ;;  %s24_s17 = int_to_ptr.vmem [resolvable:$true] %s23_s17  ;;  %s44_s19 = int_to_ptr.vmem [resolvable:$true] %s43_s19 }
  0x38   :  { %s9944_s22 = scalar_lea.hbm %s10542_s0, 512 }
  0x39   :  { %p9945_p10 = scmp.ne.s32.totalorder %s10542_s0, %s9944_s22  ;;  %p9948_p11 = scmp.lt.u32.totalorder %s9944_s22, %s10542_s0 }
  0x3b   :  { %p9950_p12 = pnand %p9948_p11, %p9945_p10 }
  0x3d   :  { %9953 = shalt.err (!%p9950_p12)
}
  0x3e   :  { %s9954_s5 = scalar_lea.vmem %s24_s17, 512  ;;  %p9959_p0 = scmp.lt.s32.totalorder %s24_s17, %s24_s17 }
  0x3f   :  { %p9955_p13 = scmp.ne.s32.totalorder %s24_s17, %s9954_s5  ;;  %p9960_p1 = scmp.lt.s32.totalorder %s9954_s5, %s9954_s5 }
  0x41   :  { %p9961_p2 = por %p9960_p1, %p9959_p0 }
  0x43   :  { %p9962_p3 = pnand %p9961_p2, %p9955_p13 }
  0x45   :  { %9965 = shalt.err (!%p9962_p3)
}
  0x46   :  { %26 = dma.hbm_to_vmem [thread:$0]  %s10542_s0, 512, %s24_s17, [#allocation3]  }
  0x47   :  { %s9966_s8 = scalar_lea.hbm %s10544_s2, 256 }
  0x48   :  { %p9967_p4 = scmp.ne.s32.totalorder %s10544_s2, %s9966_s8  ;;  %p9970_p5 = scmp.lt.u32.totalorder %s9966_s8, %s10544_s2 }
  0x4a   :  { %p9972_p6 = pnand %p9970_p5, %p9967_p4 }
  0x4c   :  { %9975 = shalt.err (!%p9972_p6)
}
  0x4d   :  { %s9976_s13 = scalar_lea.vmem %s44_s19, 256  ;;  %p9981_p8 = scmp.lt.s32.totalorder %s44_s19, %s44_s19 }
  0x4e   :  { %p9977_p7 = scmp.ne.s32.totalorder %s44_s19, %s9976_s13  ;;  %p9982_p9 = scmp.lt.s32.totalorder %s9976_s13, %s9976_s13 }
  0x50   :  { %p9983_p10 = por %p9982_p9, %p9981_p8 }
  0x52   :  { %p9984_p11 = pnand %p9983_p10, %p9977_p7 }
  0x54   :  { %9987 = shalt.err (!%p9984_p11)
}
  0x55   :  { %46 = dma.hbm_to_vmem [thread:$0]  %s10544_s2, 256, %s44_s19, [#allocation6]  }
  0x56   :  { %s10073_s27 = smov [#allocation10]   ;;  %s10074_s15 = smov [#allocation13]  }
  0x57   :  { %s65_s14 = sshll.u32 %s10073_s27, 4  ;;  %s87_s16 = sshll.u32 %s10074_s15, 4  ;;  %s66_s14 = int_to_ptr.vmem [resolvable:$true] %s65_s14  ;;  %s88_s16 = int_to_ptr.vmem [resolvable:$true] %s87_s16 }
  0x58   :  { %s9988_s20 = scalar_lea.hbm %s10546_s4, 128 }
  0x59   :  { %p9989_p12 = scmp.ne.s32.totalorder %s10546_s4, %s9988_s20  ;;  %p9992_p13 = scmp.lt.u32.totalorder %s9988_s20, %s10546_s4 }
  0x5b   :  { %p9994_p0 = pnand %p9992_p13, %p9989_p12 }
  0x5d   :  { %9997 = shalt.err (!%p9994_p0)
}
  0x5e   :  { %s9998_s2 = scalar_lea.vmem %s66_s14, 128  ;;  %p10003_p2 = scmp.lt.s32.totalorder %s66_s14, %s66_s14 }
  0x5f   :  { %p9999_p1 = scmp.ne.s32.totalorder %s66_s14, %s9998_s2  ;;  %p10004_p3 = scmp.lt.s32.totalorder %s9998_s2, %s9998_s2 }
  0x61   :  { %p10005_p4 = por %p10004_p3, %p10003_p2 }
  0x63   :  { %p10006_p5 = pnand %p10005_p4, %p9999_p1 }
  0x65   :  { %10009 = shalt.err (!%p10006_p5)
}
  0x66   :  { %68 = dma.hbm_to_vmem [thread:$0]  %s10546_s4, 128, %s66_s14, [#allocation9]  }
  0x67   :  { %s10010_s26 = scalar_lea.hbm %s10548_s6, 16 }
  0x68   :  { %p10011_p6 = scmp.ne.s32.totalorder %s10548_s6, %s10010_s26  ;;  %p10014_p7 = scmp.lt.u32.totalorder %s10010_s26, %s10548_s6 }
  0x6a   :  { %p10016_p8 = pnand %p10014_p7, %p10011_p6 }
  0x6c   :  { %10019 = shalt.err (!%p10016_p8)
}
  0x6d   :  { %s10020_s9 = scalar_lea.vmem %s88_s16, 16  ;;  %s10024_s10 = scalar_lea.vmem %s88_s16, 32 }
  0x6e   :  { %p10021_p9 = scmp.ne.s32.totalorder %s88_s16, %s10020_s9  ;;  %p10025_p10 = scmp.lt.s32.totalorder %s88_s16, %s88_s16 }
  0x6f   :  { %p10026_p11 = scmp.lt.s32.totalorder %s10024_s10, %s10020_s9 }
  0x71   :  { %p10027_p12 = por %p10026_p11, %p10025_p10 }
  0x73   :  { %p10028_p13 = pnand %p10027_p12, %p10021_p9 }
  0x75   :  { %10031 = shalt.err (!%p10028_p13)
}
  0x76   :  { %90 = dma.hbm_to_vmem [thread:$0]  %s10548_s6, 16, %s88_s16, [#allocation12]  }
  0x77   :  { %10054 = dma.done.wait [#allocation3], 512  }
  0x78   :  { %10055 = vsyncadd [#allocation3], 4294966784 }
  0x79   :  { %10056 = dma.done.wait [#allocation6], 512  }
  0x7a   :  { %10057 = vsyncadd [#allocation6], 4294966784 }
  0x7b   :  { %10058 = dma.done.wait [#allocation9], 131200  }
  0x7c   :  { %10059 = vsyncadd [#allocation9], 4294836096 }
  0x7d   :  { %10060 = dma.done.wait [#allocation12], 16400  }
  0x7e   :  { %10061 = vsyncadd [#allocation12], 4294950896  ;;  %v512_v0 = vld [vmem:[#allocation8] sm:$0xff]  ;;  %v513_v2 = vld [vmem:[#allocation8 + $0x8] sm:$0xff]  ;;  %v120_v32 = vlaneseq  ;;  %v10075_v38 = vmov 1983009808  }
  0x7f   :  { %v516_v1 = vld [vmem:[#allocation8 + $0x20] sm:$0xff]  ;;  %v517_v4 = vld [vmem:[#allocation8 + $0x28] sm:$0xff]  ;;  %v187_v39 = vunpack.c.l.s4 %v10075_v38  ;;  %s10076_s6 = smov [#allocation14]  }
  0x80   :  { %v8453_v3 = vcombine.high %v512_v0, %v516_v1  ;;  %v8452_v5 = vcombine.low %v512_v0, %v516_v1  ;;  %v520_v6 = vld [vmem:[#allocation8 + $0x40] sm:$0xff]  ;;  %v8455_v8 = vcombine.high %v513_v2, %v517_v4  ;;  %v8454_v9 = vcombine.low %v513_v2, %v517_v4  ;;  %v521_v11 = vld [vmem:[#allocation8 + $0x48] sm:$0xff]  ;;  %s8440_s12 = sshll.u32 %s10076_s6, 4  ;;  %s8441_s12 = int_to_ptr.vmem [resolvable:$true] %s8440_s12 }
  0x81   :  { %v524_v7 = vld [vmem:[#allocation8 + $0x60] sm:$0xff]  ;;  %v525_v12 = vld [vmem:[#allocation8 + $0x68] sm:$0xff]  ;;  %v10208_v43 = vshrl.u32 %v120_v32, 7  ;;  %v188_v49 = vunpack.c.0.s8 %v187_v39  ;;  %s10032_s13 = scalar_lea.vmem %s8441_s12, 32  ;;  %p10037_p1 = scmp.lt.s32.totalorder %s8441_s12, %s8441_s12 }
  0x82   :  { %v8461_v10 = vcombine.high %v520_v6, %v524_v7  ;;  %v528_v13 = vld [vmem:[#allocation8 + $0x80] sm:$0xff]  ;;  %6698 = vmatprep.subr.bf16.mxu0 %v8453_v3  ;;  %v8463_v14 = vcombine.high %v521_v11, %v525_v12  ;;  %v529_v16 = vld [vmem:[#allocation8 + $0x88] sm:$0xff]  ;;  %7026 = vmatprep.subr.bf16.mxu1 %v8455_v8  ;;  %v8460_v18 = vcombine.low %v520_v6, %v524_v7  ;;  %v10231_v6 = vld [vmem:[#allocation7] sm:$0xff]  ;;  %p10033_p0 = scmp.ne.s32.totalorder %s8441_s12, %s10032_s13  ;;  %p10038_p2 = scmp.lt.s32.totalorder %s10032_s13, %s10032_s13 }
  0x83   :  { %v532_v15 = vld [vmem:[#allocation8 + $0xa0] sm:$0xff]  ;;  %v533_v17 = vld [vmem:[#allocation8 + $0xa8] sm:$0xff]  ;;  %6699 = vmatpush1.bf16.msra.mxu0 %v8452_v5  ;;  %7027 = vmatpush1.bf16.msra.mxu1 %v8454_v9  ;;  %v8462_v19 = vcombine.low %v521_v11, %v525_v12  ;;  %v10211_v53 = vsub.s32 0, %v10208_v43  ;;  %v10214_v54 = vsub.s32 1, %v10208_v43  ;;  %v10217_v57 = vsub.s32 2, %v10208_v43 }
  0x84   :  { %6700 = vmatprep.subr.bf16.mxu0 %v8461_v10  ;;  %v8469_v20 = vcombine.high %v528_v13, %v532_v15  ;;  %7028 = vmatprep.subr.bf16.mxu1 %v8463_v14  ;;  %v8471_v21 = vcombine.high %v529_v16, %v533_v17  ;;  %v536_v22 = vld [vmem:[#allocation8 + $0xc0] sm:$0xff]  ;;  %v537_v24 = vld [vmem:[#allocation8 + $0xc8] sm:$0xff]  ;;  %v8468_v26 = vcombine.low %v528_v13, %v532_v15  ;;  %v10220_v58 = vsub.s32 3, %v10208_v43  ;;  %p10039_p3 = por %p10038_p2, %p10037_p1 }
  0x85   :  { %v540_v23 = vld [vmem:[#allocation8 + $0xe0] sm:$0xff]  ;;  %v541_v25 = vld [vmem:[#allocation8 + $0xe8] sm:$0xff]  ;;  %v8470_v27 = vcombine.low %v529_v16, %v533_v17  ;;  %v10225_v63 = vsub.s32 %v188_v49, %v10208_v43  ;;  %v267_v11 = vrot.slane %v10231_v6, %v10211_v53  ;;  %v271_v12 = vrot.slane %v10231_v6, %v10214_v54 }
  0x86   :  { %v8477_v28 = vcombine.high %v536_v22, %v540_v23  ;;  %v8479_v29 = vcombine.high %v537_v24, %v541_v25  ;;  %v544_v30 = vld [vmem:[#allocation8 + $0x100] sm:$0xff]  ;;  %v545_v33 = vld [vmem:[#allocation8 + $0x108] sm:$0xff]  ;;  %v8476_v35 = vcombine.low %v536_v22, %v540_v23  ;;  %v8478_v36 = vcombine.low %v537_v24, %v541_v25  ;;  %p10040_p4 = pnand %p10039_p3, %p10033_p0 }
  0x87   :  { %6701 = vmatpush1.bf16.msra.mxu0 %v8460_v18  ;;  %7029 = vmatpush1.bf16.msra.mxu1 %v8462_v19  ;;  %v548_v31 = vld [vmem:[#allocation8 + $0x120] sm:$0xff]  ;;  %v549_v34 = vld [vmem:[#allocation8 + $0x128] sm:$0xff]  ;;  %v275_v15 = vrot.slane %v10231_v6, %v10217_v57  ;;  %v279_v16 = vrot.slane %v10231_v6, %v10220_v58  ;;  %v328_v19 = vcombine.low %v267_v11, %v271_v12 }
  0x88   :  { %6702 = vmatprep.subr.bf16.mxu0 %v8469_v20  ;;  %7030 = vmatprep.subr.bf16.mxu1 %v8471_v21  ;;  %v8485_v37 = vcombine.high %v544_v30, %v548_v31  ;;  %v8487_v40 = vcombine.high %v545_v33, %v549_v34  ;;  %v552_v41 = vld [vmem:[#allocation8 + $0x140] sm:$0xff]  ;;  %v553_v44 = vld [vmem:[#allocation8 + $0x148] sm:$0xff]  ;;  %v8484_v46 = vcombine.low %v544_v30, %v548_v31 }
  0x89   :  { %v556_v42 = vld [vmem:[#allocation8 + $0x160] sm:$0xff]  ;;  %v557_v45 = vld [vmem:[#allocation8 + $0x168] sm:$0xff]  ;;  %v8486_v47 = vcombine.low %v545_v33, %v549_v34  ;;  %v329_v24 = vcombine.low %v275_v15, %v279_v16 }
  0x8a   :  { %v8493_v48 = vcombine.high %v552_v41, %v556_v42  ;;  %v8495_v50 = vcombine.high %v553_v44, %v557_v45  ;;  %v560_v51 = vld [vmem:[#allocation8 + $0x180] sm:$0xff]  ;;  %v561_v55 = vld [vmem:[#allocation8 + $0x188] sm:$0xff]  ;;  %v8492_v59 = vcombine.low %v552_v41, %v556_v42  ;;  %v8494_v60 = vcombine.low %v553_v44, %v557_v45 }
  0x8b   :  { %6703 = vmatpush1.bf16.msra.mxu0 %v8468_v26  ;;  %7031 = vmatpush1.bf16.msra.mxu1 %v8470_v27  ;;  %v564_v52 = vld [vmem:[#allocation8 + $0x1a0] sm:$0xff]  ;;  %v565_v56 = vld [vmem:[#allocation8 + $0x1a8] sm:$0xff]  ;;  %v343_v31 = vrot.slane %v329_v24, %v10225_v63 }
  0x8c   :  { %6704 = vmatprep.subr.bf16.mxu0 %v8477_v28  ;;  %7032 = vmatprep.subr.bf16.mxu1 %v8479_v29  ;;  %v8501_v61 = vcombine.high %v560_v51, %v564_v52  ;;  %v10222_v62 = vld [vmem:[#allocation5] sm:$0xff]  ;;  %v8503_v0 = vcombine.high %v561_v55, %v565_v56  ;;  %v8500_v1 = vcombine.low %v560_v51, %v564_v52  ;;  %v569_v7 = vld [vmem:[#allocation8 + $0x1c8] sm:$0xff] }
  0x8d   :  { %v568_v2 = vld [vmem:[#allocation8 + $0x1c0] sm:$0xff]  ;;  %v123_v4 = vrot.slane %v10222_v62, %v10211_v53  ;;  %v127_v5 = vrot.slane %v10222_v62, %v10214_v54  ;;  %v573_v8 = vld [vmem:[#allocation8 + $0x1e8] sm:$0xff]  ;;  %v131_v9 = vrot.slane %v10222_v62, %v10217_v57  ;;  %v135_v10 = vrot.slane %v10222_v62, %v10220_v58 }
  0x8e   :  { %v572_v3 = vld [vmem:[#allocation8 + $0x1e0] sm:$0xff]  ;;  %v8502_v13 = vcombine.low %v561_v55, %v565_v56  ;;  %v8511_v20 = vcombine.high %v569_v7, %v573_v8  ;;  %v577_v25 = vld [vmem:[#allocation8 + $0x208] sm:$0xff]  ;;  %v336_v28 = vrot.slane %v328_v19, %v10225_v63  ;;  %v8510_v32 = vcombine.low %v569_v7, %v573_v8 }
  0x8f   :  { %6705 = vmatpush1.bf16.msra.mxu0 %v8476_v35  ;;  %7033 = vmatpush1.bf16.msra.mxu1 %v8478_v36  ;;  %v184_v14 = vcombine.low %v123_v4, %v127_v5  ;;  %v8509_v17 = vcombine.high %v568_v2, %v572_v3  ;;  %v185_v18 = vcombine.low %v131_v9, %v135_v10  ;;  %v576_v21 = vld [vmem:[#allocation8 + $0x200] sm:$0xff]  ;;  %v581_v26 = vld [vmem:[#allocation8 + $0x228] sm:$0xff] }
  0x90   :  { %6706 = vmatprep.subr.bf16.mxu0 %v8485_v37  ;;  %7034 = vmatprep.subr.bf16.mxu1 %v8487_v40  ;;  %v580_v22 = vld [vmem:[#allocation8 + $0x220] sm:$0xff]  ;;  %v8508_v29 = vcombine.low %v568_v2, %v572_v3  ;;  %v8519_v35 = vcombine.high %v577_v25, %v581_v26  ;;  %v344_v38 = vcombine.low %v336_v28, %v343_v31  ;;  %v585_v39 = vld [vmem:[#allocation8 + $0x248] sm:$0xff] }
  0x91   :  { %v192_v23 = vrot.slane %v184_v14, %v10225_v63  ;;  %v199_v27 = vrot.slane %v185_v18, %v10225_v63  ;;  %v112_v30 = vld [vmem:[#allocation2] sm:$0xff]  ;;  %v8517_v33 = vcombine.high %v576_v21, %v580_v22  ;;  %v589_v40 = vld [vmem:[#allocation8 + $0x268] sm:$0xff]  ;;  %v8516_v42 = vcombine.low %v576_v21, %v580_v22 }
  0x92   :  { %v584_v36 = vld [vmem:[#allocation8 + $0x240] sm:$0xff]  ;;  %v8518_v44 = vcombine.low %v577_v25, %v581_v26  ;;  %v597_v51 = vld [vmem:[#allocation8 + $0x2a8] sm:$0xff]  ;;  %v8526_v56 = vcombine.low %v585_v39, %v589_v40 }
  0x93   :  { %6707 = vmatpush1.bf16.msra.mxu0 %v8484_v46  ;;  %7035 = vmatpush1.bf16.msra.mxu1 %v8486_v47  ;;  %v200_v34 = vcombine.low %v192_v23, %v199_v27  ;;  %v588_v37 = vld [vmem:[#allocation8 + $0x260] sm:$0xff]  ;;  %v8527_v47 = vcombine.high %v585_v39, %v589_v40  ;;  %v601_v2 = vld [vmem:[#allocation8 + $0x2c8] sm:$0xff] }
  0x94   :  { %6708 = vmatprep.subr.bf16.mxu0 %v8493_v48  ;;  %7036 = vmatprep.subr.bf16.mxu1 %v8495_v50  ;;  %v8525_v45 = vcombine.high %v584_v36, %v588_v37  ;;  %v592_v48 = vld [vmem:[#allocation8 + $0x280] sm:$0xff]  ;;  %v593_v50 = vld [vmem:[#allocation8 + $0x288] sm:$0xff]  ;;  %v8524_v55 = vcombine.low %v584_v36, %v588_v37 }
  0x95   :  { %v256_v41 = vmul.f32 %v200_v34, %v112_v30  ;;  %v596_v49 = vld [vmem:[#allocation8 + $0x2a0] sm:$0xff]  ;;  %v605_v3 = vld [vmem:[#allocation8 + $0x2e8] sm:$0xff]  ;;  %v8534_v7 = vcombine.low %v593_v50, %v597_v51 }
  0x96   :  { %v8532_v5 = vcombine.low %v592_v48, %v596_v49  ;;  %v8543_v10 = vcombine.high %v601_v2, %v605_v3  ;;  %v608_v11 = vld [vmem:[#allocation8 + $0x300] sm:$0xff]  ;;  %v613_v14 = vld [vmem:[#allocation8 + $0x328] sm:$0xff]  ;;  %v8542_v16 = vcombine.low %v601_v2, %v605_v3  ;;  %v10280_v2 = vsub.s32 7, %v10208_v43 }
  0x97   :  { %6709 = vmatpush1.bf16.msra.mxu0 %v8492_v59  ;;  %7037 = vmatpush1.bf16.msra.mxu1 %v8494_v60  ;;  %v400_v46 = vadd.f32 %v344_v38, %v256_v41  ;;  %v8533_v59 = vcombine.high %v592_v48, %v596_v49  ;;  %v612_v12 = vld [vmem:[#allocation8 + $0x320] sm:$0xff]  ;;  %v617_v21 = vld [vmem:[#allocation8 + $0x348] sm:$0xff]  ;;  %v10264_v41 = vsub.s32 4, %v10208_v43 }
  0x98   :  { %6710 = vmatprep.subr.bf16.mxu0 %v8501_v61  ;;  %7038 = vmatprep.subr.bf16.mxu1 %v8503_v0  ;;  %v8535_v61 = vcombine.high %v593_v50, %v597_v51  ;;  %v600_v0 = vld [vmem:[#allocation8 + $0x2c0] sm:$0xff]  ;;  %v621_v22 = vld [vmem:[#allocation8 + $0x368] sm:$0xff]  ;;  %v8548_v23 = vcombine.low %v608_v11, %v612_v12  ;;  %v10273_v50 = vsub.s32 6, %v10208_v43 }
  0x99   :  { %v10249_v52 = vmax.f32 %v400_v46, 0.0  ;;  %v616_v19 = vld [vmem:[#allocation8 + $0x340] sm:$0xff]  ;;  %v8559_v26 = vcombine.high %v617_v21, %v621_v22  ;;  %v629_v30 = vld [vmem:[#allocation8 + $0x3a8] sm:$0xff] }
  0x9a   :  { %v624_v27 = vld [vmem:[#allocation8 + $0x380] sm:$0xff]  ;;  %v633_v38 = vld [vmem:[#allocation8 + $0x3c8] sm:$0xff] }
  0x9b   :  { %6711 = vmatpush1.bf16.msra.mxu0 %v8500_v1  ;;  %7039 = vmatpush1.bf16.msra.mxu1 %v8502_v13  ;;  %v10253_v60 = vrot.slane %v10249_v52, %v10225_v63  ;;  %v604_v1 = vld [vmem:[#allocation8 + $0x2e0] sm:$0xff]  ;;  %v609_v13 = vld [vmem:[#allocation8 + $0x308] sm:$0xff]  ;;  %v412_v37 = vcombine.high %v10249_v52, %v10249_v52 }
  0x9c   :  { %6712 = vmatprep.subr.bf16.mxu0 %v8509_v17  ;;  %7040 = vmatprep.subr.bf16.mxu1 %v8511_v20  ;;  %v8541_v8 = vcombine.high %v600_v0, %v604_v1  ;;  %v8540_v15 = vcombine.low %v600_v0, %v604_v1  ;;  %v8549_v17 = vcombine.high %v608_v11, %v612_v12  ;;  %v620_v20 = vld [vmem:[#allocation8 + $0x360] sm:$0xff]  ;;  %v637_v39 = vld [vmem:[#allocation8 + $0x3e8] sm:$0xff] }
  0x9d   :  { %v427_v4 = vcombine.high %v10253_v60, %v10253_v60  ;;  %v8551_v18 = vcombine.high %v609_v13, %v613_v14  ;;  %v8550_v24 = vcombine.low %v609_v13, %v613_v14  ;;  %v8557_v25 = vcombine.high %v616_v19, %v620_v20  ;;  %v628_v28 = vld [vmem:[#allocation8 + $0x3a0] sm:$0xff]  ;;  %v641_v51 = vld [vmem:[#allocation8 + $0x408] sm:$0xff] }
  0x9e   :  { %v8556_v31 = vcombine.low %v616_v19, %v620_v20  ;;  %v636_v36 = vld [vmem:[#allocation8 + $0x3e0] sm:$0xff]  ;;  %v8564_v40 = vcombine.low %v624_v27, %v628_v28  ;;  %v8575_v46 = vcombine.high %v633_v38, %v637_v39  ;;  %v10270_v49 = vrot.slane %v412_v37, %v10225_v63  ;;  %v645_v52 = vld [vmem:[#allocation8 + $0x428] sm:$0xff] }
  0x9f   :  { %6713 = vmatpush1.bf16.msra.mxu0 %v8508_v29  ;;  %7041 = vmatpush1.bf16.msra.mxu1 %v8510_v32  ;;  %v10257_v9 = vpack.c.bf16 %v427_v4, %v427_v4  ;;  %v625_v29 = vld [vmem:[#allocation8 + $0x388] sm:$0xff]  ;;  %v8558_v32 = vcombine.low %v617_v21, %v621_v22  ;;  %v644_v48 = vld [vmem:[#allocation8 + $0x420] sm:$0xff]  ;;  %v8583_v3 = vcombine.high %v641_v51, %v645_v52 }
  0xa0   :  { %6714 = vmatprep.subr.bf16.mxu0 %v8517_v33  ;;  %7042 = vmatprep.subr.bf16.mxu1 %v8519_v35  ;;  %v8565_v33 = vcombine.high %v624_v27, %v628_v28  ;;  %v8567_v34 = vcombine.high %v625_v29, %v629_v30  ;;  %v632_v35 = vld [vmem:[#allocation8 + $0x3c0] sm:$0xff]  ;;  %v10288_v11 = vpack.c.bf16 %v10253_v60, %v10253_v60  ;;  %v661_v22 = vld [vmem:[#allocation8 + $0x4a8] sm:$0xff] }
  0xa1   :  { %6730 = vmatprep.mubr.bf16.mxu0 %v10257_v9  ;;  %7058 = vmatprep.mubr.bf16.mxu1 %v10257_v9  ;;  %v648_v1 = vld [vmem:[#allocation8 + $0x440] sm:$0xff]  ;;  %v8582_v14 = vcombine.low %v641_v51, %v645_v52  ;;  %v283_v21 = vrot.slane %v10231_v6, %v10264_v41  ;;  %v669_v37 = vld [vmem:[#allocation8 + $0x4e8] sm:$0xff] }
  0xa2   :  { %v652_v4 = vld [vmem:[#allocation8 + $0x460] sm:$0xff] }
  0xa3   :  { %6715 = vmatpush1.bf16.msra.mxu0 %v8516_v42  ;;  %7043 = vmatpush1.bf16.msra.mxu1 %v8518_v44  ;;  %v10267_v42 = vsub.s32 5, %v10208_v43  ;;  %v8566_v44 = vcombine.low %v625_v29, %v629_v30  ;;  %v151_v43 = vrot.slane %v10222_v62, %v10280_v2  ;;  %v113_v30 = vld [vmem:[#allocation2 + $0x8] sm:$0xff]  ;;  %v672_v51 = vld [vmem:[#allocation8 + $0x500] sm:$0xff] }
  0xa4   :  { %6716 = vmatprep.subr.bf16.mxu0 %v8525_v45  ;;  %7044 = vmatprep.subr.bf16.mxu1 %v8527_v47  ;;  %v8573_v45 = vcombine.high %v632_v35, %v636_v36  ;;  %v640_v47 = vld [vmem:[#allocation8 + $0x400] sm:$0xff] }
  0xa5   :  { %v8581_v0 = vcombine.high %v640_v47, %v644_v48  ;;  %v8580_v12 = vcombine.low %v640_v47, %v644_v48  ;;  %v676_v52 = vld [vmem:[#allocation8 + $0x520] sm:$0xff] }
  0xa7   :  { %6717 = vmatpush1.bf16.msra.mxu0 %v8524_v55  ;;  %7045 = vmatpush1.bf16.msra.mxu1 %v8526_v56  ;;  %v8572_v55 = vcombine.low %v632_v35, %v636_v36  ;;  %v139_v56 = vrot.slane %v10222_v62, %v10264_v41  ;;  %v668_v35 = vld [vmem:[#allocation8 + $0x4e0] sm:$0xff]  ;;  %v665_v36 = vld [vmem:[#allocation8 + $0x4c8] sm:$0xff] }
  0xa8   :  { %6718 = vmatprep.subr.bf16.mxu0 %v8533_v59  ;;  %7046 = vmatprep.subr.bf16.mxu1 %v8535_v61  ;;  %v143_v59 = vrot.slane %v10222_v62, %v10267_v42  ;;  %v8574_v61 = vcombine.low %v633_v38, %v637_v39  ;;  %v8607_v48 = vcombine.high %v665_v36, %v669_v37 }
  0xaa   :  { %v201_v13 = vcombine.low %v139_v56, %v143_v59  ;;  %v677_v56 = vld [vmem:[#allocation8 + $0x528] sm:$0xff] }
  0xab   :  { %6719 = vmatpush1.bf16.msra.mxu0 %v8532_v5  ;;  %7047 = vmatpush1.bf16.msra.mxu1 %v8534_v7  ;;  %v649_v5 = vld [vmem:[#allocation8 + $0x448] sm:$0xff] }
  0xac   :  { %6720 = vmatprep.subr.bf16.mxu0 %v8541_v8  ;;  %7048 = vmatprep.subr.bf16.mxu1 %v8543_v10  ;;  %v653_v7 = vld [vmem:[#allocation8 + $0x468] sm:$0xff]  ;;  %v428_v8 = vcombine.high %v10270_v49, %v10270_v49  ;;  %v147_v10 = vrot.slane %v10222_v62, %v10273_v50  ;;  %v209_v60 = vrot.slane %v201_v13, %v10225_v63 }
  0xad   :  { %v657_v62 = vld [vmem:[#allocation8 + $0x488] sm:$0xff]  ;;  %v8590_v27 = vcombine.low %v649_v5, %v653_v7 }
  0xae   :  { %v10292_v19 = vpack.c.bf16 %v428_v8, %v428_v8  ;;  %v202_v20 = vcombine.low %v147_v10, %v151_v43  ;;  %v685_v8 = vld [vmem:[#allocation8 + $0x568] sm:$0xff]  ;;  %v8612_v10 = vcombine.low %v672_v51, %v676_v52 }
  0xaf   :  { %6721 = vmatpush1.bf16.msra.mxu0 %v8540_v15  ;;  %7049 = vmatpush1.bf16.msra.mxu1 %v8542_v16  ;;  %v8589_v15 = vcombine.high %v648_v1, %v652_v4  ;;  %v8591_v16 = vcombine.high %v649_v5, %v653_v7  ;;  %v684_v5 = vld [vmem:[#allocation8 + $0x560] sm:$0xff]  ;;  %v681_v7 = vld [vmem:[#allocation8 + $0x548] sm:$0xff] }
  0xb0   :  { %6722 = vmatprep.subr.bf16.mxu0 %v8549_v17  ;;  %7050 = vmatprep.subr.bf16.mxu1 %v8551_v18  ;;  %v656_v17 = vld [vmem:[#allocation8 + $0x480] sm:$0xff]  ;;  %v216_v28 = vrot.slane %v202_v20, %v10225_v63  ;;  %v8623_v13 = vcombine.high %v681_v7, %v685_v8  ;;  %v8622_v20 = vcombine.low %v681_v7, %v685_v8 }
  0xb1   :  { %v660_v18 = vld [vmem:[#allocation8 + $0x4a0] sm:$0xff] }
  0xb2   :  { %v8597_v29 = vcombine.high %v656_v17, %v660_v18 }
  0xb3   :  { %6723 = vmatpush1.bf16.msra.mxu0 %v8548_v23  ;;  %7051 = vmatpush1.bf16.msra.mxu1 %v8550_v24  ;;  %v287_v23 = vrot.slane %v10231_v6, %v10267_v42  ;;  %v291_v24 = vrot.slane %v10231_v6, %v10273_v50 }
  0xb4   :  { %6724 = vmatprep.subr.bf16.mxu0 %v8557_v25  ;;  %7052 = vmatprep.subr.bf16.mxu1 %v8559_v26  ;;  %v295_v25 = vrot.slane %v10231_v6, %v10280_v2  ;;  %v8588_v26 = vcombine.low %v648_v1, %v652_v4  ;;  %v217_v6 = vcombine.low %v209_v60, %v216_v28  ;;  %v680_v4 = vld [vmem:[#allocation8 + $0x540] sm:$0xff] }
  0xb5   :  { %v8613_v1 = vcombine.high %v672_v51, %v676_v52  ;;  %v8621_v43 = vcombine.high %v680_v4, %v684_v5  ;;  %v721_v51 = vld [vmem:[#allocation8 + $0x688] sm:$0xff] }
  0xb6   :  { %v725_v52 = vld [vmem:[#allocation8 + $0x6a8] sm:$0xff] }
  0xb7   :  { %6725 = vmatpush1.bf16.msra.mxu0 %v8556_v31  ;;  %7053 = vmatpush1.bf16.msra.mxu1 %v8558_v32  ;;  %v345_v31 = vcombine.low %v283_v21, %v287_v23  ;;  %v346_v32 = vcombine.low %v291_v24, %v295_v25  ;;  %v697_v23 = vld [vmem:[#allocation8 + $0x5c8] sm:$0xff]  ;;  %v8662_v8 = vcombine.low %v721_v51, %v725_v52 }
  0xb8   :  { %6726 = vmatprep.subr.bf16.mxu0 %v8565_v33  ;;  %7054 = vmatprep.subr.bf16.mxu1 %v8567_v34  ;;  %v8599_v33 = vcombine.high %v657_v62, %v661_v22  ;;  %v664_v34 = vld [vmem:[#allocation8 + $0x4c0] sm:$0xff]  ;;  %v701_v24 = vld [vmem:[#allocation8 + $0x5e8] sm:$0xff] }
  0xb9   :  { %v353_v38 = vrot.slane %v345_v31, %v10225_v63  ;;  %v360_v39 = vrot.slane %v346_v32, %v10225_v63  ;;  %v8639_v28 = vcombine.high %v697_v23, %v701_v24  ;;  %v705_v31 = vld [vmem:[#allocation8 + $0x608] sm:$0xff] }
  0xba   :  { %v709_v32 = vld [vmem:[#allocation8 + $0x628] sm:$0xff] }
  0xbb   :  { %6727 = vmatpush1.bf16.msra.mxu0 %v8564_v40  ;;  %7055 = vmatpush1.bf16.msra.mxu1 %v8566_v44  ;;  %v8596_v40 = vcombine.low %v656_v17, %v660_v18  ;;  %v257_v44 = vmul.f32 %v217_v6, %v113_v30  ;;  %v361_v47 = vcombine.low %v353_v38, %v360_v39  ;;  %v693_v17 = vld [vmem:[#allocation8 + $0x5a8] sm:$0xff]  ;;  %v708_v30 = vld [vmem:[#allocation8 + $0x620] sm:$0xff] }
  0xbc   :  { %6728 = vmatprep.subr.bf16.mxu0 %v8573_v45  ;;  %7056 = vmatprep.subr.bf16.mxu1 %v8575_v46  ;;  %v8598_v45 = vcombine.low %v657_v62, %v661_v22  ;;  %v8605_v46 = vcombine.high %v664_v34, %v668_v35  ;;  %v8620_v18 = vcombine.low %v680_v4, %v684_v5  ;;  %v696_v62 = vld [vmem:[#allocation8 + $0x5c0] sm:$0xff]  ;;  %v713_v38 = vld [vmem:[#allocation8 + $0x648] sm:$0xff] }
  0xbd   :  { %v10310_v59 = vadd.f32 %v361_v47, %v257_v44  ;;  %v700_v22 = vld [vmem:[#allocation8 + $0x5e0] sm:$0xff]  ;;  %v8647_v6 = vcombine.high %v705_v31, %v709_v32  ;;  %v717_v39 = vld [vmem:[#allocation8 + $0x668] sm:$0xff]  ;;  %v8646_v44 = vcombine.low %v705_v31, %v709_v32 }
  0xbe   :  { %v720_v47 = vld [vmem:[#allocation8 + $0x680] sm:$0xff]  ;;  %v729_v4 = vld [vmem:[#allocation8 + $0x6c8] sm:$0xff] }
  0xbf   :  { %6729 = vmatpush1.bf16.msra.mxu0 %v8572_v55  ;;  %7057 = vmatpush1.bf16.msra.mxu1 %v8574_v61  ;;  %v673_v55 = vld [vmem:[#allocation8 + $0x508] sm:$0xff]  ;;  %v8604_v61 = vcombine.low %v664_v34, %v668_v35  ;;  %v8638_v34 = vcombine.low %v697_v23, %v701_v24 }
  0xc0   :  { %6739 = vmatprep.subr.bf16.mxu0 %v8581_v0  ;;  %7067 = vmatprep.subr.bf16.mxu1 %v8583_v3  ;;  %v8606_v0 = vcombine.low %v665_v36, %v669_v37  ;;  %v8615_v3 = vcombine.high %v673_v55, %v677_v56  ;;  %v712_v36 = vld [vmem:[#allocation8 + $0x640] sm:$0xff]  ;;  %v733_v5 = vld [vmem:[#allocation8 + $0x6e8] sm:$0xff] }
  0xc1   :  { %v716_v37 = vld [vmem:[#allocation8 + $0x660] sm:$0xff] }
  0xc2   :  { %6731 = vmatmul.mubr.bf16.vlgmr.msra.gmra.mrb[0].mxu0 %v10288_v11  ;;  %7059 = vmatmul.mubr.bf16.vlgmr.msra.gmra.mrb[0].mxu1 %v10288_v11 }
  0xc3   :  { %6740 = vmatpush1.bf16.msra.mxu0 %v8580_v12  ;;  %7068 = vmatpush1.bf16.msra.mxu1 %v8582_v14  ;;  %v8614_v12 = vcombine.low %v673_v55, %v677_v56  ;;  %v688_v14 = vld [vmem:[#allocation8 + $0x580] sm:$0xff]  ;;  %v8652_v55 = vcombine.low %v712_v36, %v716_v37  ;;  %v8654_v56 = vcombine.low %v713_v38, %v717_v39 }
  0xc4   :  { %6741 = vmatprep.subr.bf16.mxu0 %v8589_v15  ;;  %7069 = vmatprep.subr.bf16.mxu1 %v8591_v16  ;;  %v692_v15 = vld [vmem:[#allocation8 + $0x5a0] sm:$0xff]  ;;  %v689_v16 = vld [vmem:[#allocation8 + $0x588] sm:$0xff] }
  0xc5   :  { %6771 = vmatprep.mubr.bf16.mxu0 %v10292_v19  ;;  %7099 = vmatprep.mubr.bf16.mxu1 %v10292_v19  ;;  %v8629_v60 = vcombine.high %v688_v14, %v692_v15  ;;  %v8631_v21 = vcombine.high %v689_v16, %v693_v17  ;;  %v8628_v25 = vcombine.low %v688_v14, %v692_v15  ;;  %v737_v14 = vld [vmem:[#allocation8 + $0x708] sm:$0xff] }
  0xc6   :  { %v741_v15 = vld [vmem:[#allocation8 + $0x728] sm:$0xff] }
  0xc7   :  { %6742 = vmatpush1.bf16.msra.mxu0 %v8588_v26  ;;  %7070 = vmatpush1.bf16.msra.mxu1 %v8590_v27  ;;  %v8630_v26 = vcombine.low %v689_v16, %v693_v17  ;;  %v8637_v27 = vcombine.high %v696_v62, %v700_v22  ;;  %v8670_v17 = vcombine.low %v729_v4, %v733_v5 }
  0xc8   :  { %6743 = vmatprep.subr.bf16.mxu0 %v8597_v29  ;;  %7071 = vmatprep.subr.bf16.mxu1 %v8599_v33  ;;  %v704_v29 = vld [vmem:[#allocation8 + $0x600] sm:$0xff]  ;;  %v8636_v33 = vcombine.low %v696_v62, %v700_v22  ;;  %v745_v62 = vld [vmem:[#allocation8 + $0x748] sm:$0xff]  ;;  %v8678_v24 = vcombine.low %v737_v14, %v741_v15 }
  0xc9   :  { %v8645_v35 = vcombine.high %v704_v29, %v708_v30  ;;  %v749_v22 = vld [vmem:[#allocation8 + $0x768] sm:$0xff] }
  0xca   :  { %v8686_v32 = vcombine.low %v745_v62, %v749_v22 }
  0xcb   :  { %6744 = vmatpush1.bf16.msra.mxu0 %v8596_v40  ;;  %7072 = vmatpush1.bf16.msra.mxu1 %v8598_v45  ;;  %v8644_v40 = vcombine.low %v704_v29, %v708_v30  ;;  %v8653_v45 = vcombine.high %v712_v36, %v716_v37  ;;  %v753_v29 = vld [vmem:[#allocation8 + $0x788] sm:$0xff]  ;;  %v10313_v36 = vmax.f32 %v10310_v59, 0.0 }
  0xcc   :  { %6745 = vmatprep.subr.bf16.mxu0 %v8605_v46  ;;  %7073 = vmatprep.subr.bf16.mxu1 %v8607_v48  ;;  %v8655_v46 = vcombine.high %v713_v38, %v717_v39  ;;  %v724_v48 = vld [vmem:[#allocation8 + $0x6a0] sm:$0xff]  ;;  %v757_v30 = vld [vmem:[#allocation8 + $0x7a8] sm:$0xff] }
  0xcd   :  { %v8660_v7 = vcombine.low %v720_v47, %v724_v48  ;;  %v761_v37 = vld [vmem:[#allocation8 + $0x7c8] sm:$0xff] }
  0xce   :  { %v765_v38 = vld [vmem:[#allocation8 + $0x7e8] sm:$0xff] }
  0xcf   :  { %6746 = vmatpush1.bf16.msra.mxu0 %v8604_v61  ;;  %7074 = vmatpush1.bf16.msra.mxu1 %v8606_v0  ;;  %v8661_v61 = vcombine.high %v720_v47, %v724_v48  ;;  %v8663_v0 = vcombine.high %v721_v51, %v725_v52  ;;  %v772_v47 = vld [vmem:[#allocation8 + $0x820] sm:$0xff]  ;;  %v10317_v48 = vrot.slane %v10313_v36, %v10225_v63  ;;  %v769_v51 = vld [vmem:[#allocation8 + $0x808] sm:$0xff] }
  0xd0   :  { %6747 = vmatprep.subr.bf16.mxu0 %v8613_v1  ;;  %7075 = vmatprep.subr.bf16.mxu1 %v8615_v3  ;;  %v728_v1 = vld [vmem:[#allocation8 + $0x6c0] sm:$0xff]  ;;  %v773_v52 = vld [vmem:[#allocation8 + $0x828] sm:$0xff] }
  0xd1   :  { %v732_v3 = vld [vmem:[#allocation8 + $0x6e0] sm:$0xff] }
  0xd2   :  { %v8668_v16 = vcombine.low %v728_v1, %v732_v3 }
  0xd3   :  { %6748 = vmatpush1.bf16.msra.mxu0 %v8612_v10  ;;  %7076 = vmatpush1.bf16.msra.mxu1 %v8614_v12  ;;  %v8669_v10 = vcombine.high %v728_v1, %v732_v3  ;;  %v8671_v12 = vcombine.high %v729_v4, %v733_v5  ;;  %v780_v1 = vld [vmem:[#allocation8 + $0x860] sm:$0xff]  ;;  %v444_v3 = vcombine.high %v10317_v48, %v10317_v48  ;;  %v777_v5 = vld [vmem:[#allocation8 + $0x848] sm:$0xff] }
  0xd4   :  { %6749 = vmatprep.subr.bf16.mxu0 %v8621_v43  ;;  %7077 = vmatprep.subr.bf16.mxu1 %v8623_v13  ;;  %v736_v43 = vld [vmem:[#allocation8 + $0x700] sm:$0xff]  ;;  %v10323_v4 = vpack.c.bf16 %v10270_v49, %v10270_v49 }
  0xd5   :  { %v740_v13 = vld [vmem:[#allocation8 + $0x720] sm:$0xff] }
  0xd6   :  { %v8676_v23 = vcombine.low %v736_v43, %v740_v13 }
  0xd7   :  { %6750 = vmatpush1.bf16.msra.mxu0 %v8620_v18  ;;  %7078 = vmatpush1.bf16.msra.mxu1 %v8622_v20  ;;  %v8677_v18 = vcombine.high %v736_v43, %v740_v13  ;;  %v8679_v20 = vcombine.high %v737_v14, %v741_v15  ;;  %v784_v13 = vld [vmem:[#allocation8 + $0x880] sm:$0xff]  ;;  %v10325_v15 = vpack.c.bf16 %v444_v3, %v444_v3 }
  0xd8   :  { %6751 = vmatprep.subr.bf16.mxu0 %v8629_v60  ;;  %7079 = vmatprep.subr.bf16.mxu1 %v8631_v21  ;;  %v744_v60 = vld [vmem:[#allocation8 + $0x740] sm:$0xff] }
  0xd9   :  { %v748_v21 = vld [vmem:[#allocation8 + $0x760] sm:$0xff] }
  0xda   :  { %v8684_v31 = vcombine.low %v744_v60, %v748_v21  ;;  %v788_v14 = vld [vmem:[#allocation8 + $0x8a0] sm:$0xff] }
  0xdb   :  { %6752 = vmatpush1.bf16.msra.mxu0 %v8628_v25  ;;  %7080 = vmatpush1.bf16.msra.mxu1 %v8630_v26  ;;  %v8685_v25 = vcombine.high %v744_v60, %v748_v21  ;;  %v8687_v26 = vcombine.high %v745_v62, %v749_v22  ;;  %v792_v21 = vld [vmem:[#allocation8 + $0x8c0] sm:$0xff]  ;;  %v793_v22 = vld [vmem:[#allocation8 + $0x8c8] sm:$0xff] }
  0xdc   :  { %6753 = vmatprep.subr.bf16.mxu0 %v8637_v27  ;;  %7081 = vmatprep.subr.bf16.mxu1 %v8639_v28  ;;  %v752_v27 = vld [vmem:[#allocation8 + $0x780] sm:$0xff] }
  0xdd   :  { %v756_v28 = vld [vmem:[#allocation8 + $0x7a0] sm:$0xff] }
  0xde   :  { %v8692_v39 = vcombine.low %v752_v27, %v756_v28  ;;  %v796_v62 = vld [vmem:[#allocation8 + $0x8e0] sm:$0xff] }
  0xdf   :  { %6754 = vmatpush1.bf16.msra.mxu0 %v8636_v33  ;;  %7082 = vmatpush1.bf16.msra.mxu1 %v8638_v34  ;;  %v8693_v33 = vcombine.high %v752_v27, %v756_v28  ;;  %v8695_v34 = vcombine.high %v753_v29, %v757_v30  ;;  %v800_v28 = vld [vmem:[#allocation8 + $0x900] sm:$0xff] }
  0xe0   :  { %6755 = vmatprep.subr.bf16.mxu0 %v8645_v35  ;;  %7083 = vmatprep.subr.bf16.mxu1 %v8647_v6  ;;  %v760_v35 = vld [vmem:[#allocation8 + $0x7c0] sm:$0xff] }
  0xe1   :  { %v764_v6 = vld [vmem:[#allocation8 + $0x7e0] sm:$0xff] }
  0xe2   :  { %v8700_v59 = vcombine.low %v760_v35, %v764_v6  ;;  %v828_v3 = vld [vmem:[#allocation8 + $0x9e0] sm:$0xff] }
  0xe3   :  { %6756 = vmatpush1.bf16.msra.mxu0 %v8644_v40  ;;  %7084 = vmatpush1.bf16.msra.mxu1 %v8646_v44  ;;  %v8694_v40 = vcombine.low %v753_v29, %v757_v30  ;;  %v8701_v44 = vcombine.high %v760_v35, %v764_v6  ;;  %v804_v29 = vld [vmem:[#allocation8 + $0x920] sm:$0xff]  ;;  %v801_v30 = vld [vmem:[#allocation8 + $0x908] sm:$0xff] }
  0xe4   :  { %6757 = vmatprep.subr.bf16.mxu0 %v8653_v45  ;;  %7085 = vmatprep.subr.bf16.mxu1 %v8655_v46  ;;  %v8703_v45 = vcombine.high %v761_v37, %v765_v38  ;;  %v768_v46 = vld [vmem:[#allocation8 + $0x800] sm:$0xff] }
  0xe5   :  { %v808_v6 = vld [vmem:[#allocation8 + $0x940] sm:$0xff] }
  0xe7   :  { %6758 = vmatpush1.bf16.msra.mxu0 %v8652_v55  ;;  %7086 = vmatpush1.bf16.msra.mxu1 %v8654_v56  ;;  %v8702_v55 = vcombine.low %v761_v37, %v765_v38  ;;  %v8709_v56 = vcombine.high %v768_v46, %v772_v47  ;;  %v812_v37 = vld [vmem:[#allocation8 + $0x960] sm:$0xff]  ;;  %v809_v38 = vld [vmem:[#allocation8 + $0x948] sm:$0xff] }
  0xe8   :  { %6759 = vmatprep.subr.bf16.mxu0 %v8661_v61  ;;  %7087 = vmatprep.subr.bf16.mxu1 %v8663_v0  ;;  %v8711_v61 = vcombine.high %v769_v51, %v773_v52  ;;  %v776_v0 = vld [vmem:[#allocation8 + $0x840] sm:$0xff] }
  0xe9   :  { %v8716_v49 = vcombine.low %v776_v0, %v780_v1 }
  0xeb   :  { %6760 = vmatpush1.bf16.msra.mxu0 %v8660_v7  ;;  %7088 = vmatpush1.bf16.msra.mxu1 %v8662_v8  ;;  %v781_v7 = vld [vmem:[#allocation8 + $0x868] sm:$0xff]  ;;  %v8708_v8 = vcombine.low %v768_v46, %v772_v47  ;;  %v816_v47 = vld [vmem:[#allocation8 + $0x980] sm:$0xff] }
  0xec   :  { %6761 = vmatprep.subr.bf16.mxu0 %v8669_v10  ;;  %7089 = vmatprep.subr.bf16.mxu1 %v8671_v12  ;;  %v8710_v10 = vcombine.low %v769_v51, %v773_v52  ;;  %v8717_v12 = vcombine.high %v776_v0, %v780_v1  ;;  %v8719_v43 = vcombine.high %v777_v5, %v781_v7  ;;  %v820_v51 = vld [vmem:[#allocation8 + $0x9a0] sm:$0xff]  ;;  %v817_v52 = vld [vmem:[#allocation8 + $0x988] sm:$0xff] }
  0xed   :  { %v824_v1 = vld [vmem:[#allocation8 + $0x9c0] sm:$0xff] }
  0xef   :  { %6762 = vmatpush1.bf16.msra.mxu0 %v8668_v16  ;;  %7090 = vmatpush1.bf16.msra.mxu1 %v8670_v17  ;;  %v785_v16 = vld [vmem:[#allocation8 + $0x888] sm:$0xff] }
  0xf0   :  { %6763 = vmatprep.subr.bf16.mxu0 %v8677_v18  ;;  %7091 = vmatprep.subr.bf16.mxu1 %v8679_v20  ;;  %v789_v17 = vld [vmem:[#allocation8 + $0x8a8] sm:$0xff]  ;;  %v8718_v18 = vcombine.low %v777_v5, %v781_v7  ;;  %v8725_v20 = vcombine.high %v784_v13, %v788_v14 }
  0xf1   :  { %v8727_v60 = vcombine.high %v785_v16, %v789_v17  ;;  %v825_v5 = vld [vmem:[#allocation8 + $0x9c8] sm:$0xff] }
  0xf2   :  { %v829_v7 = vld [vmem:[#allocation8 + $0x9e8] sm:$0xff] }
  0xf3   :  { %6764 = vmatpush1.bf16.msra.mxu0 %v8676_v23  ;;  %7092 = vmatpush1.bf16.msra.mxu1 %v8678_v24  ;;  %v797_v23 = vld [vmem:[#allocation8 + $0x8e8] sm:$0xff]  ;;  %v8724_v24 = vcombine.low %v784_v13, %v788_v14  ;;  %v832_v13 = vld [vmem:[#allocation8 + $0xa00] sm:$0xff] }
  0xf4   :  { %6765 = vmatprep.subr.bf16.mxu0 %v8685_v25  ;;  %7093 = vmatprep.subr.bf16.mxu1 %v8687_v26  ;;  %v8726_v25 = vcombine.low %v785_v16, %v789_v17  ;;  %v8733_v26 = vcombine.high %v792_v21, %v796_v62  ;;  %v8735_v27 = vcombine.high %v793_v22, %v797_v23  ;;  %v836_v14 = vld [vmem:[#allocation8 + $0xa20] sm:$0xff]  ;;  %v833_v16 = vld [vmem:[#allocation8 + $0xa08] sm:$0xff] }
  0xf5   :  { %v837_v17 = vld [vmem:[#allocation8 + $0xa28] sm:$0xff] }
  0xf7   :  { %6766 = vmatpush1.bf16.msra.mxu0 %v8684_v31  ;;  %7094 = vmatpush1.bf16.msra.mxu1 %v8686_v32  ;;  %v805_v31 = vld [vmem:[#allocation8 + $0x928] sm:$0xff]  ;;  %v8732_v32 = vcombine.low %v792_v21, %v796_v62  ;;  %v840_v21 = vld [vmem:[#allocation8 + $0xa40] sm:$0xff] }
  0xf8   :  { %6767 = vmatprep.subr.bf16.mxu0 %v8693_v33  ;;  %7095 = vmatprep.subr.bf16.mxu1 %v8695_v34  ;;  %v8734_v33 = vcombine.low %v793_v22, %v797_v23  ;;  %v8741_v34 = vcombine.high %v800_v28, %v804_v29  ;;  %v8743_v35 = vcombine.high %v801_v30, %v805_v31  ;;  %v844_v62 = vld [vmem:[#allocation8 + $0xa60] sm:$0xff]  ;;  %v841_v22 = vld [vmem:[#allocation8 + $0xa48] sm:$0xff] }
  0xf9   :  { %v845_v23 = vld [vmem:[#allocation8 + $0xa68] sm:$0xff] }
  0xfb   :  { %6768 = vmatpush1.bf16.msra.mxu0 %v8692_v39  ;;  %7096 = vmatpush1.bf16.msra.mxu1 %v8694_v40  ;;  %v813_v39 = vld [vmem:[#allocation8 + $0x968] sm:$0xff]  ;;  %v8740_v40 = vcombine.low %v800_v28, %v804_v29  ;;  %v848_v28 = vld [vmem:[#allocation8 + $0xa80] sm:$0xff] }
  0xfc   :  { %6769 = vmatprep.subr.bf16.mxu0 %v8701_v44  ;;  %7097 = vmatprep.subr.bf16.mxu1 %v8703_v45  ;;  %v8742_v44 = vcombine.low %v801_v30, %v805_v31  ;;  %v8749_v45 = vcombine.high %v808_v6, %v812_v37  ;;  %v8751_v46 = vcombine.high %v809_v38, %v813_v39  ;;  %v852_v29 = vld [vmem:[#allocation8 + $0xaa0] sm:$0xff]  ;;  %v849_v30 = vld [vmem:[#allocation8 + $0xa88] sm:$0xff] }
  0xfd   :  { %v853_v31 = vld [vmem:[#allocation8 + $0xaa8] sm:$0xff] }
  0xff   :  { %6770 = vmatpush1.bf16.msra.mxu0 %v8700_v59  ;;  %7098 = vmatpush1.bf16.msra.mxu1 %v8702_v55  ;;  %v821_v59 = vld [vmem:[#allocation8 + $0x9a8] sm:$0xff]  ;;  %v8748_v55 = vcombine.low %v808_v6, %v812_v37  ;;  %v856_v6 = vld [vmem:[#allocation8 + $0xac0] sm:$0xff] }
 0x100   :  { %6780 = vmatprep.subr.bf16.mxu0 %v8709_v56  ;;  %7108 = vmatprep.subr.bf16.mxu1 %v8711_v61  ;;  %v8750_v56 = vcombine.low %v809_v38, %v813_v39  ;;  %v8757_v61 = vcombine.high %v816_v47, %v820_v51  ;;  %v8759_v0 = vcombine.high %v817_v52, %v821_v59  ;;  %v860_v37 = vld [vmem:[#allocation8 + $0xae0] sm:$0xff]  ;;  %v857_v38 = vld [vmem:[#allocation8 + $0xac8] sm:$0xff] }
 0x101   :  { %v861_v39 = vld [vmem:[#allocation8 + $0xae8] sm:$0xff] }
 0x102   :  { %6772 = vmatmul.mubr.bf16.vlgmr.msra.gmra.mrb[0].mxu0 %v10323_v4  ;;  %7100 = vmatmul.mubr.bf16.vlgmr.msra.gmra.mrb[0].mxu1 %v10323_v4 }
 0x103   :  { %6781 = vmatpush1.bf16.msra.mxu0 %v8708_v8  ;;  %7109 = vmatpush1.bf16.msra.mxu1 %v8710_v10  ;;  %v8756_v8 = vcombine.low %v816_v47, %v820_v51  ;;  %v8758_v10 = vcombine.low %v817_v52, %v821_v59  ;;  %v864_v47 = vld [vmem:[#allocation8 + $0xb00] sm:$0xff]  ;;  %v865_v52 = vld [vmem:[#allocation8 + $0xb08] sm:$0xff] }
 0x104   :  { %6782 = vmatprep.subr.bf16.mxu0 %v8717_v12  ;;  %7110 = vmatprep.subr.bf16.mxu1 %v8719_v43  ;;  %v8765_v12 = vcombine.high %v824_v1, %v828_v3  ;;  %v8767_v43 = vcombine.high %v825_v5, %v829_v7  ;;  %v868_v51 = vld [vmem:[#allocation8 + $0xb20] sm:$0xff]  ;;  %v869_v59 = vld [vmem:[#allocation8 + $0xb28] sm:$0xff] }
 0x105   :  { %6812 = vmatprep.mubr.bf16.mxu0 %v10325_v15  ;;  %7140 = vmatprep.mubr.bf16.mxu1 %v10325_v15 }
 0x107   :  { %6783 = vmatpush1.bf16.msra.mxu0 %v8716_v49  ;;  %7111 = vmatpush1.bf16.msra.mxu1 %v8718_v18  ;;  %v8764_v49 = vcombine.low %v824_v1, %v828_v3  ;;  %v8766_v18 = vcombine.low %v825_v5, %v829_v7  ;;  %v872_v1 = vld [vmem:[#allocation8 + $0xb40] sm:$0xff]  ;;  %v873_v5 = vld [vmem:[#allocation8 + $0xb48] sm:$0xff] }
 0x108   :  { %6784 = vmatprep.subr.bf16.mxu0 %v8725_v20  ;;  %7112 = vmatprep.subr.bf16.mxu1 %v8727_v60  ;;  %v8773_v20 = vcombine.high %v832_v13, %v836_v14  ;;  %v8775_v60 = vcombine.high %v833_v16, %v837_v17  ;;  %v876_v3 = vld [vmem:[#allocation8 + $0xb60] sm:$0xff]  ;;  %v877_v7 = vld [vmem:[#allocation8 + $0xb68] sm:$0xff] }
 0x10b   :  { %6785 = vmatpush1.bf16.msra.mxu0 %v8724_v24  ;;  %7113 = vmatpush1.bf16.msra.mxu1 %v8726_v25  ;;  %v8772_v24 = vcombine.low %v832_v13, %v836_v14  ;;  %v8774_v25 = vcombine.low %v833_v16, %v837_v17  ;;  %v880_v13 = vld [vmem:[#allocation8 + $0xb80] sm:$0xff]  ;;  %v881_v16 = vld [vmem:[#allocation8 + $0xb88] sm:$0xff] }
 0x10c   :  { %6786 = vmatprep.subr.bf16.mxu0 %v8733_v26  ;;  %7114 = vmatprep.subr.bf16.mxu1 %v8735_v27  ;;  %v8781_v26 = vcombine.high %v840_v21, %v844_v62  ;;  %v8783_v27 = vcombine.high %v841_v22, %v845_v23  ;;  %v884_v14 = vld [vmem:[#allocation8 + $0xba0] sm:$0xff]  ;;  %v885_v17 = vld [vmem:[#allocation8 + $0xba8] sm:$0xff] }
 0x10f   :  { %6787 = vmatpush1.bf16.msra.mxu0 %v8732_v32  ;;  %7115 = vmatpush1.bf16.msra.mxu1 %v8734_v33  ;;  %v8780_v32 = vcombine.low %v840_v21, %v844_v62  ;;  %v8782_v33 = vcombine.low %v841_v22, %v845_v23  ;;  %v888_v21 = vld [vmem:[#allocation8 + $0xbc0] sm:$0xff]  ;;  %v429_v22 = vcombine.high %v10313_v36, %v10313_v36  ;;  %v889_v23 = vld [vmem:[#allocation8 + $0xbc8] sm:$0xff] }
 0x110   :  { %6788 = vmatprep.subr.bf16.mxu0 %v8741_v34  ;;  %7116 = vmatprep.subr.bf16.mxu1 %v8743_v35  ;;  %v8789_v34 = vcombine.high %v848_v28, %v852_v29  ;;  %v8791_v35 = vcombine.high %v849_v30, %v853_v31  ;;  %v892_v62 = vld [vmem:[#allocation8 + $0xbe0] sm:$0xff] }
 0x113   :  { %6789 = vmatpush1.bf16.msra.mxu0 %v8740_v40  ;;  %7117 = vmatpush1.bf16.msra.mxu1 %v8742_v44  ;;  %v8788_v40 = vcombine.low %v848_v28, %v852_v29  ;;  %v8790_v44 = vcombine.low %v849_v30, %v853_v31  ;;  %v896_v29 = vld [vmem:[#allocation8 + $0xc00] sm:$0xff]  ;;  %v10334_v31 = vrot.slane %v429_v22, %v10225_v63 }
 0x114   :  { %6790 = vmatprep.subr.bf16.mxu0 %v8749_v45  ;;  %7118 = vmatprep.subr.bf16.mxu1 %v8751_v46  ;;  %v8797_v45 = vcombine.high %v856_v6, %v860_v37  ;;  %v8799_v46 = vcombine.high %v857_v38, %v861_v39  ;;  %v900_v30 = vld [vmem:[#allocation8 + $0xc20] sm:$0xff] }
 0x117   :  { %6791 = vmatpush1.bf16.msra.mxu0 %v8748_v55  ;;  %7119 = vmatpush1.bf16.msra.mxu1 %v8750_v56  ;;  %v8796_v55 = vcombine.low %v856_v6, %v860_v37  ;;  %v8798_v56 = vcombine.low %v857_v38, %v861_v39  ;;  %v904_v37 = vld [vmem:[#allocation8 + $0xc40] sm:$0xff]  ;;  %v445_v39 = vcombine.high %v10334_v31, %v10334_v31 }
 0x118   :  { %6792 = vmatprep.subr.bf16.mxu0 %v8757_v61  ;;  %7120 = vmatprep.subr.bf16.mxu1 %v8759_v0  ;;  %v8805_v61 = vcombine.high %v864_v47, %v868_v51  ;;  %v8807_v0 = vcombine.high %v865_v52, %v869_v59  ;;  %v908_v38 = vld [vmem:[#allocation8 + $0xc60] sm:$0xff] }
 0x11b   :  { %6793 = vmatpush1.bf16.msra.mxu0 %v8756_v8  ;;  %7121 = vmatpush1.bf16.msra.mxu1 %v8758_v10  ;;  %v8804_v8 = vcombine.low %v864_v47, %v868_v51  ;;  %v8806_v10 = vcombine.low %v865_v52, %v869_v59  ;;  %v8845_v51 = vcombine.high %v904_v37, %v908_v38  ;;  %v912_v59 = vld [vmem:[#allocation8 + $0xc80] sm:$0xff] }
 0x11c   :  { %6794 = vmatprep.subr.bf16.mxu0 %v8765_v12  ;;  %7122 = vmatprep.subr.bf16.mxu1 %v8767_v43  ;;  %v8813_v12 = vcombine.high %v872_v1, %v876_v3  ;;  %v8815_v43 = vcombine.high %v873_v5, %v877_v7 }
 0x11f   :  { %6795 = vmatpush1.bf16.msra.mxu0 %v8764_v49  ;;  %7123 = vmatpush1.bf16.msra.mxu1 %v8766_v18  ;;  %v8812_v49 = vcombine.low %v872_v1, %v876_v3  ;;  %v8814_v18 = vcombine.low %v873_v5, %v877_v7  ;;  %v920_v7 = vld [vmem:[#allocation8 + $0xcc0] sm:$0xff] }
 0x120   :  { %6796 = vmatprep.subr.bf16.mxu0 %v8773_v20  ;;  %7124 = vmatprep.subr.bf16.mxu1 %v8775_v60  ;;  %v8821_v20 = vcombine.high %v880_v13, %v884_v14  ;;  %v8823_v60 = vcombine.high %v881_v16, %v885_v17 }
 0x123   :  { %6797 = vmatpush1.bf16.msra.mxu0 %v8772_v24  ;;  %7125 = vmatpush1.bf16.msra.mxu1 %v8774_v25  ;;  %v893_v24 = vld [vmem:[#allocation8 + $0xbe8] sm:$0xff]  ;;  %v8820_v25 = vcombine.low %v880_v13, %v884_v14 }
 0x124   :  { %6798 = vmatprep.subr.bf16.mxu0 %v8781_v26  ;;  %7126 = vmatprep.subr.bf16.mxu1 %v8783_v27  ;;  %v8822_v26 = vcombine.low %v881_v16, %v885_v17  ;;  %v8829_v27 = vcombine.high %v888_v21, %v892_v62  ;;  %v8831_v28 = vcombine.high %v889_v23, %v893_v24  ;;  %v928_v17 = vld [vmem:[#allocation8 + $0xd00] sm:$0xff] }
 0x125   :  { %v8830_v36 = vcombine.low %v889_v23, %v893_v24  ;;  %v936_v23 = vld [vmem:[#allocation8 + $0xd40] sm:$0xff] }
 0x126   :  { %v940_v24 = vld [vmem:[#allocation8 + $0xd60] sm:$0xff] }
 0x127   :  { %6799 = vmatpush1.bf16.msra.mxu0 %v8780_v32  ;;  %7127 = vmatpush1.bf16.msra.mxu1 %v8782_v33  ;;  %v897_v32 = vld [vmem:[#allocation8 + $0xc08] sm:$0xff] }
 0x128   :  { %6800 = vmatprep.subr.bf16.mxu0 %v8789_v34  ;;  %7128 = vmatprep.subr.bf16.mxu1 %v8791_v35  ;;  %v901_v33 = vld [vmem:[#allocation8 + $0xc28] sm:$0xff]  ;;  %v8828_v34 = vcombine.low %v888_v21, %v892_v62  ;;  %v8837_v35 = vcombine.high %v896_v29, %v900_v30 }
 0x129   :  { %v8839_v6 = vcombine.high %v897_v32, %v901_v33  ;;  %v8838_v47 = vcombine.low %v897_v32, %v901_v33  ;;  %v944_v32 = vld [vmem:[#allocation8 + $0xd80] sm:$0xff] }
 0x12a   :  { %v948_v33 = vld [vmem:[#allocation8 + $0xda0] sm:$0xff] }
 0x12b   :  { %6801 = vmatpush1.bf16.msra.mxu0 %v8788_v40  ;;  %7129 = vmatpush1.bf16.msra.mxu1 %v8790_v44  ;;  %v10340_v40 = vpack.c.bf16 %v10317_v48, %v10317_v48  ;;  %v905_v44 = vld [vmem:[#allocation8 + $0xc48] sm:$0xff]  ;;  %v8844_v48 = vcombine.low %v904_v37, %v908_v38  ;;  %v8885_v37 = vcombine.high %v944_v32, %v948_v33 }
 0x12c   :  { %6802 = vmatprep.subr.bf16.mxu0 %v8797_v45  ;;  %7130 = vmatprep.subr.bf16.mxu1 %v8799_v46  ;;  %v909_v45 = vld [vmem:[#allocation8 + $0xc68] sm:$0xff]  ;;  %v8836_v46 = vcombine.low %v896_v29, %v900_v30  ;;  %v8877_v29 = vcombine.high %v936_v23, %v940_v24 }
 0x12d   :  { %v8847_v52 = vcombine.high %v905_v44, %v909_v45  ;;  %v8846_v1 = vcombine.low %v905_v44, %v909_v45  ;;  %v956_v44 = vld [vmem:[#allocation8 + $0xde0] sm:$0xff]  ;;  %v953_v45 = vld [vmem:[#allocation8 + $0xdc8] sm:$0xff] }
 0x12f   :  { %6803 = vmatpush1.bf16.msra.mxu0 %v8796_v55  ;;  %7131 = vmatpush1.bf16.msra.mxu1 %v8798_v56  ;;  %v916_v55 = vld [vmem:[#allocation8 + $0xca0] sm:$0xff]  ;;  %v10342_v56 = vpack.c.bf16 %v445_v39, %v445_v39 }
 0x130   :  { %6804 = vmatprep.subr.bf16.mxu0 %v8805_v61  ;;  %7132 = vmatprep.subr.bf16.mxu1 %v8807_v0  ;;  %v913_v61 = vld [vmem:[#allocation8 + $0xc88] sm:$0xff]  ;;  %v8853_v3 = vcombine.high %v912_v59, %v916_v55  ;;  %v952_v39 = vld [vmem:[#allocation8 + $0xdc0] sm:$0xff] }
 0x131   :  { %v917_v0 = vld [vmem:[#allocation8 + $0xca8] sm:$0xff] }
 0x132   :  { %v8855_v5 = vcombine.high %v913_v61, %v917_v0  ;;  %v8854_v13 = vcombine.low %v913_v61, %v917_v0  ;;  %v10348_v61 = vld [vmem:[#allocation5 + $0x8] sm:$0xff] }
 0x133   :  { %6805 = vmatpush1.bf16.msra.mxu0 %v8804_v8  ;;  %7133 = vmatpush1.bf16.msra.mxu1 %v8806_v10  ;;  %v924_v8 = vld [vmem:[#allocation8 + $0xce0] sm:$0xff]  ;;  %v921_v10 = vld [vmem:[#allocation8 + $0xcc8] sm:$0xff] }
 0x134   :  { %6806 = vmatprep.subr.bf16.mxu0 %v8813_v12  ;;  %7134 = vmatprep.subr.bf16.mxu1 %v8815_v43  ;;  %v925_v12 = vld [vmem:[#allocation8 + $0xce8] sm:$0xff]  ;;  %v8852_v43 = vcombine.low %v912_v59, %v916_v55  ;;  %v8861_v14 = vcombine.high %v920_v7, %v924_v8  ;;  %v960_v59 = vld [vmem:[#allocation8 + $0xe00] sm:$0xff] }
 0x135   :  { %v8863_v16 = vcombine.high %v921_v10, %v925_v12  ;;  %v8862_v21 = vcombine.low %v921_v10, %v925_v12  ;;  %v964_v55 = vld [vmem:[#allocation8 + $0xe20] sm:$0xff] }
 0x136   :  { %v968_v10 = vld [vmem:[#allocation8 + $0xe40] sm:$0xff] }
 0x137   :  { %6807 = vmatpush1.bf16.msra.mxu0 %v8812_v49  ;;  %7135 = vmatpush1.bf16.msra.mxu1 %v8814_v18  ;;  %v932_v49 = vld [vmem:[#allocation8 + $0xd20] sm:$0xff]  ;;  %v929_v18 = vld [vmem:[#allocation8 + $0xd08] sm:$0xff] }
 0x138   :  { %6808 = vmatprep.subr.bf16.mxu0 %v8821_v20  ;;  %7136 = vmatprep.subr.bf16.mxu1 %v8823_v60  ;;  %v933_v20 = vld [vmem:[#allocation8 + $0xd28] sm:$0xff]  ;;  %v8860_v60 = vcombine.low %v920_v7, %v924_v8  ;;  %v8869_v62 = vcombine.high %v928_v17, %v932_v49  ;;  %v8901_v7 = vcombine.high %v960_v59, %v964_v55  ;;  %v972_v12 = vld [vmem:[#allocation8 + $0xe60] sm:$0xff] }
 0x139   :  { %v8871_v22 = vcombine.high %v929_v18, %v933_v20  ;;  %v155_v8 = vrot.slane %v10348_v61, %v10211_v53 }
 0x13b   :  { %6809 = vmatpush1.bf16.msra.mxu0 %v8820_v25  ;;  %7137 = vmatpush1.bf16.msra.mxu1 %v8822_v26  ;;  %v937_v25 = vld [vmem:[#allocation8 + $0xd48] sm:$0xff] }
 0x13c   :  { %6810 = vmatprep.subr.bf16.mxu0 %v8829_v27  ;;  %7138 = vmatprep.subr.bf16.mxu1 %v8831_v28  ;;  %v941_v26 = vld [vmem:[#allocation8 + $0xd68] sm:$0xff]  ;;  %v8868_v27 = vcombine.low %v928_v17, %v932_v49  ;;  %v8870_v28 = vcombine.low %v929_v18, %v933_v20  ;;  %v10358_v18 = vld [vmem:[#allocation7 + $0x8] sm:$0xff]  ;;  %v8900_v20 = vcombine.low %v960_v59, %v964_v55 }
 0x13d   :  { %v8879_v30 = vcombine.high %v937_v25, %v941_v26  ;;  %v969_v17 = vld [vmem:[#allocation8 + $0xe48] sm:$0xff] }
 0x13e   :  { %v973_v49 = vld [vmem:[#allocation8 + $0xe68] sm:$0xff] }
 0x13f   :  { %6811 = vmatpush1.bf16.msra.mxu0 %v8828_v34  ;;  %7139 = vmatpush1.bf16.msra.mxu1 %v8830_v36  ;;  %v945_v34 = vld [vmem:[#allocation8 + $0xd88] sm:$0xff] }
 0x140   :  { %6821 = vmatprep.subr.bf16.mxu0 %v8837_v35  ;;  %7149 = vmatprep.subr.bf16.mxu1 %v8839_v6  ;;  %v949_v36 = vld [vmem:[#allocation8 + $0xda8] sm:$0xff]  ;;  %v8876_v35 = vcombine.low %v936_v23, %v940_v24  ;;  %v8878_v6 = vcombine.low %v937_v25, %v941_v26  ;;  %v980_v25 = vld [vmem:[#allocation8 + $0xea0] sm:$0xff] }
 0x141   :  { %v8887_v38 = vcombine.high %v945_v34, %v949_v36  ;;  %v977_v26 = vld [vmem:[#allocation8 + $0xe88] sm:$0xff] }
 0x142   :  { %6813 = vmatmul.mubr.bf16.vlgmr.msra.gmra.mrb[0].mxu0 %v10340_v40  ;;  %7141 = vmatmul.mubr.bf16.vlgmr.msra.gmra.mrb[0].mxu1 %v10340_v40 }
 0x143   :  { %6822 = vmatpush1.bf16.msra.mxu0 %v8836_v46  ;;  %7150 = vmatpush1.bf16.msra.mxu1 %v8838_v47  ;;  %v957_v46 = vld [vmem:[#allocation8 + $0xde8] sm:$0xff]  ;;  %v8884_v47 = vcombine.low %v944_v32, %v948_v33  ;;  %v311_v32 = vrot.slane %v10358_v18, %v10220_v58  ;;  %v8908_v33 = vcombine.low %v968_v10, %v972_v12 }
 0x144   :  { %6823 = vmatprep.subr.bf16.mxu0 %v8845_v51  ;;  %7151 = vmatprep.subr.bf16.mxu1 %v8847_v52  ;;  %v8886_v51 = vcombine.low %v945_v34, %v949_v36  ;;  %v8893_v52 = vcombine.high %v952_v39, %v956_v44  ;;  %v8895_v0 = vcombine.high %v953_v45, %v957_v46 }
 0x145   :  { %6853 = vmatprep.mubr.bf16.mxu0 %v10342_v56  ;;  %7181 = vmatprep.mubr.bf16.mxu1 %v10342_v56  ;;  %v8910_v34 = vcombine.low %v969_v17, %v973_v49 }
 0x147   :  { %6824 = vmatpush1.bf16.msra.mxu0 %v8844_v48  ;;  %7152 = vmatpush1.bf16.msra.mxu1 %v8846_v1  ;;  %v961_v48 = vld [vmem:[#allocation8 + $0xe08] sm:$0xff] }
 0x148   :  { %6825 = vmatprep.subr.bf16.mxu0 %v8853_v3  ;;  %7153 = vmatprep.subr.bf16.mxu1 %v8855_v5  ;;  %v965_v1 = vld [vmem:[#allocation8 + $0xe28] sm:$0xff]  ;;  %v8892_v3 = vcombine.low %v952_v39, %v956_v44  ;;  %v8894_v5 = vcombine.low %v953_v45, %v957_v46 }
 0x149   :  { %v985_v46 = vld [vmem:[#allocation8 + $0xec8] sm:$0xff] }
 0x14b   :  { %6826 = vmatpush1.bf16.msra.mxu0 %v8852_v43  ;;  %7154 = vmatpush1.bf16.msra.mxu1 %v8854_v13  ;;  %v159_v43 = vrot.slane %v10348_v61, %v10214_v54  ;;  %v163_v13 = vrot.slane %v10348_v61, %v10217_v57 }
 0x14c   :  { %6827 = vmatprep.subr.bf16.mxu0 %v8861_v14  ;;  %7155 = vmatprep.subr.bf16.mxu1 %v8863_v16  ;;  %v167_v14 = vrot.slane %v10348_v61, %v10220_v58  ;;  %v8903_v16 = vcombine.high %v961_v48, %v965_v1 }
 0x14d   :  { %v218_v23 = vcombine.low %v155_v8, %v159_v43  ;;  %v997_v8 = vld [vmem:[#allocation8 + $0xf28] sm:$0xff] }
 0x14e   :  { %v219_v24 = vcombine.low %v163_v13, %v167_v14 }
 0x14f   :  { %6828 = vmatpush1.bf16.msra.mxu0 %v8860_v60  ;;  %7156 = vmatpush1.bf16.msra.mxu1 %v8862_v21  ;;  %v8902_v60 = vcombine.low %v961_v48, %v965_v1  ;;  %v8909_v21 = vcombine.high %v968_v10, %v972_v12  ;;  %v996_v48 = vld [vmem:[#allocation8 + $0xf20] sm:$0xff]  ;;  %v114_v10 = vld [vmem:[#allocation2 + $0x10] sm:$0xff] }
 0x150   :  { %6829 = vmatprep.subr.bf16.mxu0 %v8869_v62  ;;  %7157 = vmatprep.subr.bf16.mxu1 %v8871_v22  ;;  %v8911_v62 = vcombine.high %v969_v17, %v973_v49  ;;  %v976_v22 = vld [vmem:[#allocation8 + $0xe80] sm:$0xff]  ;;  %v233_v39 = vrot.slane %v219_v24, %v10225_v63 }
 0x151   :  { %v8917_v36 = vcombine.high %v976_v22, %v980_v25  ;;  %v1004_v17 = vld [vmem:[#allocation8 + $0xf60] sm:$0xff] }
 0x153   :  { %6830 = vmatpush1.bf16.msra.mxu0 %v8868_v27  ;;  %7158 = vmatpush1.bf16.msra.mxu1 %v8870_v28  ;;  %v981_v27 = vld [vmem:[#allocation8 + $0xea8] sm:$0xff]  ;;  %v299_v28 = vrot.slane %v10358_v18, %v10211_v53 }
 0x154   :  { %6831 = vmatprep.subr.bf16.mxu0 %v8877_v29  ;;  %7159 = vmatprep.subr.bf16.mxu1 %v8879_v30  ;;  %v303_v29 = vrot.slane %v10358_v18, %v10214_v54  ;;  %v307_v30 = vrot.slane %v10358_v18, %v10217_v57 }
 0x156   :  { %v362_v44 = vcombine.low %v299_v28, %v303_v29  ;;  %v363_v45 = vcombine.low %v307_v30, %v311_v32  ;;  %v1009_v28 = vld [vmem:[#allocation8 + $0xf88] sm:$0xff] }
 0x157   :  { %6832 = vmatpush1.bf16.msra.mxu0 %v8876_v35  ;;  %7160 = vmatpush1.bf16.msra.mxu1 %v8878_v6  ;;  %v8919_v35 = vcombine.high %v977_v26, %v981_v27  ;;  %v984_v6 = vld [vmem:[#allocation8 + $0xec0] sm:$0xff]  ;;  %v1013_v29 = vld [vmem:[#allocation8 + $0xfa8] sm:$0xff] }
 0x158   :  { %6833 = vmatprep.subr.bf16.mxu0 %v8885_v37  ;;  %7161 = vmatprep.subr.bf16.mxu1 %v8887_v38  ;;  %v988_v37 = vld [vmem:[#allocation8 + $0xee0] sm:$0xff]  ;;  %v226_v38 = vrot.slane %v218_v23, %v10225_v63 }
 0x159   :  { %v8925_v59 = vcombine.high %v984_v6, %v988_v37  ;;  %v8924_v12 = vcombine.low %v984_v6, %v988_v37  ;;  %v1017_v37 = vld [vmem:[#allocation8 + $0xfc8] sm:$0xff] }
 0x15a   :  { %v234_v1 = vcombine.low %v226_v38, %v233_v39  ;;  %v1021_v38 = vld [vmem:[#allocation8 + $0xfe8] sm:$0xff] }
 0x15b   :  { %6834 = vmatpush1.bf16.msra.mxu0 %v8884_v47  ;;  %7162 = vmatpush1.bf16.msra.mxu1 %v8886_v51  ;;  %v989_v47 = vld [vmem:[#allocation8 + $0xee8] sm:$0xff]  ;;  %v8916_v51 = vcombine.low %v976_v22, %v980_v25  ;;  %v1008_v25 = vld [vmem:[#allocation8 + $0xf80] sm:$0xff] }
 0x15c   :  { %6835 = vmatprep.subr.bf16.mxu0 %v8893_v52  ;;  %7163 = vmatprep.subr.bf16.mxu1 %v8895_v0  ;;  %v8918_v52 = vcombine.low %v977_v26, %v981_v27  ;;  %v8927_v55 = vcombine.high %v985_v46, %v989_v47  ;;  %v992_v0 = vld [vmem:[#allocation8 + $0xf00] sm:$0xff]  ;;  %v8926_v43 = vcombine.low %v985_v46, %v989_v47 }
 0x15d   :  { %v8933_v13 = vcombine.high %v992_v0, %v996_v48  ;;  %v258_v49 = vmul.f32 %v234_v1, %v114_v10  ;;  %v1012_v26 = vld [vmem:[#allocation8 + $0xfa0] sm:$0xff]  ;;  %v8959_v46 = vcombine.high %v1017_v37, %v1021_v38  ;;  %v10382_v10 = vpack.c.bf16 %v10334_v31, %v10334_v31 }
 0x15e   :  { %v8948_v39 = vcombine.low %v1008_v25, %v1012_v26  ;;  %v1024_v47 = vld [vmem:[#allocation8 + $0x1000] sm:$0xff] }
 0x15f   :  { %6836 = vmatpush1.bf16.msra.mxu0 %v8892_v3  ;;  %7164 = vmatpush1.bf16.msra.mxu1 %v8894_v5  ;;  %v370_v3 = vrot.slane %v362_v44, %v10225_v63  ;;  %v377_v5 = vrot.slane %v363_v45, %v10225_v63  ;;  %v8950_v44 = vcombine.low %v1009_v28, %v1013_v29 }
 0x160   :  { %6837 = vmatprep.subr.bf16.mxu0 %v8901_v7  ;;  %7165 = vmatprep.subr.bf16.mxu1 %v8903_v16  ;;  %v993_v7 = vld [vmem:[#allocation8 + $0xf08] sm:$0xff]  ;;  %v1000_v16 = vld [vmem:[#allocation8 + $0xf40] sm:$0xff] }
 0x161   :  { %v8935_v14 = vcombine.high %v993_v7, %v997_v8  ;;  %v8934_v22 = vcombine.low %v993_v7, %v997_v8  ;;  %v8941_v23 = vcombine.high %v1000_v16, %v1004_v17  ;;  %v8940_v30 = vcombine.low %v1000_v16, %v1004_v17  ;;  %v1036_v7 = vld [vmem:[#allocation8 + $0x1060] sm:$0xff] }
 0x163   :  { %6838 = vmatpush1.bf16.msra.mxu0 %v8900_v20  ;;  %7166 = vmatpush1.bf16.msra.mxu1 %v8902_v60  ;;  %v378_v20 = vcombine.low %v370_v3, %v377_v5  ;;  %v1001_v60 = vld [vmem:[#allocation8 + $0xf48] sm:$0xff]  ;;  %v1032_v5 = vld [vmem:[#allocation8 + $0x1040] sm:$0xff] }
 0x164   :  { %6839 = vmatprep.subr.bf16.mxu0 %v8909_v21  ;;  %7167 = vmatprep.subr.bf16.mxu1 %v8911_v62  ;;  %v1005_v21 = vld [vmem:[#allocation8 + $0xf68] sm:$0xff]  ;;  %v8932_v62 = vcombine.low %v992_v0, %v996_v48  ;;  %v8958_v48 = vcombine.low %v1017_v37, %v1021_v38  ;;  %v8973_v16 = vcombine.high %v1032_v5, %v1036_v7 }
 0x165   :  { %v8943_v24 = vcombine.high %v1001_v60, %v1005_v21  ;;  %v402_v27 = vadd.f32 %v378_v20, %v258_v49  ;;  %v8942_v32 = vcombine.low %v1001_v60, %v1005_v21  ;;  %v1040_v49 = vld [vmem:[#allocation8 + $0x1080] sm:$0xff]  ;;  %v1041_v21 = vld [vmem:[#allocation8 + $0x1088] sm:$0xff]  ;;  %v8972_v31 = vcombine.low %v1032_v5, %v1036_v7 }
 0x166   :  { %v1044_v20 = vld [vmem:[#allocation8 + $0x10a0] sm:$0xff]  ;;  %v1061_v37 = vld [vmem:[#allocation8 + $0x1128] sm:$0xff] }
 0x167   :  { %6840 = vmatpush1.bf16.msra.mxu0 %v8908_v33  ;;  %7168 = vmatpush1.bf16.msra.mxu1 %v8910_v34  ;;  %v8949_v33 = vcombine.high %v1008_v25, %v1012_v26  ;;  %v8951_v34 = vcombine.high %v1009_v28, %v1013_v29  ;;  %v10372_v6 = vmax.f32 %v402_v27, 0.0  ;;  %v1048_v25 = vld [vmem:[#allocation8 + $0x10c0] sm:$0xff]  ;;  %v1049_v27 = vld [vmem:[#allocation8 + $0x10c8] sm:$0xff]  ;;  %v8980_v29 = vcombine.low %v1040_v49, %v1044_v20 }
 0x168   :  { %6841 = vmatprep.subr.bf16.mxu0 %v8917_v36  ;;  %7169 = vmatprep.subr.bf16.mxu1 %v8919_v35  ;;  %v1016_v36 = vld [vmem:[#allocation8 + $0xfc0] sm:$0xff]  ;;  %v1053_v28 = vld [vmem:[#allocation8 + $0x10e8] sm:$0xff] }
 0x169   :  { %v1020_v35 = vld [vmem:[#allocation8 + $0xfe0] sm:$0xff]  ;;  %v1073_v7 = vld [vmem:[#allocation8 + $0x1188] sm:$0xff] }
 0x16a   :  { %v8957_v45 = vcombine.high %v1016_v36, %v1020_v35  ;;  %v8956_v0 = vcombine.low %v1016_v36, %v1020_v35  ;;  %v1052_v26 = vld [vmem:[#allocation8 + $0x10e0] sm:$0xff]  ;;  %v1057_v35 = vld [vmem:[#allocation8 + $0x1108] sm:$0xff] }
 0x16b   :  { %6842 = vmatpush1.bf16.msra.mxu0 %v8916_v51  ;;  %7170 = vmatpush1.bf16.msra.mxu1 %v8918_v52  ;;  %v1028_v51 = vld [vmem:[#allocation8 + $0x1020] sm:$0xff]  ;;  %v10376_v52 = vrot.slane %v10372_v6, %v10225_v63  ;;  %v8988_v38 = vcombine.low %v1048_v25, %v1052_v26 }
 0x16c   :  { %6843 = vmatprep.subr.bf16.mxu0 %v8925_v59  ;;  %7171 = vmatprep.subr.bf16.mxu1 %v8927_v55  ;;  %v1025_v59 = vld [vmem:[#allocation8 + $0x1008] sm:$0xff]  ;;  %v8965_v1 = vcombine.high %v1024_v47, %v1028_v51  ;;  %v1060_v36 = vld [vmem:[#allocation8 + $0x1120] sm:$0xff] }
 0x16d   :  { %v1029_v55 = vld [vmem:[#allocation8 + $0x1028] sm:$0xff]  ;;  %v461_v8 = vcombine.high %v10376_v52, %v10376_v52  ;;  %v1076_v5 = vld [vmem:[#allocation8 + $0x11a0] sm:$0xff] }
 0x16e   :  { %v8967_v3 = vcombine.high %v1025_v59, %v1029_v55 }
 0x16f   :  { %6844 = vmatpush1.bf16.msra.mxu0 %v8924_v12  ;;  %7172 = vmatpush1.bf16.msra.mxu1 %v8926_v43  ;;  %v1033_v12 = vld [vmem:[#allocation8 + $0x1048] sm:$0xff]  ;;  %v10384_v60 = vpack.c.bf16 %v461_v8, %v461_v8 }
 0x170   :  { %6845 = vmatprep.subr.bf16.mxu0 %v8933_v13  ;;  %7173 = vmatprep.subr.bf16.mxu1 %v8935_v14  ;;  %v1037_v43 = vld [vmem:[#allocation8 + $0x1068] sm:$0xff]  ;;  %v8964_v13 = vcombine.low %v1024_v47, %v1028_v51  ;;  %v8966_v14 = vcombine.low %v1025_v59, %v1029_v55  ;;  %v1068_v47 = vld [vmem:[#allocation8 + $0x1160] sm:$0xff] }
 0x171   :  { %v8975_v17 = vcombine.high %v1033_v12, %v1037_v43  ;;  %v1065_v51 = vld [vmem:[#allocation8 + $0x1148] sm:$0xff] }
 0x172   :  { %v1069_v59 = vld [vmem:[#allocation8 + $0x1168] sm:$0xff] }
 0x173   :  { %6846 = vmatpush1.bf16.msra.mxu0 %v8932_v62  ;;  %7174 = vmatpush1.bf16.msra.mxu1 %v8934_v22  ;;  %v1045_v62 = vld [vmem:[#allocation8 + $0x10a8] sm:$0xff]  ;;  %v8974_v22 = vcombine.low %v1033_v12, %v1037_v43  ;;  %v9006_v43 = vcombine.low %v1065_v51, %v1069_v59 }
 0x174   :  { %6847 = vmatprep.subr.bf16.mxu0 %v8941_v23  ;;  %7175 = vmatprep.subr.bf16.mxu1 %v8943_v24  ;;  %v8981_v23 = vcombine.high %v1040_v49, %v1044_v20  ;;  %v8983_v24 = vcombine.high %v1041_v21, %v1045_v62  ;;  %v1077_v8 = vld [vmem:[#allocation8 + $0x11a8] sm:$0xff] }
 0x175   :  { %v1081_v49 = vld [vmem:[#allocation8 + $0x11c8] sm:$0xff] }
 0x176   :  { %v1085_v20 = vld [vmem:[#allocation8 + $0x11e8] sm:$0xff] }
 0x177   :  { %6848 = vmatpush1.bf16.msra.mxu0 %v8940_v30  ;;  %7176 = vmatpush1.bf16.msra.mxu1 %v8942_v32  ;;  %v8982_v30 = vcombine.low %v1041_v21, %v1045_v62  ;;  %v8989_v32 = vcombine.high %v1048_v25, %v1052_v26  ;;  %v9014_v62 = vcombine.low %v1073_v7, %v1077_v8  ;;  %v1089_v25 = vld [vmem:[#allocation8 + $0x1208] sm:$0xff] }
 0x178   :  { %6849 = vmatprep.subr.bf16.mxu0 %v8949_v33  ;;  %7177 = vmatprep.subr.bf16.mxu1 %v8951_v34  ;;  %v8991_v33 = vcombine.high %v1049_v27, %v1053_v28  ;;  %v1056_v34 = vld [vmem:[#allocation8 + $0x1100] sm:$0xff]  ;;  %v1093_v26 = vld [vmem:[#allocation8 + $0x1228] sm:$0xff] }
 0x179   :  { %v8996_v55 = vcombine.low %v1056_v34, %v1060_v36 }
 0x17b   :  { %6850 = vmatpush1.bf16.msra.mxu0 %v8948_v39  ;;  %7178 = vmatpush1.bf16.msra.mxu1 %v8950_v44  ;;  %v8990_v39 = vcombine.low %v1049_v27, %v1053_v28  ;;  %v8997_v44 = vcombine.high %v1056_v34, %v1060_v36  ;;  %v9022_v28 = vcombine.low %v1081_v49, %v1085_v20  ;;  %v1097_v34 = vld [vmem:[#allocation8 + $0x1248] sm:$0xff] }
 0x17c   :  { %6851 = vmatprep.subr.bf16.mxu0 %v8957_v45  ;;  %7179 = vmatprep.subr.bf16.mxu1 %v8959_v46  ;;  %v8999_v45 = vcombine.high %v1057_v35, %v1061_v37  ;;  %v1064_v46 = vld [vmem:[#allocation8 + $0x1140] sm:$0xff]  ;;  %v1101_v36 = vld [vmem:[#allocation8 + $0x1268] sm:$0xff] }
 0x17d   :  { %v9004_v12 = vcombine.low %v1064_v46, %v1068_v47 }
 0x17f   :  { %6852 = vmatpush1.bf16.msra.mxu0 %v8956_v0  ;;  %7180 = vmatpush1.bf16.msra.mxu1 %v8958_v48  ;;  %v8998_v0 = vcombine.low %v1057_v35, %v1061_v37  ;;  %v9005_v48 = vcombine.high %v1064_v46, %v1068_v47  ;;  %v9030_v37 = vcombine.low %v1089_v25, %v1093_v26  ;;  %v1105_v46 = vld [vmem:[#allocation8 + $0x1288] sm:$0xff] }
 0x180   :  { %6862 = vmatprep.subr.bf16.mxu0 %v8965_v1  ;;  %7190 = vmatprep.subr.bf16.mxu1 %v8967_v3  ;;  %v9007_v1 = vcombine.high %v1065_v51, %v1069_v59  ;;  %v1072_v3 = vld [vmem:[#allocation8 + $0x1180] sm:$0xff]  ;;  %v1109_v47 = vld [vmem:[#allocation8 + $0x12a8] sm:$0xff]  ;;  %v9038_v59 = vcombine.low %v1097_v34, %v1101_v36 }
 0x181   :  { %v9012_v21 = vcombine.low %v1072_v3, %v1076_v5 }
 0x182   :  { %6854 = vmatmul.mubr.bf16.vlgmr.msra.gmra.mrb[0].mxu0 %v10382_v10  ;;  %7182 = vmatmul.mubr.bf16.vlgmr.msra.gmra.mrb[0].mxu1 %v10382_v10 }
 0x183   :  { %6863 = vmatpush1.bf16.msra.mxu0 %v8964_v13  ;;  %7191 = vmatpush1.bf16.msra.mxu1 %v8966_v14  ;;  %v9013_v13 = vcombine.high %v1072_v3, %v1076_v5  ;;  %v9015_v14 = vcombine.high %v1073_v7, %v1077_v8  ;;  %v1113_v3 = vld [vmem:[#allocation8 + $0x12c8] sm:$0xff]  ;;  %v9046_v8 = vcombine.low %v1105_v46, %v1109_v47 }
 0x184   :  { %6864 = vmatprep.subr.bf16.mxu0 %v8973_v16  ;;  %7192 = vmatprep.subr.bf16.mxu1 %v8975_v17  ;;  %v1080_v16 = vld [vmem:[#allocation8 + $0x11c0] sm:$0xff]  ;;  %v1117_v5 = vld [vmem:[#allocation8 + $0x12e8] sm:$0xff] }
 0x185   :  { %6894 = vmatprep.mubr.bf16.mxu0 %v10384_v60  ;;  %7222 = vmatprep.mubr.bf16.mxu1 %v10384_v60  ;;  %v1084_v17 = vld [vmem:[#allocation8 + $0x11e0] sm:$0xff] }
 0x186   :  { %v9020_v27 = vcombine.low %v1080_v16, %v1084_v17 }
 0x187   :  { %6865 = vmatpush1.bf16.msra.mxu0 %v8972_v31  ;;  %7193 = vmatpush1.bf16.msra.mxu1 %v8974_v22  ;;  %v9021_v31 = vcombine.high %v1080_v16, %v1084_v17  ;;  %v9023_v22 = vcombine.high %v1081_v49, %v1085_v20  ;;  %v1121_v16 = vld [vmem:[#allocation8 + $0x1308] sm:$0xff]  ;;  %v9054_v20 = vcombine.low %v1113_v3, %v1117_v5 }
 0x188   :  { %6866 = vmatprep.subr.bf16.mxu0 %v8981_v23  ;;  %7194 = vmatprep.subr.bf16.mxu1 %v8983_v24  ;;  %v1088_v23 = vld [vmem:[#allocation8 + $0x1200] sm:$0xff]  ;;  %v1125_v17 = vld [vmem:[#allocation8 + $0x1328] sm:$0xff] }
 0x189   :  { %v1092_v24 = vld [vmem:[#allocation8 + $0x1220] sm:$0xff] }
 0x18a   :  { %v9028_v35 = vcombine.low %v1088_v23, %v1092_v24 }
 0x18b   :  { %6867 = vmatpush1.bf16.msra.mxu0 %v8980_v29  ;;  %7195 = vmatpush1.bf16.msra.mxu1 %v8982_v30  ;;  %v9029_v29 = vcombine.high %v1088_v23, %v1092_v24  ;;  %v9031_v30 = vcombine.high %v1089_v25, %v1093_v26  ;;  %v1129_v23 = vld [vmem:[#allocation8 + $0x1348] sm:$0xff]  ;;  %v9062_v26 = vcombine.low %v1121_v16, %v1125_v17 }
 0x18c   :  { %6868 = vmatprep.subr.bf16.mxu0 %v8989_v32  ;;  %7196 = vmatprep.subr.bf16.mxu1 %v8991_v33  ;;  %v1096_v32 = vld [vmem:[#allocation8 + $0x1240] sm:$0xff]  ;;  %v1133_v24 = vld [vmem:[#allocation8 + $0x1368] sm:$0xff] }
 0x18d   :  { %v1100_v33 = vld [vmem:[#allocation8 + $0x1260] sm:$0xff] }
 0x18e   :  { %v9036_v51 = vcombine.low %v1096_v32, %v1100_v33 }
 0x18f   :  { %6869 = vmatpush1.bf16.msra.mxu0 %v8988_v38  ;;  %7197 = vmatpush1.bf16.msra.mxu1 %v8990_v39  ;;  %v9037_v38 = vcombine.high %v1096_v32, %v1100_v33  ;;  %v9039_v39 = vcombine.high %v1097_v34, %v1101_v36  ;;  %v1137_v32 = vld [vmem:[#allocation8 + $0x1388] sm:$0xff]  ;;  %v9070_v36 = vcombine.low %v1129_v23, %v1133_v24 }
 0x190   :  { %6870 = vmatprep.subr.bf16.mxu0 %v8997_v44  ;;  %7198 = vmatprep.subr.bf16.mxu1 %v8999_v45  ;;  %v1104_v44 = vld [vmem:[#allocation8 + $0x1280] sm:$0xff]  ;;  %v1141_v33 = vld [vmem:[#allocation8 + $0x13a8] sm:$0xff] }
 0x191   :  { %v1108_v45 = vld [vmem:[#allocation8 + $0x12a0] sm:$0xff] }
 0x192   :  { %v9044_v7 = vcombine.low %v1104_v44, %v1108_v45 }
 0x193   :  { %6871 = vmatpush1.bf16.msra.mxu0 %v8996_v55  ;;  %7199 = vmatpush1.bf16.msra.mxu1 %v8998_v0  ;;  %v9045_v55 = vcombine.high %v1104_v44, %v1108_v45  ;;  %v9047_v0 = vcombine.high %v1105_v46, %v1109_v47  ;;  %v446_v44 = vcombine.high %v10372_v6, %v10372_v6  ;;  %v1145_v45 = vld [vmem:[#allocation8 + $0x13c8] sm:$0xff] }
 0x194   :  { %6872 = vmatprep.subr.bf16.mxu0 %v9005_v48  ;;  %7200 = vmatprep.subr.bf16.mxu1 %v9007_v1  ;;  %v1112_v48 = vld [vmem:[#allocation8 + $0x12c0] sm:$0xff]  ;;  %v1149_v46 = vld [vmem:[#allocation8 + $0x13e8] sm:$0xff] }
 0x195   :  { %v1116_v1 = vld [vmem:[#allocation8 + $0x12e0] sm:$0xff]  ;;  %v9086_v6 = vcombine.low %v1145_v45, %v1149_v46 }
 0x196   :  { %v9052_v49 = vcombine.low %v1112_v48, %v1116_v1 }
 0x197   :  { %6873 = vmatpush1.bf16.msra.mxu0 %v9004_v12  ;;  %7201 = vmatpush1.bf16.msra.mxu1 %v9006_v43  ;;  %v9053_v12 = vcombine.high %v1112_v48, %v1116_v1  ;;  %v9055_v43 = vcombine.high %v1113_v3, %v1117_v5  ;;  %v1156_v48 = vld [vmem:[#allocation8 + $0x1420] sm:$0xff]  ;;  %v10393_v1 = vrot.slane %v446_v44, %v10225_v63  ;;  %v1153_v3 = vld [vmem:[#allocation8 + $0x1408] sm:$0xff] }
 0x198   :  { %6874 = vmatprep.subr.bf16.mxu0 %v9013_v13  ;;  %7202 = vmatprep.subr.bf16.mxu1 %v9015_v14  ;;  %v1120_v13 = vld [vmem:[#allocation8 + $0x1300] sm:$0xff]  ;;  %v1157_v5 = vld [vmem:[#allocation8 + $0x1428] sm:$0xff] }
 0x199   :  { %v1124_v14 = vld [vmem:[#allocation8 + $0x1320] sm:$0xff] }
 0x19a   :  { %v9060_v25 = vcombine.low %v1120_v13, %v1124_v14  ;;  %v1188_v44 = vld [vmem:[#allocation8 + $0x1520] sm:$0xff] }
 0x19b   :  { %6875 = vmatpush1.bf16.msra.mxu0 %v9012_v21  ;;  %7203 = vmatpush1.bf16.msra.mxu1 %v9014_v62  ;;  %v9061_v21 = vcombine.high %v1120_v13, %v1124_v14  ;;  %v9063_v62 = vcombine.high %v1121_v16, %v1125_v17  ;;  %v1164_v13 = vld [vmem:[#allocation8 + $0x1460] sm:$0xff]  ;;  %v462_v14 = vcombine.high %v10393_v1, %v10393_v1  ;;  %v1161_v17 = vld [vmem:[#allocation8 + $0x1448] sm:$0xff] }
 0x19c   :  { %6876 = vmatprep.subr.bf16.mxu0 %v9021_v31  ;;  %7204 = vmatprep.subr.bf16.mxu1 %v9023_v22  ;;  %v1128_v31 = vld [vmem:[#allocation8 + $0x1340] sm:$0xff]  ;;  %v10399_v16 = vpack.c.bf16 %v10376_v52, %v10376_v52 }
 0x19d   :  { %v1132_v22 = vld [vmem:[#allocation8 + $0x1360] sm:$0xff] }
 0x19e   :  { %v9068_v34 = vcombine.low %v1128_v31, %v1132_v22 }
 0x19f   :  { %6877 = vmatpush1.bf16.msra.mxu0 %v9020_v27  ;;  %7205 = vmatpush1.bf16.msra.mxu1 %v9022_v28  ;;  %v9069_v27 = vcombine.high %v1128_v31, %v1132_v22  ;;  %v9071_v28 = vcombine.high %v1129_v23, %v1133_v24  ;;  %v1168_v22 = vld [vmem:[#allocation8 + $0x1480] sm:$0xff]  ;;  %v10401_v24 = vpack.c.bf16 %v462_v14, %v462_v14  ;;  %v1201_v14 = vld [vmem:[#allocation8 + $0x1588] sm:$0xff] }
 0x1a0   :  { %6878 = vmatprep.subr.bf16.mxu0 %v9029_v29  ;;  %7206 = vmatprep.subr.bf16.mxu1 %v9031_v30  ;;  %v1136_v29 = vld [vmem:[#allocation8 + $0x1380] sm:$0xff] }
 0x1a1   :  { %v1140_v30 = vld [vmem:[#allocation8 + $0x13a0] sm:$0xff] }
 0x1a2   :  { %v9076_v47 = vcombine.low %v1136_v29, %v1140_v30  ;;  %v1172_v23 = vld [vmem:[#allocation8 + $0x14a0] sm:$0xff] }
 0x1a3   :  { %6879 = vmatpush1.bf16.msra.mxu0 %v9028_v35  ;;  %7207 = vmatpush1.bf16.msra.mxu1 %v9030_v37  ;;  %v9077_v35 = vcombine.high %v1136_v29, %v1140_v30  ;;  %v9079_v37 = vcombine.high %v1137_v32, %v1141_v33  ;;  %v1176_v30 = vld [vmem:[#allocation8 + $0x14c0] sm:$0xff] }
 0x1a4   :  { %6880 = vmatprep.subr.bf16.mxu0 %v9037_v38  ;;  %7208 = vmatprep.subr.bf16.mxu1 %v9039_v39  ;;  %v1144_v38 = vld [vmem:[#allocation8 + $0x13c0] sm:$0xff] }
 0x1a5   :  { %v1148_v39 = vld [vmem:[#allocation8 + $0x13e0] sm:$0xff] }
 0x1a7   :  { %6881 = vmatpush1.bf16.msra.mxu0 %v9036_v51  ;;  %7209 = vmatpush1.bf16.msra.mxu1 %v9038_v59  ;;  %v9078_v51 = vcombine.low %v1137_v32, %v1141_v33  ;;  %v9085_v59 = vcombine.high %v1144_v38, %v1148_v39  ;;  %v1180_v32 = vld [vmem:[#allocation8 + $0x14e0] sm:$0xff]  ;;  %v1177_v33 = vld [vmem:[#allocation8 + $0x14c8] sm:$0xff] }
 0x1a8   :  { %6882 = vmatprep.subr.bf16.mxu0 %v9045_v55  ;;  %7210 = vmatprep.subr.bf16.mxu1 %v9047_v0  ;;  %v9087_v55 = vcombine.high %v1145_v45, %v1149_v46  ;;  %v1152_v0 = vld [vmem:[#allocation8 + $0x1400] sm:$0xff]  ;;  %v1185_v45 = vld [vmem:[#allocation8 + $0x1508] sm:$0xff] }
 0x1a9   :  { %v1189_v46 = vld [vmem:[#allocation8 + $0x1528] sm:$0xff] }
 0x1ab   :  { %6883 = vmatpush1.bf16.msra.mxu0 %v9044_v7  ;;  %7211 = vmatpush1.bf16.msra.mxu1 %v9046_v8  ;;  %v9084_v7 = vcombine.low %v1144_v38, %v1148_v39  ;;  %v9093_v8 = vcombine.high %v1152_v0, %v1156_v48  ;;  %v1184_v39 = vld [vmem:[#allocation8 + $0x1500] sm:$0xff] }
 0x1ac   :  { %6884 = vmatprep.subr.bf16.mxu0 %v9053_v12  ;;  %7212 = vmatprep.subr.bf16.mxu1 %v9055_v43  ;;  %v9095_v12 = vcombine.high %v1153_v3, %v1157_v5  ;;  %v1160_v43 = vld [vmem:[#allocation8 + $0x1440] sm:$0xff] }
 0x1ad   :  { %v9100_v52 = vcombine.low %v1160_v43, %v1164_v13 }
 0x1af   :  { %6885 = vmatpush1.bf16.msra.mxu0 %v9052_v49  ;;  %7213 = vmatpush1.bf16.msra.mxu1 %v9054_v20  ;;  %v1165_v49 = vld [vmem:[#allocation8 + $0x1468] sm:$0xff]  ;;  %v9092_v20 = vcombine.low %v1152_v0, %v1156_v48  ;;  %v1192_v0 = vld [vmem:[#allocation8 + $0x1540] sm:$0xff] }
 0x1b0   :  { %6886 = vmatprep.subr.bf16.mxu0 %v9061_v21  ;;  %7214 = vmatprep.subr.bf16.mxu1 %v9063_v62  ;;  %v9094_v21 = vcombine.low %v1153_v3, %v1157_v5  ;;  %v9101_v62 = vcombine.high %v1160_v43, %v1164_v13  ;;  %v9103_v31 = vcombine.high %v1161_v17, %v1165_v49  ;;  %v1196_v48 = vld [vmem:[#allocation8 + $0x1560] sm:$0xff]  ;;  %v1193_v3 = vld [vmem:[#allocation8 + $0x1548] sm:$0xff] }
 0x1b1   :  { %v1197_v5 = vld [vmem:[#allocation8 + $0x1568] sm:$0xff]  ;;  %v1200_v43 = vld [vmem:[#allocation8 + $0x1580] sm:$0xff] }
 0x1b2   :  { %v1204_v13 = vld [vmem:[#allocation8 + $0x15a0] sm:$0xff] }
 0x1b3   :  { %6887 = vmatpush1.bf16.msra.mxu0 %v9060_v25  ;;  %7215 = vmatpush1.bf16.msra.mxu1 %v9062_v26  ;;  %v1169_v25 = vld [vmem:[#allocation8 + $0x1488] sm:$0xff] }
 0x1b4   :  { %6888 = vmatprep.subr.bf16.mxu0 %v9069_v27  ;;  %7216 = vmatprep.subr.bf16.mxu1 %v9071_v28  ;;  %v1173_v26 = vld [vmem:[#allocation8 + $0x14a8] sm:$0xff]  ;;  %v9102_v27 = vcombine.low %v1161_v17, %v1165_v49  ;;  %v9109_v28 = vcombine.high %v1168_v22, %v1172_v23  ;;  %v9132_v49 = vcombine.low %v1192_v0, %v1196_v48 }
 0x1b5   :  { %v9111_v29 = vcombine.high %v1169_v25, %v1173_v26  ;;  %v1205_v17 = vld [vmem:[#allocation8 + $0x15a8] sm:$0xff] }
 0x1b7   :  { %6889 = vmatpush1.bf16.msra.mxu0 %v9068_v34  ;;  %7217 = vmatpush1.bf16.msra.mxu1 %v9070_v36  ;;  %v1181_v34 = vld [vmem:[#allocation8 + $0x14e8] sm:$0xff]  ;;  %v9108_v36 = vcombine.low %v1168_v22, %v1172_v23  ;;  %v1212_v22 = vld [vmem:[#allocation8 + $0x15e0] sm:$0xff] }
 0x1b8   :  { %6890 = vmatprep.subr.bf16.mxu0 %v9077_v35  ;;  %7218 = vmatprep.subr.bf16.mxu1 %v9079_v37  ;;  %v9110_v35 = vcombine.low %v1169_v25, %v1173_v26  ;;  %v9117_v37 = vcombine.high %v1176_v30, %v1180_v32  ;;  %v9119_v38 = vcombine.high %v1177_v33, %v1181_v34  ;;  %v1209_v23 = vld [vmem:[#allocation8 + $0x15c8] sm:$0xff] }
 0x1b9   :  { %v1213_v25 = vld [vmem:[#allocation8 + $0x15e8] sm:$0xff]  ;;  %v9140_v26 = vcombine.low %v1200_v43, %v1204_v13 }
 0x1bb   :  { %6891 = vmatpush1.bf16.msra.mxu0 %v9076_v47  ;;  %7219 = vmatpush1.bf16.msra.mxu1 %v9078_v51  ;;  %v9116_v47 = vcombine.low %v1176_v30, %v1180_v32  ;;  %v9118_v51 = vcombine.low %v1177_v33, %v1181_v34  ;;  %v9151_v30 = vcombine.high %v1209_v23, %v1213_v25  ;;  %v1217_v32 = vld [vmem:[#allocation8 + $0x1608] sm:$0xff] }
 0x1bc   :  { %6892 = vmatprep.subr.bf16.mxu0 %v9085_v59  ;;  %7220 = vmatprep.subr.bf16.mxu1 %v9087_v55  ;;  %v9125_v59 = vcombine.high %v1184_v39, %v1188_v44  ;;  %v9127_v55 = vcombine.high %v1185_v45, %v1189_v46  ;;  %v1221_v33 = vld [vmem:[#allocation8 + $0x1628] sm:$0xff] }
 0x1bf   :  { %6893 = vmatpush1.bf16.msra.mxu0 %v9084_v7  ;;  %7221 = vmatpush1.bf16.msra.mxu1 %v9086_v6  ;;  %v9124_v7 = vcombine.low %v1184_v39, %v1188_v44  ;;  %v9126_v6 = vcombine.low %v1185_v45, %v1189_v46  ;;  %v1228_v39 = vld [vmem:[#allocation8 + $0x1660] sm:$0xff]  ;;  %v175_v44 = vrot.slane %v10348_v61, %v10267_v42 }
 0x1c0   :  { %6903 = vmatprep.subr.bf16.mxu0 %v9093_v8  ;;  %7231 = vmatprep.subr.bf16.mxu1 %v9095_v12  ;;  %v9133_v8 = vcombine.high %v1192_v0, %v1196_v48  ;;  %v9135_v12 = vcombine.high %v1193_v3, %v1197_v5  ;;  %v179_v45 = vrot.slane %v10348_v61, %v10273_v50 }
 0x1c1   :  { %v183_v46 = vrot.slane %v10348_v61, %v10280_v2  ;;  %v9158_v0 = vcombine.low %v1217_v32, %v1221_v33 }
 0x1c2   :  { %6895 = vmatmul.mubr.bf16.vlgmr.msra.gmra.mrb[0].mxu0 %v10399_v16  ;;  %7223 = vmatmul.mubr.bf16.vlgmr.msra.gmra.mrb[0].mxu1 %v10399_v16 }
 0x1c3   :  { %6904 = vmatpush1.bf16.msra.mxu0 %v9092_v20  ;;  %7232 = vmatpush1.bf16.msra.mxu1 %v9094_v21  ;;  %v9134_v20 = vcombine.low %v1193_v3, %v1197_v5  ;;  %v9141_v21 = vcombine.high %v1200_v43, %v1204_v13  ;;  %v1232_v5 = vld [vmem:[#allocation8 + $0x1680] sm:$0xff]  ;;  %v1237_v43 = vld [vmem:[#allocation8 + $0x16a8] sm:$0xff]  ;;  %v319_v13 = vrot.slane %v10358_v18, %v10267_v42 }
 0x1c4   :  { %6905 = vmatprep.subr.bf16.mxu0 %v9101_v62  ;;  %7233 = vmatprep.subr.bf16.mxu1 %v9103_v31  ;;  %v9143_v62 = vcombine.high %v1201_v14, %v1205_v17  ;;  %v1208_v31 = vld [vmem:[#allocation8 + $0x15c0] sm:$0xff] }
 0x1c5   :  { %6935 = vmatprep.mubr.bf16.mxu0 %v10401_v24  ;;  %7263 = vmatprep.mubr.bf16.mxu1 %v10401_v24  ;;  %v9148_v34 = vcombine.low %v1208_v31, %v1212_v22 }
 0x1c7   :  { %6906 = vmatpush1.bf16.msra.mxu0 %v9100_v52  ;;  %7234 = vmatpush1.bf16.msra.mxu1 %v9102_v27  ;;  %v9142_v52 = vcombine.low %v1201_v14, %v1205_v17  ;;  %v9149_v27 = vcombine.high %v1208_v31, %v1212_v22  ;;  %v323_v14 = vrot.slane %v10358_v18, %v10273_v50  ;;  %v1240_v31 = vld [vmem:[#allocation8 + $0x16c0] sm:$0xff] }
 0x1c8   :  { %6907 = vmatprep.subr.bf16.mxu0 %v9109_v28  ;;  %7235 = vmatprep.subr.bf16.mxu1 %v9111_v29  ;;  %v1216_v28 = vld [vmem:[#allocation8 + $0x1600] sm:$0xff]  ;;  %v327_v17 = vrot.slane %v10358_v18, %v10280_v2 }
 0x1c9   :  { %v1220_v29 = vld [vmem:[#allocation8 + $0x1620] sm:$0xff] }
 0x1ca   :  { %v1244_v22 = vld [vmem:[#allocation8 + $0x16e0] sm:$0xff] }
 0x1cb   :  { %6908 = vmatpush1.bf16.msra.mxu0 %v9108_v36  ;;  %7236 = vmatpush1.bf16.msra.mxu1 %v9110_v35  ;;  %v9150_v36 = vcombine.low %v1209_v23, %v1213_v25  ;;  %v9157_v35 = vcombine.high %v1216_v28, %v1220_v29 }
 0x1cc   :  { %6909 = vmatprep.subr.bf16.mxu0 %v9117_v37  ;;  %7237 = vmatprep.subr.bf16.mxu1 %v9119_v38  ;;  %v171_v37 = vrot.slane %v10348_v61, %v10264_v41  ;;  %v1224_v38 = vld [vmem:[#allocation8 + $0x1640] sm:$0xff]  ;;  %v315_v61 = vrot.slane %v10358_v18, %v10264_v41 }
 0x1cd   :  { %v9165_v48 = vcombine.high %v1224_v38, %v1228_v39 }
 0x1cf   :  { %6910 = vmatpush1.bf16.msra.mxu0 %v9116_v47  ;;  %7238 = vmatpush1.bf16.msra.mxu1 %v9118_v51  ;;  %v9159_v47 = vcombine.high %v1217_v32, %v1221_v33  ;;  %v1225_v51 = vld [vmem:[#allocation8 + $0x1648] sm:$0xff]  ;;  %v1248_v33 = vld [vmem:[#allocation8 + $0x1700] sm:$0xff] }
 0x1d0   :  { %6911 = vmatprep.subr.bf16.mxu0 %v9125_v59  ;;  %7239 = vmatprep.subr.bf16.mxu1 %v9127_v55  ;;  %v1229_v59 = vld [vmem:[#allocation8 + $0x1668] sm:$0xff]  ;;  %v9156_v55 = vcombine.low %v1216_v28, %v1220_v29 }
 0x1d1   :  { %v9167_v3 = vcombine.high %v1225_v51, %v1229_v59  ;;  %v1245_v28 = vld [vmem:[#allocation8 + $0x16e8] sm:$0xff] }
 0x1d3   :  { %6912 = vmatpush1.bf16.msra.mxu0 %v9124_v7  ;;  %7240 = vmatpush1.bf16.msra.mxu1 %v9126_v6  ;;  %v235_v7 = vcombine.low %v171_v37, %v175_v44  ;;  %v236_v6 = vcombine.low %v179_v45, %v183_v46  ;;  %v115_v44 = vld [vmem:[#allocation2 + $0x18] sm:$0xff]  ;;  %v9180_v45 = vcombine.low %v1240_v31, %v1244_v22 }
 0x1d4   :  { %6913 = vmatprep.subr.bf16.mxu0 %v9133_v8  ;;  %7241 = vmatprep.subr.bf16.mxu1 %v9135_v12  ;;  %v1236_v8 = vld [vmem:[#allocation8 + $0x16a0] sm:$0xff]  ;;  %v1233_v12 = vld [vmem:[#allocation8 + $0x1688] sm:$0xff] }
 0x1d5   :  { %v243_v23 = vrot.slane %v235_v7, %v10225_v63  ;;  %v250_v25 = vrot.slane %v236_v6, %v10225_v63  ;;  %v9172_v18 = vcombine.low %v1232_v5, %v1236_v8  ;;  %v9174_v29 = vcombine.low %v1233_v12, %v1237_v43 }
 0x1d7   :  { %6914 = vmatpush1.bf16.msra.mxu0 %v9132_v49  ;;  %7242 = vmatpush1.bf16.msra.mxu1 %v9134_v20  ;;  %v9164_v49 = vcombine.low %v1224_v38, %v1228_v39  ;;  %v9166_v20 = vcombine.low %v1225_v51, %v1229_v59  ;;  %v1249_v38 = vld [vmem:[#allocation8 + $0x1708] sm:$0xff]  ;;  %v1256_v59 = vld [vmem:[#allocation8 + $0x1740] sm:$0xff] }
 0x1d8   :  { %6915 = vmatprep.subr.bf16.mxu0 %v9141_v21  ;;  %7243 = vmatprep.subr.bf16.mxu1 %v9143_v62  ;;  %v9173_v21 = vcombine.high %v1232_v5, %v1236_v8  ;;  %v9175_v62 = vcombine.high %v1233_v12, %v1237_v43  ;;  %v1253_v39 = vld [vmem:[#allocation8 + $0x1728] sm:$0xff]  ;;  %v1264_v43 = vld [vmem:[#allocation8 + $0x1780] sm:$0xff] }
 0x1d9   :  { %v9191_v51 = vcombine.high %v1249_v38, %v1253_v39  ;;  %v1261_v5 = vld [vmem:[#allocation8 + $0x1768] sm:$0xff]  ;;  %v9190_v6 = vcombine.low %v1249_v38, %v1253_v39  ;;  %v1288_v39 = vld [vmem:[#allocation8 + $0x1840] sm:$0xff] }
 0x1db   :  { %6916 = vmatpush1.bf16.msra.mxu0 %v9140_v26  ;;  %7244 = vmatpush1.bf16.msra.mxu1 %v9142_v52  ;;  %v379_v26 = vcombine.low %v315_v61, %v319_v13  ;;  %v380_v52 = vcombine.low %v323_v14, %v327_v17  ;;  %v1268_v61 = vld [vmem:[#allocation8 + $0x17a0] sm:$0xff]  ;;  %v1265_v14 = vld [vmem:[#allocation8 + $0x1788] sm:$0xff] }
 0x1dc   :  { %6917 = vmatprep.subr.bf16.mxu0 %v9149_v27  ;;  %7245 = vmatprep.subr.bf16.mxu1 %v9151_v30  ;;  %v1241_v27 = vld [vmem:[#allocation8 + $0x16c8] sm:$0xff]  ;;  %v9181_v30 = vcombine.high %v1240_v31, %v1244_v22  ;;  %v1272_v31 = vld [vmem:[#allocation8 + $0x17c0] sm:$0xff] }
 0x1dd   :  { %v9183_v32 = vcombine.high %v1241_v27, %v1245_v28  ;;  %v394_v37 = vrot.slane %v380_v52, %v10225_v63  ;;  %v9182_v46 = vcombine.low %v1241_v27, %v1245_v28  ;;  %v1269_v17 = vld [vmem:[#allocation8 + $0x17a8] sm:$0xff]  ;;  %v1276_v22 = vld [vmem:[#allocation8 + $0x17e0] sm:$0xff]  ;;  %v9204_v52 = vcombine.low %v1264_v43, %v1268_v61 }
 0x1de   :  { %v9206_v27 = vcombine.low %v1265_v14, %v1269_v17  ;;  %v9213_v28 = vcombine.high %v1272_v31, %v1276_v22 }
 0x1df   :  { %6918 = vmatpush1.bf16.msra.mxu0 %v9148_v34  ;;  %7246 = vmatpush1.bf16.msra.mxu1 %v9150_v36  ;;  %v1252_v34 = vld [vmem:[#allocation8 + $0x1720] sm:$0xff]  ;;  %v251_v36 = vcombine.low %v243_v23, %v250_v25  ;;  %v1273_v25 = vld [vmem:[#allocation8 + $0x17c8] sm:$0xff] }
 0x1e0   :  { %6919 = vmatprep.subr.bf16.mxu0 %v9157_v35  ;;  %7247 = vmatprep.subr.bf16.mxu1 %v9159_v47  ;;  %v387_v35 = vrot.slane %v379_v26, %v10225_v63  ;;  %v9189_v47 = vcombine.high %v1248_v33, %v1252_v34  ;;  %v9188_v7 = vcombine.low %v1248_v33, %v1252_v34  ;;  %v1277_v26 = vld [vmem:[#allocation8 + $0x17e8] sm:$0xff] }
 0x1e1   :  { %v1281_v33 = vld [vmem:[#allocation8 + $0x1808] sm:$0xff] }
 0x1e2   :  { %v1285_v34 = vld [vmem:[#allocation8 + $0x1828] sm:$0xff] }
 0x1e3   :  { %6920 = vmatpush1.bf16.msra.mxu0 %v9156_v55  ;;  %7248 = vmatpush1.bf16.msra.mxu1 %v9158_v0  ;;  %v1260_v55 = vld [vmem:[#allocation8 + $0x1760] sm:$0xff]  ;;  %v259_v0 = vmul.f32 %v251_v36, %v115_v44  ;;  %v9212_v36 = vcombine.low %v1272_v31, %v1276_v22  ;;  %v9223_v38 = vcombine.high %v1281_v33, %v1285_v34 }
 0x1e4   :  { %6921 = vmatprep.subr.bf16.mxu0 %v9165_v48  ;;  %7249 = vmatprep.subr.bf16.mxu1 %v9167_v3  ;;  %v395_v48 = vcombine.low %v387_v35, %v394_v37  ;;  %v1257_v3 = vld [vmem:[#allocation8 + $0x1748] sm:$0xff]  ;;  %v9197_v8 = vcombine.high %v1256_v59, %v1260_v55  ;;  %v9214_v35 = vcombine.low %v1273_v25, %v1277_v26  ;;  %v1292_v44 = vld [vmem:[#allocation8 + $0x1860] sm:$0xff] }
 0x1e5   :  { %v9199_v12 = vcombine.high %v1257_v3, %v1261_v5  ;;  %v1312_v22 = vld [vmem:[#allocation8 + $0x1900] sm:$0xff] }
 0x1e6   :  { %v403_v13 = vadd.f32 %v395_v48, %v259_v0  ;;  %v9229_v0 = vcombine.high %v1288_v39, %v1292_v44 }
 0x1e7   :  { %6922 = vmatpush1.bf16.msra.mxu0 %v9164_v49  ;;  %7250 = vmatpush1.bf16.msra.mxu1 %v9166_v20  ;;  %v9196_v49 = vcombine.low %v1256_v59, %v1260_v55  ;;  %v9198_v20 = vcombine.low %v1257_v3, %v1261_v5  ;;  %v9222_v55 = vcombine.low %v1281_v33, %v1285_v34  ;;  %v1296_v3 = vld [vmem:[#allocation8 + $0x1880] sm:$0xff]  ;;  %v1321_v34 = vld [vmem:[#allocation8 + $0x1948] sm:$0xff] }
 0x1e8   :  { %6923 = vmatprep.subr.bf16.mxu0 %v9173_v21  ;;  %7251 = vmatprep.subr.bf16.mxu1 %v9175_v62  ;;  %v9205_v21 = vcombine.high %v1264_v43, %v1268_v61  ;;  %v9207_v62 = vcombine.high %v1265_v14, %v1269_v17  ;;  %v10427_v23 = vmax.f32 %v403_v13, 0.0  ;;  %v1300_v5 = vld [vmem:[#allocation8 + $0x18a0] sm:$0xff]  ;;  %v1305_v17 = vld [vmem:[#allocation8 + $0x18c8] sm:$0xff] }
 0x1e9   :  { %v9237_v43 = vcombine.high %v1296_v3, %v1300_v5  ;;  %v1304_v13 = vld [vmem:[#allocation8 + $0x18c0] sm:$0xff] }
 0x1ea   :  { %v1308_v14 = vld [vmem:[#allocation8 + $0x18e0] sm:$0xff] }
 0x1eb   :  { %6924 = vmatpush1.bf16.msra.mxu0 %v9172_v18  ;;  %7252 = vmatpush1.bf16.msra.mxu1 %v9174_v29  ;;  %v9215_v18 = vcombine.high %v1273_v25, %v1277_v26  ;;  %v1280_v29 = vld [vmem:[#allocation8 + $0x1800] sm:$0xff]  ;;  %v1313_v26 = vld [vmem:[#allocation8 + $0x1908] sm:$0xff] }
 0x1ec   :  { %6925 = vmatprep.subr.bf16.mxu0 %v9181_v30  ;;  %7253 = vmatprep.subr.bf16.mxu1 %v9183_v32  ;;  %v1284_v30 = vld [vmem:[#allocation8 + $0x1820] sm:$0xff]  ;;  %v10431_v32 = vrot.slane %v10427_v23, %v10225_v63 }
 0x1ed   :  { %v9221_v37 = vcombine.high %v1280_v29, %v1284_v30  ;;  %v9220_v59 = vcombine.low %v1280_v29, %v1284_v30  ;;  %v1316_v25 = vld [vmem:[#allocation8 + $0x1920] sm:$0xff] }
 0x1ee   :  { %v1320_v30 = vld [vmem:[#allocation8 + $0x1940] sm:$0xff] }
 0x1ef   :  { %6926 = vmatpush1.bf16.msra.mxu0 %v9180_v45  ;;  %7254 = vmatpush1.bf16.msra.mxu1 %v9182_v46  ;;  %v478_v45 = vcombine.high %v10431_v32, %v10431_v32  ;;  %v10437_v46 = vpack.c.bf16 %v10393_v1, %v10393_v1  ;;  %v9228_v1 = vcombine.low %v1288_v39, %v1292_v44  ;;  %v1324_v33 = vld [vmem:[#allocation8 + $0x1960] sm:$0xff] }
 0x1f0   :  { %6927 = vmatprep.subr.bf16.mxu0 %v9189_v47  ;;  %7255 = vmatprep.subr.bf16.mxu1 %v9191_v51  ;;  %v1289_v47 = vld [vmem:[#allocation8 + $0x1848] sm:$0xff]  ;;  %v1328_v44 = vld [vmem:[#allocation8 + $0x1980] sm:$0xff] }
 0x1f1   :  { %v1293_v51 = vld [vmem:[#allocation8 + $0x1868] sm:$0xff] }
 0x1f2   :  { %v9231_v48 = vcombine.high %v1289_v47, %v1293_v51 }
 0x1f3   :  { %6928 = vmatpush1.bf16.msra.mxu0 %v9188_v7  ;;  %7256 = vmatpush1.bf16.msra.mxu1 %v9190_v6  ;;  %v10439_v7 = vpack.c.bf16 %v478_v45, %v478_v45  ;;  %v1297_v6 = vld [vmem:[#allocation8 + $0x1888] sm:$0xff]  ;;  %v1332_v45 = vld [vmem:[#allocation8 + $0x19a0] sm:$0xff] }
 0x1f4   :  { %6929 = vmatprep.subr.bf16.mxu0 %v9197_v8  ;;  %7257 = vmatprep.subr.bf16.mxu1 %v9199_v12  ;;  %v1301_v8 = vld [vmem:[#allocation8 + $0x18a8] sm:$0xff]  ;;  %v9230_v12 = vcombine.low %v1289_v47, %v1293_v51 }
 0x1f5   :  { %v9239_v61 = vcombine.high %v1297_v6, %v1301_v8  ;;  %v1329_v47 = vld [vmem:[#allocation8 + $0x1988] sm:$0xff] }
 0x1f6   :  { %v1333_v51 = vld [vmem:[#allocation8 + $0x19a8] sm:$0xff] }
 0x1f7   :  { %6930 = vmatpush1.bf16.msra.mxu0 %v9196_v49  ;;  %7258 = vmatpush1.bf16.msra.mxu1 %v9198_v20  ;;  %v1309_v49 = vld [vmem:[#allocation8 + $0x18e8] sm:$0xff]  ;;  %v9236_v20 = vcombine.low %v1296_v3, %v1300_v5  ;;  %v1336_v3 = vld [vmem:[#allocation8 + $0x19c0] sm:$0xff] }
 0x1f8   :  { %6931 = vmatprep.subr.bf16.mxu0 %v9205_v21  ;;  %7259 = vmatprep.subr.bf16.mxu1 %v9207_v62  ;;  %v9238_v21 = vcombine.low %v1297_v6, %v1301_v8  ;;  %v9245_v62 = vcombine.high %v1304_v13, %v1308_v14  ;;  %v9247_v31 = vcombine.high %v1305_v17, %v1309_v49  ;;  %v1340_v5 = vld [vmem:[#allocation8 + $0x19e0] sm:$0xff]  ;;  %v1337_v6 = vld [vmem:[#allocation8 + $0x19c8] sm:$0xff] }
 0x1f9   :  { %v1341_v8 = vld [vmem:[#allocation8 + $0x19e8] sm:$0xff] }
 0x1fb   :  { %6932 = vmatpush1.bf16.msra.mxu0 %v9204_v52  ;;  %7260 = vmatpush1.bf16.msra.mxu1 %v9206_v27  ;;  %v1317_v52 = vld [vmem:[#allocation8 + $0x1928] sm:$0xff]  ;;  %v9244_v27 = vcombine.low %v1304_v13, %v1308_v14  ;;  %v1344_v13 = vld [vmem:[#allocation8 + $0x1a00] sm:$0xff] }
 0x1fc   :  { %6933 = vmatprep.subr.bf16.mxu0 %v9213_v28  ;;  %7261 = vmatprep.subr.bf16.mxu1 %v9215_v18  ;;  %v9246_v28 = vcombine.low %v1305_v17, %v1309_v49  ;;  %v9253_v18 = vcombine.high %v1312_v22, %v1316_v25  ;;  %v9255_v29 = vcombine.high %v1313_v26, %v1317_v52  ;;  %v1348_v14 = vld [vmem:[#allocation8 + $0x1a20] sm:$0xff]  ;;  %v1345_v17 = vld [vmem:[#allocation8 + $0x1a08] sm:$0xff] }
 0x1fd   :  { %v1349_v49 = vld [vmem:[#allocation8 + $0x1a28] sm:$0xff] }
 0x1ff   :  { %6934 = vmatpush1.bf16.msra.mxu0 %v9212_v36  ;;  %7262 = vmatpush1.bf16.msra.mxu1 %v9214_v35  ;;  %v1325_v36 = vld [vmem:[#allocation8 + $0x1968] sm:$0xff]  ;;  %v9252_v35 = vcombine.low %v1312_v22, %v1316_v25  ;;  %v1352_v22 = vld [vmem:[#allocation8 + $0x1a40] sm:$0xff] }
 0x200   :  { %6944 = vmatprep.subr.bf16.mxu0 %v9221_v37  ;;  %7272 = vmatprep.subr.bf16.mxu1 %v9223_v38  ;;  %v9254_v37 = vcombine.low %v1313_v26, %v1317_v52  ;;  %v9261_v38 = vcombine.high %v1320_v30, %v1324_v33  ;;  %v9263_v39 = vcombine.high %v1321_v34, %v1325_v36  ;;  %v1356_v25 = vld [vmem:[#allocation8 + $0x1a60] sm:$0xff]  ;;  %v1353_v26 = vld [vmem:[#allocation8 + $0x1a48] sm:$0xff] }
 0x201   :  { %v1357_v52 = vld [vmem:[#allocation8 + $0x1a68] sm:$0xff] }
 0x202   :  { %6936 = vmatmul.mubr.bf16.vlgmr.msra.gmra.mrb[0].mxu0 %v10437_v46  ;;  %7264 = vmatmul.mubr.bf16.vlgmr.msra.gmra.mrb[0].mxu1 %v10437_v46 }
 0x203   :  { %6945 = vmatpush1.bf16.msra.mxu0 %v9220_v59  ;;  %7273 = vmatpush1.bf16.msra.mxu1 %v9222_v55  ;;  %v9260_v59 = vcombine.low %v1320_v30, %v1324_v33  ;;  %v9262_v55 = vcombine.low %v1321_v34, %v1325_v36  ;;  %v1360_v30 = vld [vmem:[#allocation8 + $0x1a80] sm:$0xff]  ;;  %v1361_v34 = vld [vmem:[#allocation8 + $0x1a88] sm:$0xff] }
 0x204   :  { %6946 = vmatprep.subr.bf16.mxu0 %v9229_v0  ;;  %7274 = vmatprep.subr.bf16.mxu1 %v9231_v48  ;;  %v9269_v0 = vcombine.high %v1328_v44, %v1332_v45  ;;  %v9271_v48 = vcombine.high %v1329_v47, %v1333_v51  ;;  %v1364_v33 = vld [vmem:[#allocation8 + $0x1aa0] sm:$0xff]  ;;  %v1365_v36 = vld [vmem:[#allocation8 + $0x1aa8] sm:$0xff] }
 0x205   :  { %6976 = vmatprep.mubr.bf16.mxu0 %v10439_v7  ;;  %7304 = vmatprep.mubr.bf16.mxu1 %v10439_v7 }
 0x207   :  { %6947 = vmatpush1.bf16.msra.mxu0 %v9228_v1  ;;  %7275 = vmatpush1.bf16.msra.mxu1 %v9230_v12  ;;  %v9268_v1 = vcombine.low %v1328_v44, %v1332_v45  ;;  %v9270_v12 = vcombine.low %v1329_v47, %v1333_v51  ;;  %v1368_v44 = vld [vmem:[#allocation8 + $0x1ac0] sm:$0xff]  ;;  %v1369_v47 = vld [vmem:[#allocation8 + $0x1ac8] sm:$0xff] }
 0x208   :  { %6948 = vmatprep.subr.bf16.mxu0 %v9237_v43  ;;  %7276 = vmatprep.subr.bf16.mxu1 %v9239_v61  ;;  %v9277_v43 = vcombine.high %v1336_v3, %v1340_v5  ;;  %v9279_v61 = vcombine.high %v1337_v6, %v1341_v8  ;;  %v1372_v45 = vld [vmem:[#allocation8 + $0x1ae0] sm:$0xff]  ;;  %v1373_v51 = vld [vmem:[#allocation8 + $0x1ae8] sm:$0xff] }
 0x20b   :  { %6949 = vmatpush1.bf16.msra.mxu0 %v9236_v20  ;;  %7277 = vmatpush1.bf16.msra.mxu1 %v9238_v21  ;;  %v9276_v20 = vcombine.low %v1336_v3, %v1340_v5  ;;  %v9278_v21 = vcombine.low %v1337_v6, %v1341_v8  ;;  %v1376_v3 = vld [vmem:[#allocation8 + $0x1b00] sm:$0xff]  ;;  %v1377_v6 = vld [vmem:[#allocation8 + $0x1b08] sm:$0xff] }
 0x20c   :  { %6950 = vmatprep.subr.bf16.mxu0 %v9245_v62  ;;  %7278 = vmatprep.subr.bf16.mxu1 %v9247_v31  ;;  %v9285_v62 = vcombine.high %v1344_v13, %v1348_v14  ;;  %v9287_v31 = vcombine.high %v1345_v17, %v1349_v49  ;;  %v1380_v5 = vld [vmem:[#allocation8 + $0x1b20] sm:$0xff]  ;;  %v1381_v8 = vld [vmem:[#allocation8 + $0x1b28] sm:$0xff] }
 0x20f   :  { %6951 = vmatpush1.bf16.msra.mxu0 %v9244_v27  ;;  %7279 = vmatpush1.bf16.msra.mxu1 %v9246_v28  ;;  %v9284_v27 = vcombine.low %v1344_v13, %v1348_v14  ;;  %v9286_v28 = vcombine.low %v1345_v17, %v1349_v49  ;;  %v1384_v13 = vld [vmem:[#allocation8 + $0x1b40] sm:$0xff]  ;;  %v1385_v17 = vld [vmem:[#allocation8 + $0x1b48] sm:$0xff] }
 0x210   :  { %6952 = vmatprep.subr.bf16.mxu0 %v9253_v18  ;;  %7280 = vmatprep.subr.bf16.mxu1 %v9255_v29  ;;  %v9293_v18 = vcombine.high %v1352_v22, %v1356_v25  ;;  %v9295_v29 = vcombine.high %v1353_v26, %v1357_v52  ;;  %v1388_v14 = vld [vmem:[#allocation8 + $0x1b60] sm:$0xff]  ;;  %v1389_v49 = vld [vmem:[#allocation8 + $0x1b68] sm:$0xff] }
 0x213   :  { %6953 = vmatpush1.bf16.msra.mxu0 %v9252_v35  ;;  %7281 = vmatpush1.bf16.msra.mxu1 %v9254_v37  ;;  %v9292_v35 = vcombine.low %v1352_v22, %v1356_v25  ;;  %v9294_v37 = vcombine.low %v1353_v26, %v1357_v52  ;;  %v1392_v22 = vld [vmem:[#allocation8 + $0x1b80] sm:$0xff]  ;;  %v1393_v26 = vld [vmem:[#allocation8 + $0x1b88] sm:$0xff] }
 0x214   :  { %6954 = vmatprep.subr.bf16.mxu0 %v9261_v38  ;;  %7282 = vmatprep.subr.bf16.mxu1 %v9263_v39  ;;  %v9301_v38 = vcombine.high %v1360_v30, %v1364_v33  ;;  %v9303_v39 = vcombine.high %v1361_v34, %v1365_v36  ;;  %v1396_v25 = vld [vmem:[#allocation8 + $0x1ba0] sm:$0xff]  ;;  %v1397_v52 = vld [vmem:[#allocation8 + $0x1ba8] sm:$0xff] }
 0x217   :  { %6955 = vmatpush1.bf16.msra.mxu0 %v9260_v59  ;;  %7283 = vmatpush1.bf16.msra.mxu1 %v9262_v55  ;;  %v9300_v59 = vcombine.low %v1360_v30, %v1364_v33  ;;  %v9302_v55 = vcombine.low %v1361_v34, %v1365_v36  ;;  %v1400_v30 = vld [vmem:[#allocation8 + $0x1bc0] sm:$0xff]  ;;  %v463_v34 = vcombine.high %v10427_v23, %v10427_v23  ;;  %v1401_v36 = vld [vmem:[#allocation8 + $0x1bc8] sm:$0xff] }
 0x218   :  { %6956 = vmatprep.subr.bf16.mxu0 %v9269_v0  ;;  %7284 = vmatprep.subr.bf16.mxu1 %v9271_v48  ;;  %v9309_v0 = vcombine.high %v1368_v44, %v1372_v45  ;;  %v9311_v48 = vcombine.high %v1369_v47, %v1373_v51  ;;  %v1404_v33 = vld [vmem:[#allocation8 + $0x1be0] sm:$0xff] }
 0x21b   :  { %6957 = vmatpush1.bf16.msra.mxu0 %v9268_v1  ;;  %7285 = vmatpush1.bf16.msra.mxu1 %v9270_v12  ;;  %v9308_v1 = vcombine.low %v1368_v44, %v1372_v45  ;;  %v9310_v12 = vcombine.low %v1369_v47, %v1373_v51  ;;  %v1408_v45 = vld [vmem:[#allocation8 + $0x1c00] sm:$0xff]  ;;  %v10448_v51 = vrot.slane %v463_v34, %v10225_v63  ;;  %v1417_v63 = vld [vmem:[#allocation8 + $0x1c48] sm:$0xff] }
 0x21c   :  { %6958 = vmatprep.subr.bf16.mxu0 %v9277_v43  ;;  %7286 = vmatprep.subr.bf16.mxu1 %v9279_v61  ;;  %v9317_v43 = vcombine.high %v1376_v3, %v1380_v5  ;;  %v9319_v61 = vcombine.high %v1377_v6, %v1381_v8  ;;  %v1412_v47 = vld [vmem:[#allocation8 + $0x1c20] sm:$0xff] }
 0x21d   :  { %v1440_v34 = vld [vmem:[#allocation8 + $0x1d00] sm:$0xff] }
 0x21f   :  { %6959 = vmatpush1.bf16.msra.mxu0 %v9276_v20  ;;  %7287 = vmatpush1.bf16.msra.mxu1 %v9278_v21  ;;  %v9316_v20 = vcombine.low %v1376_v3, %v1380_v5  ;;  %v9318_v21 = vcombine.low %v1377_v6, %v1381_v8  ;;  %v1416_v5 = vld [vmem:[#allocation8 + $0x1c40] sm:$0xff]  ;;  %v479_v8 = vcombine.high %v10448_v51, %v10448_v51 }
 0x220   :  { %6960 = vmatprep.subr.bf16.mxu0 %v9285_v62  ;;  %7288 = vmatprep.subr.bf16.mxu1 %v9287_v31  ;;  %v9325_v62 = vcombine.high %v1384_v13, %v1388_v14  ;;  %v9327_v31 = vcombine.high %v1385_v17, %v1389_v49  ;;  %v1420_v6 = vld [vmem:[#allocation8 + $0x1c60] sm:$0xff] }
 0x223   :  { %6961 = vmatpush1.bf16.msra.mxu0 %v9284_v27  ;;  %7289 = vmatpush1.bf16.msra.mxu1 %v9286_v28  ;;  %v9324_v27 = vcombine.low %v1384_v13, %v1388_v14  ;;  %v9326_v28 = vcombine.low %v1385_v17, %v1389_v49  ;;  %v9357_v13 = vcombine.high %v1416_v5, %v1420_v6  ;;  %v1424_v17 = vld [vmem:[#allocation8 + $0x1c80] sm:$0xff] }
 0x224   :  { %6962 = vmatprep.subr.bf16.mxu0 %v9293_v18  ;;  %7290 = vmatprep.subr.bf16.mxu1 %v9295_v29  ;;  %v9333_v18 = vcombine.high %v1392_v22, %v1396_v25  ;;  %v9335_v29 = vcombine.high %v1393_v26, %v1397_v52  ;;  %v1428_v49 = vld [vmem:[#allocation8 + $0x1ca0] sm:$0xff] }
 0x227   :  { %6963 = vmatpush1.bf16.msra.mxu0 %v9292_v35  ;;  %7291 = vmatpush1.bf16.msra.mxu1 %v9294_v37  ;;  %v1405_v35 = vld [vmem:[#allocation8 + $0x1be8] sm:$0xff]  ;;  %v9332_v37 = vcombine.low %v1392_v22, %v1396_v25  ;;  %v9365_v22 = vcombine.high %v1424_v17, %v1428_v49 }
 0x228   :  { %6964 = vmatprep.subr.bf16.mxu0 %v9301_v38  ;;  %7292 = vmatprep.subr.bf16.mxu1 %v9303_v39  ;;  %v9334_v38 = vcombine.low %v1393_v26, %v1397_v52  ;;  %v9341_v39 = vcombine.high %v1400_v30, %v1404_v33  ;;  %v9343_v44 = vcombine.high %v1401_v36, %v1405_v35  ;;  %v1432_v26 = vld [vmem:[#allocation8 + $0x1cc0] sm:$0xff] }
 0x229   :  { %v9342_v23 = vcombine.low %v1401_v36, %v1405_v35  ;;  %v1436_v52 = vld [vmem:[#allocation8 + $0x1ce0] sm:$0xff]  ;;  %v1441_v35 = vld [vmem:[#allocation8 + $0x1d08] sm:$0xff] }
 0x22a   :  { %v1444_v36 = vld [vmem:[#allocation8 + $0x1d20] sm:$0xff] }
 0x22b   :  { %6965 = vmatpush1.bf16.msra.mxu0 %v9300_v59  ;;  %7293 = vmatpush1.bf16.msra.mxu1 %v9302_v55  ;;  %v1409_v59 = vld [vmem:[#allocation8 + $0x1c08] sm:$0xff] }
 0x22c   :  { %6966 = vmatprep.subr.bf16.mxu0 %v9309_v0  ;;  %7294 = vmatprep.subr.bf16.mxu1 %v9311_v48  ;;  %v1413_v55 = vld [vmem:[#allocation8 + $0x1c28] sm:$0xff]  ;;  %v9340_v0 = vcombine.low %v1400_v30, %v1404_v33  ;;  %v9349_v48 = vcombine.high %v1408_v45, %v1412_v47  ;;  %v9373_v30 = vcombine.high %v1432_v26, %v1436_v52 }
 0x22d   :  { %v9351_v3 = vcombine.high %v1409_v59, %v1413_v55 }
 0x22f   :  { %6967 = vmatpush1.bf16.msra.mxu0 %v9308_v1  ;;  %7295 = vmatpush1.bf16.msra.mxu1 %v9310_v12  ;;  %v10454_v1 = vpack.c.bf16 %v10431_v32, %v10431_v32  ;;  %v1421_v12 = vld [vmem:[#allocation8 + $0x1c68] sm:$0xff]  ;;  %v9356_v32 = vcombine.low %v1416_v5, %v1420_v6  ;;  %v1456_v6 = vld [vmem:[#allocation8 + $0x1d80] sm:$0xff] }
 0x230   :  { %6968 = vmatprep.subr.bf16.mxu0 %v9317_v43  ;;  %7296 = vmatprep.subr.bf16.mxu1 %v9319_v61  ;;  %v9348_v43 = vcombine.low %v1408_v45, %v1412_v47  ;;  %v9350_v61 = vcombine.low %v1409_v59, %v1413_v55  ;;  %v9359_v14 = vcombine.high %v1417_v63, %v1421_v12  ;;  %v1448_v47 = vld [vmem:[#allocation8 + $0x1d40] sm:$0xff]  ;;  %v1449_v55 = vld [vmem:[#allocation8 + $0x1d48] sm:$0xff] }
 0x231   :  { %v1452_v59 = vld [vmem:[#allocation8 + $0x1d60] sm:$0xff] }
 0x233   :  { %6969 = vmatpush1.bf16.msra.mxu0 %v9316_v20  ;;  %7297 = vmatpush1.bf16.msra.mxu1 %v9318_v21  ;;  %v10456_v20 = vpack.c.bf16 %v479_v8, %v479_v8  ;;  %v1425_v21 = vld [vmem:[#allocation8 + $0x1c88] sm:$0xff]  ;;  %v1460_v8 = vld [vmem:[#allocation8 + $0x1da0] sm:$0xff] }
 0x234   :  { %6970 = vmatprep.subr.bf16.mxu0 %v9325_v62  ;;  %7298 = vmatprep.subr.bf16.mxu1 %v9327_v31  ;;  %v1429_v62 = vld [vmem:[#allocation8 + $0x1ca8] sm:$0xff]  ;;  %v9358_v31 = vcombine.low %v1417_v63, %v1421_v12 }
 0x235   :  { %v9367_v25 = vcombine.high %v1425_v21, %v1429_v62  ;;  %v1457_v63 = vld [vmem:[#allocation8 + $0x1d88] sm:$0xff] }
 0x236   :  { %v1461_v12 = vld [vmem:[#allocation8 + $0x1da8] sm:$0xff] }
 0x237   :  { %6971 = vmatpush1.bf16.msra.mxu0 %v9324_v27  ;;  %7299 = vmatpush1.bf16.msra.mxu1 %v9326_v28  ;;  %v1433_v27 = vld [vmem:[#allocation8 + $0x1cc8] sm:$0xff] }
 0x238   :  { %6972 = vmatprep.subr.bf16.mxu0 %v9333_v18  ;;  %7300 = vmatprep.subr.bf16.mxu1 %v9335_v29  ;;  %v1437_v28 = vld [vmem:[#allocation8 + $0x1ce8] sm:$0xff]  ;;  %v9364_v18 = vcombine.low %v1424_v17, %v1428_v49  ;;  %v9366_v29 = vcombine.low %v1425_v21, %v1429_v62  ;;  %v1464_v17 = vld [vmem:[#allocation8 + $0x1dc0] sm:$0xff] }
 0x239   :  { %v9375_v33 = vcombine.high %v1433_v27, %v1437_v28  ;;  %v1468_v49 = vld [vmem:[#allocation8 + $0x1de0] sm:$0xff]  ;;  %v1465_v21 = vld [vmem:[#allocation8 + $0x1dc8] sm:$0xff] }
 0x23a   :  { %v1469_v62 = vld [vmem:[#allocation8 + $0x1de8] sm:$0xff] }
 0x23b   :  { %6973 = vmatpush1.bf16.msra.mxu0 %v9332_v37  ;;  %7301 = vmatpush1.bf16.msra.mxu1 %v9334_v38  ;;  %v1445_v37 = vld [vmem:[#allocation8 + $0x1d28] sm:$0xff]  ;;  %v9372_v38 = vcombine.low %v1432_v26, %v1436_v52  ;;  %v1472_v26 = vld [vmem:[#allocation8 + $0x1e00] sm:$0xff] }
 0x23c   :  { %6974 = vmatprep.subr.bf16.mxu0 %v9341_v39  ;;  %7302 = vmatprep.subr.bf16.mxu1 %v9343_v44  ;;  %v9374_v39 = vcombine.low %v1433_v27, %v1437_v28  ;;  %v9381_v44 = vcombine.high %v1440_v34, %v1444_v36  ;;  %v9383_v45 = vcombine.high %v1441_v35, %v1445_v37  ;;  %v1476_v52 = vld [vmem:[#allocation8 + $0x1e20] sm:$0xff]  ;;  %v1473_v27 = vld [vmem:[#allocation8 + $0x1e08] sm:$0xff] }
 0x23d   :  { %v1477_v28 = vld [vmem:[#allocation8 + $0x1e28] sm:$0xff] }
 0x23f   :  { %6975 = vmatpush1.bf16.msra.mxu0 %v9340_v0  ;;  %7303 = vmatpush1.bf16.msra.mxu1 %v9342_v23  ;;  %v1453_v0 = vld [vmem:[#allocation8 + $0x1d68] sm:$0xff]  ;;  %v9380_v23 = vcombine.low %v1440_v34, %v1444_v36  ;;  %v1480_v34 = vld [vmem:[#allocation8 + $0x1e40] sm:$0xff] }
 0x240   :  { %6985 = vmatprep.subr.bf16.mxu0 %v9349_v48  ;;  %7313 = vmatprep.subr.bf16.mxu1 %v9351_v3  ;;  %v9382_v48 = vcombine.low %v1441_v35, %v1445_v37  ;;  %v9389_v3 = vcombine.high %v1448_v47, %v1452_v59  ;;  %v9391_v5 = vcombine.high %v1449_v55, %v1453_v0  ;;  %v1484_v36 = vld [vmem:[#allocation8 + $0x1e60] sm:$0xff]  ;;  %v1481_v35 = vld [vmem:[#allocation8 + $0x1e48] sm:$0xff] }
 0x241   :  { %v1485_v37 = vld [vmem:[#allocation8 + $0x1e68] sm:$0xff] }
 0x242   :  { %6977 = vmatmul.mubr.bf16.vlgmr.msra.gmra.mrb[0].mxu0 %v10454_v1  ;;  %7305 = vmatmul.mubr.bf16.vlgmr.msra.gmra.mrb[0].mxu1 %v10454_v1 }
 0x243   :  { %6986 = vmatpush1.bf16.msra.mxu0 %v9348_v43  ;;  %7314 = vmatpush1.bf16.msra.mxu1 %v9350_v61  ;;  %v9388_v43 = vcombine.low %v1448_v47, %v1452_v59  ;;  %v9390_v61 = vcombine.low %v1449_v55, %v1453_v0  ;;  %v1488_v47 = vld [vmem:[#allocation8 + $0x1e80] sm:$0xff]  ;;  %v1489_v55 = vld [vmem:[#allocation8 + $0x1e88] sm:$0xff] }
 0x244   :  { %6987 = vmatprep.subr.bf16.mxu0 %v9357_v13  ;;  %7315 = vmatprep.subr.bf16.mxu1 %v9359_v14  ;;  %v9397_v13 = vcombine.high %v1456_v6, %v1460_v8  ;;  %v9399_v14 = vcombine.high %v1457_v63, %v1461_v12  ;;  %v1492_v59 = vld [vmem:[#allocation8 + $0x1ea0] sm:$0xff]  ;;  %v1493_v0 = vld [vmem:[#allocation8 + $0x1ea8] sm:$0xff] }
 0x245   :  { %7017 = vmatprep.mubr.bf16.mxu0 %v10456_v20  ;;  %7345 = vmatprep.mubr.bf16.mxu1 %v10456_v20 }
 0x247   :  { %6988 = vmatpush1.bf16.msra.mxu0 %v9356_v32  ;;  %7316 = vmatpush1.bf16.msra.mxu1 %v9358_v31  ;;  %v9396_v32 = vcombine.low %v1456_v6, %v1460_v8  ;;  %v9398_v31 = vcombine.low %v1457_v63, %v1461_v12  ;;  %v1496_v6 = vld [vmem:[#allocation8 + $0x1ec0] sm:$0xff]  ;;  %v1497_v63 = vld [vmem:[#allocation8 + $0x1ec8] sm:$0xff] }
 0x248   :  { %6989 = vmatprep.subr.bf16.mxu0 %v9365_v22  ;;  %7317 = vmatprep.subr.bf16.mxu1 %v9367_v25  ;;  %v9405_v22 = vcombine.high %v1464_v17, %v1468_v49  ;;  %v9407_v25 = vcombine.high %v1465_v21, %v1469_v62  ;;  %v1500_v8 = vld [vmem:[#allocation8 + $0x1ee0] sm:$0xff]  ;;  %v1501_v12 = vld [vmem:[#allocation8 + $0x1ee8] sm:$0xff] }
 0x24b   :  { %6990 = vmatpush1.bf16.msra.mxu0 %v9364_v18  ;;  %7318 = vmatpush1.bf16.msra.mxu1 %v9366_v29  ;;  %v9404_v18 = vcombine.low %v1464_v17, %v1468_v49  ;;  %v9406_v29 = vcombine.low %v1465_v21, %v1469_v62  ;;  %v1504_v17 = vld [vmem:[#allocation8 + $0x1f00] sm:$0xff]  ;;  %v1505_v21 = vld [vmem:[#allocation8 + $0x1f08] sm:$0xff] }
 0x24c   :  { %6991 = vmatprep.subr.bf16.mxu0 %v9373_v30  ;;  %7319 = vmatprep.subr.bf16.mxu1 %v9375_v33  ;;  %v9413_v30 = vcombine.high %v1472_v26, %v1476_v52  ;;  %v9415_v33 = vcombine.high %v1473_v27, %v1477_v28  ;;  %v1508_v49 = vld [vmem:[#allocation8 + $0x1f20] sm:$0xff]  ;;  %v1509_v62 = vld [vmem:[#allocation8 + $0x1f28] sm:$0xff] }
 0x24f   :  { %6992 = vmatpush1.bf16.msra.mxu0 %v9372_v38  ;;  %7320 = vmatpush1.bf16.msra.mxu1 %v9374_v39  ;;  %v9412_v38 = vcombine.low %v1472_v26, %v1476_v52  ;;  %v9414_v39 = vcombine.low %v1473_v27, %v1477_v28  ;;  %v1512_v26 = vld [vmem:[#allocation8 + $0x1f40] sm:$0xff]  ;;  %v1513_v27 = vld [vmem:[#allocation8 + $0x1f48] sm:$0xff] }
 0x250   :  { %6993 = vmatprep.subr.bf16.mxu0 %v9381_v44  ;;  %7321 = vmatprep.subr.bf16.mxu1 %v9383_v45  ;;  %v9421_v44 = vcombine.high %v1480_v34, %v1484_v36  ;;  %v9423_v45 = vcombine.high %v1481_v35, %v1485_v37  ;;  %v1516_v52 = vld [vmem:[#allocation8 + $0x1f60] sm:$0xff]  ;;  %v1517_v28 = vld [vmem:[#allocation8 + $0x1f68] sm:$0xff] }
 0x253   :  { %6994 = vmatpush1.bf16.msra.mxu0 %v9380_v23  ;;  %7322 = vmatpush1.bf16.msra.mxu1 %v9382_v48  ;;  %v9420_v23 = vcombine.low %v1480_v34, %v1484_v36  ;;  %v9422_v48 = vcombine.low %v1481_v35, %v1485_v37  ;;  %v1520_v34 = vld [vmem:[#allocation8 + $0x1f80] sm:$0xff]  ;;  %v1521_v35 = vld [vmem:[#allocation8 + $0x1f88] sm:$0xff] }
 0x254   :  { %6995 = vmatprep.subr.bf16.mxu0 %v9389_v3  ;;  %7323 = vmatprep.subr.bf16.mxu1 %v9391_v5  ;;  %v9429_v3 = vcombine.high %v1488_v47, %v1492_v59  ;;  %v9431_v5 = vcombine.high %v1489_v55, %v1493_v0  ;;  %v1524_v36 = vld [vmem:[#allocation8 + $0x1fa0] sm:$0xff]  ;;  %v1525_v37 = vld [vmem:[#allocation8 + $0x1fa8] sm:$0xff] }
 0x257   :  { %6996 = vmatpush1.bf16.msra.mxu0 %v9388_v43  ;;  %7324 = vmatpush1.bf16.msra.mxu1 %v9390_v61  ;;  %v9428_v43 = vcombine.low %v1488_v47, %v1492_v59  ;;  %v9430_v61 = vcombine.low %v1489_v55, %v1493_v0  ;;  %v1528_v47 = vld [vmem:[#allocation8 + $0x1fc0] sm:$0xff]  ;;  %v1529_v55 = vld [vmem:[#allocation8 + $0x1fc8] sm:$0xff] }
 0x258   :  { %6997 = vmatprep.subr.bf16.mxu0 %v9397_v13  ;;  %7325 = vmatprep.subr.bf16.mxu1 %v9399_v14  ;;  %v9437_v13 = vcombine.high %v1496_v6, %v1500_v8  ;;  %v9439_v14 = vcombine.high %v1497_v63, %v1501_v12  ;;  %v1532_v59 = vld [vmem:[#allocation8 + $0x1fe0] sm:$0xff]  ;;  %v1533_v0 = vld [vmem:[#allocation8 + $0x1fe8] sm:$0xff] }
 0x25b   :  { %6998 = vmatpush1.bf16.msra.mxu0 %v9396_v32  ;;  %7326 = vmatpush1.bf16.msra.mxu1 %v9398_v31  ;;  %v9436_v32 = vcombine.low %v1496_v6, %v1500_v8  ;;  %v9438_v31 = vcombine.low %v1497_v63, %v1501_v12  ;;  %v514_v6 = vld [vmem:[#allocation8 + $0x10] sm:$0xff]  ;;  %v515_v63 = vld [vmem:[#allocation8 + $0x18] sm:$0xff] }
 0x25c   :  { %6999 = vmatprep.subr.bf16.mxu0 %v9405_v22  ;;  %7327 = vmatprep.subr.bf16.mxu1 %v9407_v25  ;;  %v9445_v22 = vcombine.high %v1504_v17, %v1508_v49  ;;  %v9447_v25 = vcombine.high %v1505_v21, %v1509_v62  ;;  %v518_v8 = vld [vmem:[#allocation8 + $0x30] sm:$0xff]  ;;  %v519_v12 = vld [vmem:[#allocation8 + $0x38] sm:$0xff] }
 0x25f   :  { %7000 = vmatpush1.bf16.msra.mxu0 %v9404_v18  ;;  %7328 = vmatpush1.bf16.msra.mxu1 %v9406_v29  ;;  %v9444_v18 = vcombine.low %v1504_v17, %v1508_v49  ;;  %v9446_v29 = vcombine.low %v1505_v21, %v1509_v62  ;;  %v522_v17 = vld [vmem:[#allocation8 + $0x50] sm:$0xff]  ;;  %v10464_v21 = vpack.c.bf16 %v10448_v51, %v10448_v51  ;;  %v523_v62 = vld [vmem:[#allocation8 + $0x58] sm:$0xff] }
 0x260   :  { %7001 = vmatprep.subr.bf16.mxu0 %v9413_v30  ;;  %7329 = vmatprep.subr.bf16.mxu1 %v9415_v33  ;;  %v9453_v30 = vcombine.high %v1512_v26, %v1516_v52  ;;  %v9455_v33 = vcombine.high %v1513_v27, %v1517_v28  ;;  %v526_v49 = vld [vmem:[#allocation8 + $0x70] sm:$0xff] }
 0x261   :  { %v8464_v51 = vcombine.low %v522_v17, %v526_v49 }
 0x263   :  { %7002 = vmatpush1.bf16.msra.mxu0 %v9412_v38  ;;  %7330 = vmatpush1.bf16.msra.mxu1 %v9414_v39  ;;  %v9452_v38 = vcombine.low %v1512_v26, %v1516_v52  ;;  %v9454_v39 = vcombine.low %v1513_v27, %v1517_v28  ;;  %v530_v52 = vld [vmem:[#allocation8 + $0x90] sm:$0xff]  ;;  %v531_v28 = vld [vmem:[#allocation8 + $0x98] sm:$0xff] }
 0x264   :  { %7003 = vmatprep.subr.bf16.mxu0 %v9421_v44  ;;  %7331 = vmatprep.subr.bf16.mxu1 %v9423_v45  ;;  %v9461_v44 = vcombine.high %v1520_v34, %v1524_v36  ;;  %v9463_v45 = vcombine.high %v1521_v35, %v1525_v37  ;;  %v534_v27 = vld [vmem:[#allocation8 + $0xb0] sm:$0xff] }
 0x267   :  { %7004 = vmatpush1.bf16.msra.mxu0 %v9420_v23  ;;  %7332 = vmatpush1.bf16.msra.mxu1 %v9422_v48  ;;  %v9460_v23 = vcombine.low %v1520_v34, %v1524_v36  ;;  %v9462_v48 = vcombine.low %v1521_v35, %v1525_v37  ;;  %v538_v34 = vld [vmem:[#allocation8 + $0xd0] sm:$0xff]  ;;  %v539_v35 = vld [vmem:[#allocation8 + $0xd8] sm:$0xff] }
 0x268   :  { %7005 = vmatprep.subr.bf16.mxu0 %v9429_v3  ;;  %7333 = vmatprep.subr.bf16.mxu1 %v9431_v5  ;;  %v9469_v3 = vcombine.high %v1528_v47, %v1532_v59  ;;  %v9471_v5 = vcombine.high %v1529_v55, %v1533_v0  ;;  %v542_v36 = vld [vmem:[#allocation8 + $0xf0] sm:$0xff]  ;;  %v543_v37 = vld [vmem:[#allocation8 + $0xf8] sm:$0xff] }
 0x26b   :  { %7006 = vmatpush1.bf16.msra.mxu0 %v9428_v43  ;;  %7334 = vmatpush1.bf16.msra.mxu1 %v9430_v61  ;;  %v9468_v43 = vcombine.low %v1528_v47, %v1532_v59  ;;  %v9470_v61 = vcombine.low %v1529_v55, %v1533_v0  ;;  %v546_v47 = vld [vmem:[#allocation8 + $0x110] sm:$0xff]  ;;  %v547_v55 = vld [vmem:[#allocation8 + $0x118] sm:$0xff] }
 0x26c   :  { %7007 = vmatprep.subr.bf16.mxu0 %v9437_v13  ;;  %7335 = vmatprep.subr.bf16.mxu1 %v9439_v14  ;;  %v8457_v13 = vcombine.high %v514_v6, %v518_v8  ;;  %v8459_v14 = vcombine.high %v515_v63, %v519_v12  ;;  %v550_v59 = vld [vmem:[#allocation8 + $0x130] sm:$0xff]  ;;  %v551_v0 = vld [vmem:[#allocation8 + $0x138] sm:$0xff] }
 0x26f   :  { %7008 = vmatpush1.bf16.msra.mxu0 %v9436_v32  ;;  %7336 = vmatpush1.bf16.msra.mxu1 %v9438_v31  ;;  %v527_v32 = vld [vmem:[#allocation8 + $0x78] sm:$0xff]  ;;  %v8456_v31 = vcombine.low %v514_v6, %v518_v8  ;;  %v558_v6 = vld [vmem:[#allocation8 + $0x170] sm:$0xff] }
 0x270   :  { %7009 = vmatprep.subr.bf16.mxu0 %v9445_v22  ;;  %7337 = vmatprep.subr.bf16.mxu1 %v9447_v25  ;;  %v8458_v22 = vcombine.low %v515_v63, %v519_v12  ;;  %v8465_v25 = vcombine.high %v522_v17, %v526_v49  ;;  %v8467_v26 = vcombine.high %v523_v62, %v527_v32  ;;  %v555_v8 = vld [vmem:[#allocation8 + $0x158] sm:$0xff]  ;;  %v566_v17 = vld [vmem:[#allocation8 + $0x1b0] sm:$0xff] }
 0x271   :  { %v559_v63 = vld [vmem:[#allocation8 + $0x178] sm:$0xff]  ;;  %v8488_v12 = vcombine.low %v546_v47, %v550_v59 }
 0x272   :  { %v563_v49 = vld [vmem:[#allocation8 + $0x198] sm:$0xff] }
 0x273   :  { %7010 = vmatpush1.bf16.msra.mxu0 %v9444_v18  ;;  %7338 = vmatpush1.bf16.msra.mxu1 %v9446_v29  ;;  %v535_v18 = vld [vmem:[#allocation8 + $0xb8] sm:$0xff]  ;;  %v8466_v29 = vcombine.low %v523_v62, %v527_v32 }
 0x274   :  { %7011 = vmatprep.subr.bf16.mxu0 %v9453_v30  ;;  %7339 = vmatprep.subr.bf16.mxu1 %v9455_v33  ;;  %v8473_v30 = vcombine.high %v530_v52, %v534_v27  ;;  %v8475_v33 = vcombine.high %v531_v28, %v535_v18  ;;  %v567_v62 = vld [vmem:[#allocation8 + $0x1b8] sm:$0xff] }
 0x277   :  { %7012 = vmatpush1.bf16.msra.mxu0 %v9452_v38  ;;  %7340 = vmatpush1.bf16.msra.mxu1 %v9454_v39  ;;  %v8472_v38 = vcombine.low %v530_v52, %v534_v27  ;;  %v8474_v39 = vcombine.low %v531_v28, %v535_v18  ;;  %v574_v52 = vld [vmem:[#allocation8 + $0x1f0] sm:$0xff]  ;;  %v571_v27 = vld [vmem:[#allocation8 + $0x1d8] sm:$0xff] }
 0x278   :  { %7013 = vmatprep.subr.bf16.mxu0 %v9461_v44  ;;  %7341 = vmatprep.subr.bf16.mxu1 %v9463_v45  ;;  %v8481_v44 = vcombine.high %v538_v34, %v542_v36  ;;  %v8483_v45 = vcombine.high %v539_v35, %v543_v37  ;;  %v575_v28 = vld [vmem:[#allocation8 + $0x1f8] sm:$0xff] }
 0x27b   :  { %7014 = vmatpush1.bf16.msra.mxu0 %v9460_v23  ;;  %7342 = vmatpush1.bf16.msra.mxu1 %v9462_v48  ;;  %v8480_v23 = vcombine.low %v538_v34, %v542_v36  ;;  %v8482_v48 = vcombine.low %v539_v35, %v543_v37  ;;  %v582_v34 = vld [vmem:[#allocation8 + $0x230] sm:$0xff]  ;;  %v579_v36 = vld [vmem:[#allocation8 + $0x218] sm:$0xff] }
 0x27c   :  { %7015 = vmatprep.subr.bf16.mxu0 %v9469_v3  ;;  %7343 = vmatprep.subr.bf16.mxu1 %v9471_v5  ;;  %v8489_v3 = vcombine.high %v546_v47, %v550_v59  ;;  %v554_v5 = vld [vmem:[#allocation8 + $0x150] sm:$0xff]  ;;  %v583_v35 = vld [vmem:[#allocation8 + $0x238] sm:$0xff] }
 0x27d   :  { %v8496_v32 = vcombine.low %v554_v5, %v558_v6  ;;  %v590_v47 = vld [vmem:[#allocation8 + $0x270] sm:$0xff]  ;;  %v587_v59 = vld [vmem:[#allocation8 + $0x258] sm:$0xff] }
 0x27f   :  { %7016 = vmatpush1.bf16.msra.mxu0 %v9468_v43  ;;  %7344 = vmatpush1.bf16.msra.mxu1 %v9470_v61  ;;  %v8490_v43 = vcombine.low %v547_v55, %v551_v0  ;;  %v8497_v61 = vcombine.high %v554_v5, %v558_v6  ;;  %v598_v5 = vld [vmem:[#allocation8 + $0x2b0] sm:$0xff]  ;;  %v595_v6 = vld [vmem:[#allocation8 + $0x298] sm:$0xff] }
 0x280   :  { %7354 = vmatprep.subr.bf16.mxu0 %v8457_v13  ;;  %7682 = vmatprep.subr.bf16.mxu1 %v8459_v14  ;;  %v8499_v13 = vcombine.high %v555_v8, %v559_v63  ;;  %v562_v14 = vld [vmem:[#allocation8 + $0x190] sm:$0xff] }
 0x281   :  { %v8504_v18 = vcombine.low %v562_v14, %v566_v17 }
 0x282   :  { %7018 = vmatmul.mubr.bf16.vlgmr.msra.gmra.mrb[0].mxu0 %v10464_v21  ;;  %7346 = vmatmul.mubr.bf16.vlgmr.msra.gmra.mrb[0].mxu1 %v10464_v21 }
 0x283   :  { %7355 = vmatpush1.bf16.msra.mxu0 %v8456_v31  ;;  %7683 = vmatpush1.bf16.msra.mxu1 %v8458_v22  ;;  %v8498_v31 = vcombine.low %v555_v8, %v559_v63  ;;  %v8505_v22 = vcombine.high %v562_v14, %v566_v17  ;;  %v599_v8 = vld [vmem:[#allocation8 + $0x2b8] sm:$0xff]  ;;  %v606_v14 = vld [vmem:[#allocation8 + $0x2f0] sm:$0xff] }
 0x284   :  { %7356 = vmatprep.subr.bf16.mxu0 %v8465_v25  ;;  %7684 = vmatprep.subr.bf16.mxu1 %v8467_v26  ;;  %v8507_v25 = vcombine.high %v563_v49, %v567_v62  ;;  %v570_v26 = vld [vmem:[#allocation8 + $0x1d0] sm:$0xff]  ;;  %v603_v17 = vld [vmem:[#allocation8 + $0x2d8] sm:$0xff] }
 0x285   :  { %7386 = vmatprep.mubr.bf16.mxu0 %v10257_v9  ;;  %7714 = vmatprep.mubr.bf16.mxu1 %v10257_v9  ;;  %v8491_v9 = vcombine.high %v547_v55, %v551_v0  ;;  %v8512_v37 = vcombine.low %v570_v26, %v574_v52  ;;  %v591_v55 = vld [vmem:[#allocation8 + $0x278] sm:$0xff] }
 0x287   :  { %7357 = vmatpush1.bf16.msra.mxu0 %v8464_v51  ;;  %7685 = vmatpush1.bf16.msra.mxu1 %v8466_v29  ;;  %v8506_v51 = vcombine.low %v563_v49, %v567_v62  ;;  %v8513_v29 = vcombine.high %v570_v26, %v574_v52  ;;  %v607_v49 = vld [vmem:[#allocation8 + $0x2f8] sm:$0xff]  ;;  %v614_v26 = vld [vmem:[#allocation8 + $0x330] sm:$0xff] }
 0x288   :  { %7358 = vmatprep.subr.bf16.mxu0 %v8473_v30  ;;  %7686 = vmatprep.subr.bf16.mxu1 %v8475_v33  ;;  %v8515_v30 = vcombine.high %v571_v27, %v575_v28  ;;  %v578_v33 = vld [vmem:[#allocation8 + $0x210] sm:$0xff]  ;;  %v611_v52 = vld [vmem:[#allocation8 + $0x318] sm:$0xff] }
 0x289   :  { %v8520_v0 = vcombine.low %v578_v33, %v582_v34 }
 0x28b   :  { %7359 = vmatpush1.bf16.msra.mxu0 %v8472_v38  ;;  %7687 = vmatpush1.bf16.msra.mxu1 %v8474_v39  ;;  %v8514_v38 = vcombine.low %v571_v27, %v575_v28  ;;  %v8521_v39 = vcombine.high %v578_v33, %v582_v34  ;;  %v615_v27 = vld [vmem:[#allocation8 + $0x338] sm:$0xff]  ;;  %v622_v33 = vld [vmem:[#allocation8 + $0x370] sm:$0xff] }
 0x28c   :  { %7360 = vmatprep.subr.bf16.mxu0 %v8481_v44  ;;  %7688 = vmatprep.subr.bf16.mxu1 %v8483_v45  ;;  %v8523_v44 = vcombine.high %v579_v36, %v583_v35  ;;  %v586_v45 = vld [vmem:[#allocation8 + $0x250] sm:$0xff]  ;;  %v619_v34 = vld [vmem:[#allocation8 + $0x358] sm:$0xff] }
 0x28d   :  { %v8528_v63 = vcombine.low %v586_v45, %v590_v47 }
 0x28f   :  { %7361 = vmatpush1.bf16.msra.mxu0 %v8480_v23  ;;  %7689 = vmatpush1.bf16.msra.mxu1 %v8482_v48  ;;  %v8522_v23 = vcombine.low %v579_v36, %v583_v35  ;;  %v8529_v48 = vcombine.high %v586_v45, %v590_v47  ;;  %v623_v36 = vld [vmem:[#allocation8 + $0x378] sm:$0xff]  ;;  %v630_v45 = vld [vmem:[#allocation8 + $0x3b0] sm:$0xff] }
 0x290   :  { %7362 = vmatprep.subr.bf16.mxu0 %v8489_v3  ;;  %7690 = vmatprep.subr.bf16.mxu1 %v8491_v9  ;;  %v8531_v3 = vcombine.high %v587_v59, %v591_v55  ;;  %v594_v9 = vld [vmem:[#allocation8 + $0x290] sm:$0xff]  ;;  %v627_v47 = vld [vmem:[#allocation8 + $0x398] sm:$0xff] }
 0x291   :  { %v8536_v62 = vcombine.low %v594_v9, %v598_v5 }
 0x293   :  { %7363 = vmatpush1.bf16.msra.mxu0 %v8488_v12  ;;  %7691 = vmatpush1.bf16.msra.mxu1 %v8490_v43  ;;  %v8530_v12 = vcombine.low %v587_v59, %v591_v55  ;;  %v8537_v43 = vcombine.high %v594_v9, %v598_v5  ;;  %v631_v59 = vld [vmem:[#allocation8 + $0x3b8] sm:$0xff]  ;;  %v638_v9 = vld [vmem:[#allocation8 + $0x3f0] sm:$0xff] }
 0x294   :  { %7364 = vmatprep.subr.bf16.mxu0 %v8497_v61  ;;  %7692 = vmatprep.subr.bf16.mxu1 %v8499_v13  ;;  %v8539_v61 = vcombine.high %v595_v6, %v599_v8  ;;  %v602_v13 = vld [vmem:[#allocation8 + $0x2d0] sm:$0xff]  ;;  %v635_v5 = vld [vmem:[#allocation8 + $0x3d8] sm:$0xff] }
 0x295   :  { %v8544_v28 = vcombine.low %v602_v13, %v606_v14 }
 0x297   :  { %7365 = vmatpush1.bf16.msra.mxu0 %v8496_v32  ;;  %7693 = vmatpush1.bf16.msra.mxu1 %v8498_v31  ;;  %v8538_v32 = vcombine.low %v595_v6, %v599_v8  ;;  %v8545_v31 = vcombine.high %v602_v13, %v606_v14  ;;  %v639_v6 = vld [vmem:[#allocation8 + $0x3f8] sm:$0xff]  ;;  %v646_v13 = vld [vmem:[#allocation8 + $0x430] sm:$0xff] }
 0x298   :  { %7366 = vmatprep.subr.bf16.mxu0 %v8505_v22  ;;  %7694 = vmatprep.subr.bf16.mxu1 %v8507_v25  ;;  %v8547_v22 = vcombine.high %v603_v17, %v607_v49  ;;  %v610_v25 = vld [vmem:[#allocation8 + $0x310] sm:$0xff]  ;;  %v643_v14 = vld [vmem:[#allocation8 + $0x418] sm:$0xff] }
 0x299   :  { %v8552_v35 = vcombine.low %v610_v25, %v614_v26 }
 0x29b   :  { %7367 = vmatpush1.bf16.msra.mxu0 %v8504_v18  ;;  %7695 = vmatpush1.bf16.msra.mxu1 %v8506_v51  ;;  %v8546_v18 = vcombine.low %v603_v17, %v607_v49  ;;  %v8553_v51 = vcombine.high %v610_v25, %v614_v26  ;;  %v647_v17 = vld [vmem:[#allocation8 + $0x438] sm:$0xff]  ;;  %v654_v25 = vld [vmem:[#allocation8 + $0x470] sm:$0xff] }
 0x29c   :  { %7368 = vmatprep.subr.bf16.mxu0 %v8513_v29  ;;  %7696 = vmatprep.subr.bf16.mxu1 %v8515_v30  ;;  %v8555_v29 = vcombine.high %v611_v52, %v615_v27  ;;  %v618_v30 = vld [vmem:[#allocation8 + $0x350] sm:$0xff]  ;;  %v651_v26 = vld [vmem:[#allocation8 + $0x458] sm:$0xff] }
 0x29d   :  { %v8560_v55 = vcombine.low %v618_v30, %v622_v33 }
 0x29f   :  { %7369 = vmatpush1.bf16.msra.mxu0 %v8512_v37  ;;  %7697 = vmatpush1.bf16.msra.mxu1 %v8514_v38  ;;  %v8554_v37 = vcombine.low %v611_v52, %v615_v27  ;;  %v8561_v38 = vcombine.high %v618_v30, %v622_v33  ;;  %v655_v52 = vld [vmem:[#allocation8 + $0x478] sm:$0xff]  ;;  %v662_v30 = vld [vmem:[#allocation8 + $0x4b0] sm:$0xff] }
 0x2a0   :  { %7370 = vmatprep.subr.bf16.mxu0 %v8521_v39  ;;  %7698 = vmatprep.subr.bf16.mxu1 %v8523_v44  ;;  %v8563_v39 = vcombine.high %v619_v34, %v623_v36  ;;  %v626_v44 = vld [vmem:[#allocation8 + $0x390] sm:$0xff]  ;;  %v659_v33 = vld [vmem:[#allocation8 + $0x498] sm:$0xff] }
 0x2a1   :  { %v8568_v8 = vcombine.low %v626_v44, %v630_v45 }
 0x2a3   :  { %7371 = vmatpush1.bf16.msra.mxu0 %v8520_v0  ;;  %7699 = vmatpush1.bf16.msra.mxu1 %v8522_v23  ;;  %v8562_v0 = vcombine.low %v619_v34, %v623_v36  ;;  %v8569_v23 = vcombine.high %v626_v44, %v630_v45  ;;  %v663_v34 = vld [vmem:[#allocation8 + $0x4b8] sm:$0xff]  ;;  %v670_v44 = vld [vmem:[#allocation8 + $0x4f0] sm:$0xff] }
 0x2a4   :  { %7372 = vmatprep.subr.bf16.mxu0 %v8529_v48  ;;  %7700 = vmatprep.subr.bf16.mxu1 %v8531_v3  ;;  %v8571_v48 = vcombine.high %v627_v47, %v631_v59  ;;  %v634_v3 = vld [vmem:[#allocation8 + $0x3d0] sm:$0xff]  ;;  %v667_v45 = vld [vmem:[#allocation8 + $0x4d8] sm:$0xff] }
 0x2a5   :  { %v8576_v49 = vcombine.low %v634_v3, %v638_v9 }
 0x2a7   :  { %7373 = vmatpush1.bf16.msra.mxu0 %v8528_v63  ;;  %7701 = vmatpush1.bf16.msra.mxu1 %v8530_v12  ;;  %v8570_v63 = vcombine.low %v627_v47, %v631_v59  ;;  %v8577_v12 = vcombine.high %v634_v3, %v638_v9  ;;  %v671_v47 = vld [vmem:[#allocation8 + $0x4f8] sm:$0xff] }
 0x2a8   :  { %7374 = vmatprep.subr.bf16.mxu0 %v8537_v43  ;;  %7702 = vmatprep.subr.bf16.mxu1 %v8539_v61  ;;  %v8579_v43 = vcombine.high %v635_v5, %v639_v6  ;;  %v642_v61 = vld [vmem:[#allocation8 + $0x410] sm:$0xff]  ;;  %v675_v3 = vld [vmem:[#allocation8 + $0x518] sm:$0xff] }
 0x2a9   :  { %v8584_v27 = vcombine.low %v642_v61, %v646_v13  ;;  %v679_v9 = vld [vmem:[#allocation8 + $0x538] sm:$0xff] }
 0x2ab   :  { %7375 = vmatpush1.bf16.msra.mxu0 %v8536_v62  ;;  %7703 = vmatpush1.bf16.msra.mxu1 %v8538_v32  ;;  %v8578_v62 = vcombine.low %v635_v5, %v639_v6  ;;  %v8585_v32 = vcombine.high %v642_v61, %v646_v13  ;;  %v8610_v6 = vcombine.low %v667_v45, %v671_v47  ;;  %v687_v61 = vld [vmem:[#allocation8 + $0x578] sm:$0xff] }
 0x2ac   :  { %7376 = vmatprep.subr.bf16.mxu0 %v8545_v31  ;;  %7704 = vmatprep.subr.bf16.mxu1 %v8547_v22  ;;  %v8587_v31 = vcombine.high %v643_v14, %v647_v17  ;;  %v650_v22 = vld [vmem:[#allocation8 + $0x450] sm:$0xff] }
 0x2ad   :  { %v8592_v36 = vcombine.low %v650_v22, %v654_v25 }
 0x2af   :  { %7377 = vmatpush1.bf16.msra.mxu0 %v8544_v28  ;;  %7705 = vmatpush1.bf16.msra.mxu1 %v8546_v18  ;;  %v8586_v28 = vcombine.low %v643_v14, %v647_v17  ;;  %v8593_v18 = vcombine.high %v650_v22, %v654_v25  ;;  %v8618_v14 = vcombine.low %v675_v3, %v679_v9  ;;  %v695_v22 = vld [vmem:[#allocation8 + $0x5b8] sm:$0xff] }
 0x2b0   :  { %7378 = vmatprep.subr.bf16.mxu0 %v8553_v51  ;;  %7706 = vmatprep.subr.bf16.mxu1 %v8555_v29  ;;  %v8595_v51 = vcombine.high %v651_v26, %v655_v52  ;;  %v658_v29 = vld [vmem:[#allocation8 + $0x490] sm:$0xff] }
 0x2b1   :  { %v8600_v59 = vcombine.low %v658_v29, %v662_v30 }
 0x2b3   :  { %7379 = vmatpush1.bf16.msra.mxu0 %v8552_v35  ;;  %7707 = vmatpush1.bf16.msra.mxu1 %v8554_v37  ;;  %v8594_v35 = vcombine.low %v651_v26, %v655_v52  ;;  %v8601_v37 = vcombine.high %v658_v29, %v662_v30  ;;  %v703_v29 = vld [vmem:[#allocation8 + $0x5f8] sm:$0xff] }
 0x2b4   :  { %7380 = vmatprep.subr.bf16.mxu0 %v8561_v38  ;;  %7708 = vmatprep.subr.bf16.mxu1 %v8563_v39  ;;  %v8603_v38 = vcombine.high %v659_v33, %v663_v34  ;;  %v666_v39 = vld [vmem:[#allocation8 + $0x4d0] sm:$0xff] }
 0x2b5   :  { %v8608_v5 = vcombine.low %v666_v39, %v670_v44 }
 0x2b7   :  { %7381 = vmatpush1.bf16.msra.mxu0 %v8560_v55  ;;  %7709 = vmatpush1.bf16.msra.mxu1 %v8562_v0  ;;  %v8609_v55 = vcombine.high %v666_v39, %v670_v44  ;;  %v8611_v0 = vcombine.high %v667_v45, %v671_v47  ;;  %v711_v39 = vld [vmem:[#allocation8 + $0x638] sm:$0xff] }
 0x2b8   :  { %7382 = vmatprep.subr.bf16.mxu0 %v8569_v23  ;;  %7710 = vmatprep.subr.bf16.mxu1 %v8571_v48  ;;  %v674_v23 = vld [vmem:[#allocation8 + $0x510] sm:$0xff] }
 0x2b9   :  { %v678_v48 = vld [vmem:[#allocation8 + $0x530] sm:$0xff] }
 0x2ba   :  { %v8616_v13 = vcombine.low %v674_v23, %v678_v48 }
 0x2bb   :  { %7383 = vmatpush1.bf16.msra.mxu0 %v8568_v8  ;;  %7711 = vmatpush1.bf16.msra.mxu1 %v8570_v63  ;;  %v8617_v8 = vcombine.high %v674_v23, %v678_v48  ;;  %v682_v63 = vld [vmem:[#allocation8 + $0x550] sm:$0xff]  ;;  %v719_v23 = vld [vmem:[#allocation8 + $0x678] sm:$0xff] }
 0x2bc   :  { %7384 = vmatprep.subr.bf16.mxu0 %v8577_v12  ;;  %7712 = vmatprep.subr.bf16.mxu1 %v8579_v43  ;;  %v686_v12 = vld [vmem:[#allocation8 + $0x570] sm:$0xff]  ;;  %v683_v43 = vld [vmem:[#allocation8 + $0x558] sm:$0xff] }
 0x2bd   :  { %v8625_v17 = vcombine.high %v682_v63, %v686_v12  ;;  %v8624_v25 = vcombine.low %v682_v63, %v686_v12  ;;  %v8626_v26 = vcombine.low %v683_v43, %v687_v61  ;;  %v727_v63 = vld [vmem:[#allocation8 + $0x6b8] sm:$0xff] }
 0x2bf   :  { %7385 = vmatpush1.bf16.msra.mxu0 %v8576_v49  ;;  %7713 = vmatpush1.bf16.msra.mxu1 %v8578_v62  ;;  %v8627_v49 = vcombine.high %v683_v43, %v687_v61  ;;  %v690_v62 = vld [vmem:[#allocation8 + $0x590] sm:$0xff] }
 0x2c0   :  { %7395 = vmatprep.subr.bf16.mxu0 %v8585_v32  ;;  %7723 = vmatprep.subr.bf16.mxu1 %v8587_v31  ;;  %v694_v32 = vld [vmem:[#allocation8 + $0x5b0] sm:$0xff]  ;;  %v691_v31 = vld [vmem:[#allocation8 + $0x598] sm:$0xff] }
 0x2c1   :  { %v8633_v52 = vcombine.high %v690_v62, %v694_v32  ;;  %v8632_v30 = vcombine.low %v690_v62, %v694_v32  ;;  %v735_v62 = vld [vmem:[#allocation8 + $0x6f8] sm:$0xff] }
 0x2c2   :  { %7387 = vmatmul.mubr.bf16.vlgmr.msra.gmra.mrb[4].mxu0 %v10288_v11  ;;  %7715 = vmatmul.mubr.bf16.vlgmr.msra.gmra.mrb[4].mxu1 %v10288_v11  ;;  %v8602_v11 = vcombine.low %v659_v33, %v663_v34  ;;  %v8634_v33 = vcombine.low %v691_v31, %v695_v22 }
 0x2c3   :  { %7396 = vmatpush1.bf16.msra.mxu0 %v8584_v27  ;;  %7724 = vmatpush1.bf16.msra.mxu1 %v8586_v28  ;;  %v8635_v27 = vcombine.high %v691_v31, %v695_v22  ;;  %v698_v28 = vld [vmem:[#allocation8 + $0x5d0] sm:$0xff] }
 0x2c4   :  { %7397 = vmatprep.subr.bf16.mxu0 %v8593_v18  ;;  %7725 = vmatprep.subr.bf16.mxu1 %v8595_v51  ;;  %v702_v18 = vld [vmem:[#allocation8 + $0x5f0] sm:$0xff]  ;;  %v699_v51 = vld [vmem:[#allocation8 + $0x5d8] sm:$0xff] }
 0x2c5   :  { %7427 = vmatprep.mubr.bf16.mxu0 %v10292_v19  ;;  %7755 = vmatprep.mubr.bf16.mxu1 %v10292_v19  ;;  %v8619_v19 = vcombine.high %v675_v3, %v679_v9  ;;  %v8641_v34 = vcombine.high %v698_v28, %v702_v18  ;;  %v8640_v44 = vcombine.low %v698_v28, %v702_v18  ;;  %v743_v28 = vld [vmem:[#allocation8 + $0x738] sm:$0xff] }
 0x2c6   :  { %v8642_v45 = vcombine.low %v699_v51, %v703_v29 }
 0x2c7   :  { %7398 = vmatpush1.bf16.msra.mxu0 %v8592_v36  ;;  %7726 = vmatpush1.bf16.msra.mxu1 %v8594_v35  ;;  %v8643_v36 = vcombine.high %v699_v51, %v703_v29  ;;  %v706_v35 = vld [vmem:[#allocation8 + $0x610] sm:$0xff] }
 0x2c8   :  { %7399 = vmatprep.subr.bf16.mxu0 %v8601_v37  ;;  %7727 = vmatprep.subr.bf16.mxu1 %v8603_v38  ;;  %v710_v37 = vld [vmem:[#allocation8 + $0x630] sm:$0xff]  ;;  %v707_v38 = vld [vmem:[#allocation8 + $0x618] sm:$0xff] }
 0x2c9   :  { %v8649_v47 = vcombine.high %v706_v35, %v710_v37  ;;  %v8648_v48 = vcombine.low %v706_v35, %v710_v37  ;;  %v8650_v3 = vcombine.low %v707_v38, %v711_v39  ;;  %v751_v35 = vld [vmem:[#allocation8 + $0x778] sm:$0xff] }
 0x2cb   :  { %7400 = vmatpush1.bf16.msra.mxu0 %v8600_v59  ;;  %7728 = vmatpush1.bf16.msra.mxu1 %v8602_v11  ;;  %v8651_v59 = vcombine.high %v707_v38, %v711_v39  ;;  %v714_v11 = vld [vmem:[#allocation8 + $0x650] sm:$0xff] }
 0x2cc   :  { %7401 = vmatprep.subr.bf16.mxu0 %v8609_v55  ;;  %7729 = vmatprep.subr.bf16.mxu1 %v8611_v0  ;;  %v718_v55 = vld [vmem:[#allocation8 + $0x670] sm:$0xff]  ;;  %v715_v0 = vld [vmem:[#allocation8 + $0x658] sm:$0xff] }
 0x2cd   :  { %v8657_v9 = vcombine.high %v714_v11, %v718_v55  ;;  %v8656_v12 = vcombine.low %v714_v11, %v718_v55  ;;  %v8658_v43 = vcombine.low %v715_v0, %v719_v23  ;;  %v759_v11 = vld [vmem:[#allocation8 + $0x7b8] sm:$0xff] }
 0x2cf   :  { %7402 = vmatpush1.bf16.msra.mxu0 %v8608_v5  ;;  %7730 = vmatpush1.bf16.msra.mxu1 %v8610_v6  ;;  %v8659_v5 = vcombine.high %v715_v0, %v719_v23  ;;  %v722_v6 = vld [vmem:[#allocation8 + $0x690] sm:$0xff] }
 0x2d0   :  { %7403 = vmatprep.subr.bf16.mxu0 %v8617_v8  ;;  %7731 = vmatprep.subr.bf16.mxu1 %v8619_v19  ;;  %v726_v8 = vld [vmem:[#allocation8 + $0x6b0] sm:$0xff]  ;;  %v723_v19 = vld [vmem:[#allocation8 + $0x698] sm:$0xff] }
 0x2d1   :  { %v8665_v61 = vcombine.high %v722_v6, %v726_v8  ;;  %v8664_v32 = vcombine.low %v722_v6, %v726_v8  ;;  %v8666_v31 = vcombine.low %v723_v19, %v727_v63  ;;  %v767_v6 = vld [vmem:[#allocation8 + $0x7f8] sm:$0xff] }
 0x2d3   :  { %7404 = vmatpush1.bf16.msra.mxu0 %v8616_v13  ;;  %7732 = vmatpush1.bf16.msra.mxu1 %v8618_v14  ;;  %v8667_v13 = vcombine.high %v723_v19, %v727_v63  ;;  %v730_v14 = vld [vmem:[#allocation8 + $0x6d0] sm:$0xff] }
 0x2d4   :  { %7405 = vmatprep.subr.bf16.mxu0 %v8625_v17  ;;  %7733 = vmatprep.subr.bf16.mxu1 %v8627_v49  ;;  %v734_v17 = vld [vmem:[#allocation8 + $0x6f0] sm:$0xff]  ;;  %v731_v49 = vld [vmem:[#allocation8 + $0x6d8] sm:$0xff] }
 0x2d5   :  { %v8673_v22 = vcombine.high %v730_v14, %v734_v17  ;;  %v8672_v18 = vcombine.low %v730_v14, %v734_v17  ;;  %v8674_v51 = vcombine.low %v731_v49, %v735_v62  ;;  %v775_v14 = vld [vmem:[#allocation8 + $0x838] sm:$0xff] }
 0x2d7   :  { %7406 = vmatpush1.bf16.msra.mxu0 %v8624_v25  ;;  %7734 = vmatpush1.bf16.msra.mxu1 %v8626_v26  ;;  %v8675_v25 = vcombine.high %v731_v49, %v735_v62  ;;  %v738_v26 = vld [vmem:[#allocation8 + $0x710] sm:$0xff] }
 0x2d8   :  { %7407 = vmatprep.subr.bf16.mxu0 %v8633_v52  ;;  %7735 = vmatprep.subr.bf16.mxu1 %v8635_v27  ;;  %v742_v52 = vld [vmem:[#allocation8 + $0x730] sm:$0xff]  ;;  %v739_v27 = vld [vmem:[#allocation8 + $0x718] sm:$0xff] }
 0x2d9   :  { %v8681_v29 = vcombine.high %v738_v26, %v742_v52  ;;  %v8680_v37 = vcombine.low %v738_v26, %v742_v52  ;;  %v8682_v38 = vcombine.low %v739_v27, %v743_v28  ;;  %v783_v26 = vld [vmem:[#allocation8 + $0x878] sm:$0xff] }
 0x2db   :  { %7408 = vmatpush1.bf16.msra.mxu0 %v8632_v30  ;;  %7736 = vmatpush1.bf16.msra.mxu1 %v8634_v33  ;;  %v8683_v30 = vcombine.high %v739_v27, %v743_v28  ;;  %v746_v33 = vld [vmem:[#allocation8 + $0x750] sm:$0xff] }
 0x2dc   :  { %7409 = vmatprep.subr.bf16.mxu0 %v8641_v34  ;;  %7737 = vmatprep.subr.bf16.mxu1 %v8643_v36  ;;  %v750_v34 = vld [vmem:[#allocation8 + $0x770] sm:$0xff]  ;;  %v747_v36 = vld [vmem:[#allocation8 + $0x758] sm:$0xff] }
 0x2dd   :  { %v8689_v39 = vcombine.high %v746_v33, %v750_v34  ;;  %v8688_v55 = vcombine.low %v746_v33, %v750_v34  ;;  %v8690_v0 = vcombine.low %v747_v36, %v751_v35  ;;  %v791_v33 = vld [vmem:[#allocation8 + $0x8b8] sm:$0xff] }
 0x2df   :  { %7410 = vmatpush1.bf16.msra.mxu0 %v8640_v44  ;;  %7738 = vmatpush1.bf16.msra.mxu1 %v8642_v45  ;;  %v8691_v44 = vcombine.high %v747_v36, %v751_v35  ;;  %v754_v45 = vld [vmem:[#allocation8 + $0x790] sm:$0xff] }
 0x2e0   :  { %7411 = vmatprep.subr.bf16.mxu0 %v8649_v47  ;;  %7739 = vmatprep.subr.bf16.mxu1 %v8651_v59  ;;  %v758_v47 = vld [vmem:[#allocation8 + $0x7b0] sm:$0xff]  ;;  %v755_v59 = vld [vmem:[#allocation8 + $0x798] sm:$0xff] }
 0x2e1   :  { %v8697_v23 = vcombine.high %v754_v45, %v758_v47  ;;  %v8696_v8 = vcombine.low %v754_v45, %v758_v47  ;;  %v8698_v19 = vcombine.low %v755_v59, %v759_v11  ;;  %v799_v45 = vld [vmem:[#allocation8 + $0x8f8] sm:$0xff] }
 0x2e3   :  { %7412 = vmatpush1.bf16.msra.mxu0 %v8648_v48  ;;  %7740 = vmatpush1.bf16.msra.mxu1 %v8650_v3  ;;  %v8699_v48 = vcombine.high %v755_v59, %v759_v11  ;;  %v762_v3 = vld [vmem:[#allocation8 + $0x7d0] sm:$0xff] }
 0x2e4   :  { %7413 = vmatprep.subr.bf16.mxu0 %v8657_v9  ;;  %7741 = vmatprep.subr.bf16.mxu1 %v8659_v5  ;;  %v766_v9 = vld [vmem:[#allocation8 + $0x7f0] sm:$0xff]  ;;  %v763_v5 = vld [vmem:[#allocation8 + $0x7d8] sm:$0xff] }
 0x2e5   :  { %v8705_v63 = vcombine.high %v762_v3, %v766_v9  ;;  %v8704_v17 = vcombine.low %v762_v3, %v766_v9  ;;  %v8706_v49 = vcombine.low %v763_v5, %v767_v6 }
 0x2e7   :  { %7414 = vmatpush1.bf16.msra.mxu0 %v8656_v12  ;;  %7742 = vmatpush1.bf16.msra.mxu1 %v8658_v43  ;;  %v8707_v12 = vcombine.high %v763_v5, %v767_v6  ;;  %v770_v43 = vld [vmem:[#allocation8 + $0x810] sm:$0xff] }
 0x2e8   :  { %7415 = vmatprep.subr.bf16.mxu0 %v8665_v61  ;;  %7743 = vmatprep.subr.bf16.mxu1 %v8667_v13  ;;  %v774_v61 = vld [vmem:[#allocation8 + $0x830] sm:$0xff]  ;;  %v771_v13 = vld [vmem:[#allocation8 + $0x818] sm:$0xff] }
 0x2e9   :  { %v8713_v62 = vcombine.high %v770_v43, %v774_v61  ;;  %v8712_v52 = vcombine.low %v770_v43, %v774_v61  ;;  %v8714_v27 = vcombine.low %v771_v13, %v775_v14  ;;  %v810_v6 = vld [vmem:[#allocation8 + $0x950] sm:$0xff] }
 0x2eb   :  { %7416 = vmatpush1.bf16.msra.mxu0 %v8664_v32  ;;  %7744 = vmatpush1.bf16.msra.mxu1 %v8666_v31  ;;  %v8715_v32 = vcombine.high %v771_v13, %v775_v14  ;;  %v778_v31 = vld [vmem:[#allocation8 + $0x850] sm:$0xff] }
 0x2ec   :  { %7417 = vmatprep.subr.bf16.mxu0 %v8673_v22  ;;  %7745 = vmatprep.subr.bf16.mxu1 %v8675_v25  ;;  %v782_v22 = vld [vmem:[#allocation8 + $0x870] sm:$0xff]  ;;  %v779_v25 = vld [vmem:[#allocation8 + $0x858] sm:$0xff] }
 0x2ed   :  { %v8721_v28 = vcombine.high %v778_v31, %v782_v22  ;;  %v8720_v34 = vcombine.low %v778_v31, %v782_v22  ;;  %v8722_v36 = vcombine.low %v779_v25, %v783_v26  ;;  %v818_v14 = vld [vmem:[#allocation8 + $0x990] sm:$0xff] }
 0x2ef   :  { %7418 = vmatpush1.bf16.msra.mxu0 %v8672_v18  ;;  %7746 = vmatpush1.bf16.msra.mxu1 %v8674_v51  ;;  %v8723_v18 = vcombine.high %v779_v25, %v783_v26  ;;  %v786_v51 = vld [vmem:[#allocation8 + $0x890] sm:$0xff] }
 0x2f0   :  { %7419 = vmatprep.subr.bf16.mxu0 %v8681_v29  ;;  %7747 = vmatprep.subr.bf16.mxu1 %v8683_v30  ;;  %v790_v29 = vld [vmem:[#allocation8 + $0x8b0] sm:$0xff]  ;;  %v787_v30 = vld [vmem:[#allocation8 + $0x898] sm:$0xff] }
 0x2f1   :  { %v8729_v35 = vcombine.high %v786_v51, %v790_v29  ;;  %v8728_v47 = vcombine.low %v786_v51, %v790_v29  ;;  %v826_v26 = vld [vmem:[#allocation8 + $0x9d0] sm:$0xff] }
 0x2f3   :  { %7420 = vmatpush1.bf16.msra.mxu0 %v8680_v37  ;;  %7748 = vmatpush1.bf16.msra.mxu1 %v8682_v38  ;;  %v8731_v37 = vcombine.high %v787_v30, %v791_v33  ;;  %v794_v38 = vld [vmem:[#allocation8 + $0x8d0] sm:$0xff] }
 0x2f4   :  { %7421 = vmatprep.subr.bf16.mxu0 %v8689_v39  ;;  %7749 = vmatprep.subr.bf16.mxu1 %v8691_v44  ;;  %v798_v39 = vld [vmem:[#allocation8 + $0x8f0] sm:$0xff]  ;;  %v795_v44 = vld [vmem:[#allocation8 + $0x8d8] sm:$0xff] }
 0x2f5   :  { %v8737_v59 = vcombine.high %v794_v38, %v798_v39  ;;  %v8739_v11 = vcombine.high %v795_v44, %v799_v45  ;;  %v8736_v3 = vcombine.low %v794_v38, %v798_v39  ;;  %v8738_v9 = vcombine.low %v795_v44, %v799_v45  ;;  %v842_v45 = vld [vmem:[#allocation8 + $0xa50] sm:$0xff] }
 0x2f7   :  { %7422 = vmatpush1.bf16.msra.mxu0 %v8688_v55  ;;  %7750 = vmatpush1.bf16.msra.mxu1 %v8690_v0  ;;  %v802_v55 = vld [vmem:[#allocation8 + $0x910] sm:$0xff] }
 0x2f8   :  { %7423 = vmatprep.subr.bf16.mxu0 %v8697_v23  ;;  %7751 = vmatprep.subr.bf16.mxu1 %v8699_v48  ;;  %v806_v0 = vld [vmem:[#allocation8 + $0x930] sm:$0xff]  ;;  %v803_v23 = vld [vmem:[#allocation8 + $0x918] sm:$0xff] }
 0x2f9   :  { %v807_v48 = vld [vmem:[#allocation8 + $0x938] sm:$0xff]  ;;  %v8745_v5 = vcombine.high %v802_v55, %v806_v0 }
 0x2fa   :  { %v8746_v43 = vcombine.low %v803_v23, %v807_v48 }
 0x2fb   :  { %7424 = vmatpush1.bf16.msra.mxu0 %v8696_v8  ;;  %7752 = vmatpush1.bf16.msra.mxu1 %v8698_v19  ;;  %v814_v8 = vld [vmem:[#allocation8 + $0x970] sm:$0xff]  ;;  %v811_v19 = vld [vmem:[#allocation8 + $0x958] sm:$0xff] }
 0x2fc   :  { %7425 = vmatprep.subr.bf16.mxu0 %v8705_v63  ;;  %7753 = vmatprep.subr.bf16.mxu1 %v8707_v12  ;;  %v815_v63 = vld [vmem:[#allocation8 + $0x978] sm:$0xff]  ;;  %v8744_v12 = vcombine.low %v802_v55, %v806_v0  ;;  %v8753_v61 = vcombine.high %v810_v6, %v814_v8 }
 0x2fd   :  { %v8755_v13 = vcombine.high %v811_v19, %v815_v63  ;;  %v8754_v31 = vcombine.low %v811_v19, %v815_v63  ;;  %v858_v63 = vld [vmem:[#allocation8 + $0xad0] sm:$0xff] }
 0x2ff   :  { %7426 = vmatpush1.bf16.msra.mxu0 %v8704_v17  ;;  %7754 = vmatpush1.bf16.msra.mxu1 %v8706_v49  ;;  %v822_v17 = vld [vmem:[#allocation8 + $0x9b0] sm:$0xff]  ;;  %v819_v49 = vld [vmem:[#allocation8 + $0x998] sm:$0xff] }
 0x300   :  { %7436 = vmatprep.subr.bf16.mxu0 %v8713_v62  ;;  %7764 = vmatprep.subr.bf16.mxu1 %v8715_v32  ;;  %v823_v62 = vld [vmem:[#allocation8 + $0x9b8] sm:$0xff]  ;;  %v8752_v32 = vcombine.low %v810_v6, %v814_v8  ;;  %v8761_v22 = vcombine.high %v818_v14, %v822_v17 }
 0x301   :  { %v8763_v25 = vcombine.high %v819_v49, %v823_v62  ;;  %v8762_v51 = vcombine.low %v819_v49, %v823_v62  ;;  %v866_v62 = vld [vmem:[#allocation8 + $0xb10] sm:$0xff] }
 0x302   :  { %7428 = vmatmul.mubr.bf16.vlgmr.msra.gmra.mrb[4].mxu0 %v10323_v4  ;;  %7756 = vmatmul.mubr.bf16.vlgmr.msra.gmra.mrb[4].mxu1 %v10323_v4  ;;  %v8730_v4 = vcombine.low %v787_v30, %v791_v33  ;;  %v834_v33 = vld [vmem:[#allocation8 + $0xa10] sm:$0xff] }
 0x303   :  { %7437 = vmatpush1.bf16.msra.mxu0 %v8712_v52  ;;  %7765 = vmatpush1.bf16.msra.mxu1 %v8714_v27  ;;  %v830_v52 = vld [vmem:[#allocation8 + $0x9f0] sm:$0xff]  ;;  %v827_v27 = vld [vmem:[#allocation8 + $0x9d8] sm:$0xff] }
 0x304   :  { %7438 = vmatprep.subr.bf16.mxu0 %v8721_v28  ;;  %7766 = vmatprep.subr.bf16.mxu1 %v8723_v18  ;;  %v831_v28 = vld [vmem:[#allocation8 + $0x9f8] sm:$0xff]  ;;  %v8760_v18 = vcombine.low %v818_v14, %v822_v17  ;;  %v8769_v29 = vcombine.high %v826_v26, %v830_v52 }
 0x305   :  { %7468 = vmatprep.mubr.bf16.mxu0 %v10325_v15  ;;  %7796 = vmatprep.mubr.bf16.mxu1 %v10325_v15  ;;  %v8747_v15 = vcombine.high %v803_v23, %v807_v48  ;;  %v8771_v30 = vcombine.high %v827_v27, %v831_v28  ;;  %v8770_v38 = vcombine.low %v827_v27, %v831_v28  ;;  %v850_v48 = vld [vmem:[#allocation8 + $0xa90] sm:$0xff] }
 0x306   :  { %v874_v28 = vld [vmem:[#allocation8 + $0xb50] sm:$0xff] }
 0x307   :  { %7439 = vmatpush1.bf16.msra.mxu0 %v8720_v34  ;;  %7767 = vmatpush1.bf16.msra.mxu1 %v8722_v36  ;;  %v838_v34 = vld [vmem:[#allocation8 + $0xa30] sm:$0xff]  ;;  %v835_v36 = vld [vmem:[#allocation8 + $0xa18] sm:$0xff] }
 0x308   :  { %7440 = vmatprep.subr.bf16.mxu0 %v8729_v35  ;;  %7768 = vmatprep.subr.bf16.mxu1 %v8731_v37  ;;  %v839_v35 = vld [vmem:[#allocation8 + $0xa38] sm:$0xff]  ;;  %v8768_v37 = vcombine.low %v826_v26, %v830_v52  ;;  %v8777_v39 = vcombine.high %v834_v33, %v838_v34 }
 0x309   :  { %v8779_v44 = vcombine.high %v835_v36, %v839_v35  ;;  %v8778_v55 = vcombine.low %v835_v36, %v839_v35  ;;  %v882_v35 = vld [vmem:[#allocation8 + $0xb90] sm:$0xff] }
 0x30b   :  { %7441 = vmatpush1.bf16.msra.mxu0 %v8728_v47  ;;  %7769 = vmatpush1.bf16.msra.mxu1 %v8730_v4  ;;  %v846_v47 = vld [vmem:[#allocation8 + $0xa70] sm:$0xff]  ;;  %v843_v4 = vld [vmem:[#allocation8 + $0xa58] sm:$0xff] }
 0x30c   :  { %7442 = vmatprep.subr.bf16.mxu0 %v8737_v59  ;;  %7770 = vmatprep.subr.bf16.mxu1 %v8739_v11  ;;  %v847_v59 = vld [vmem:[#allocation8 + $0xa78] sm:$0xff]  ;;  %v8776_v11 = vcombine.low %v834_v33, %v838_v34  ;;  %v8785_v0 = vcombine.high %v842_v45, %v846_v47 }
 0x30d   :  { %v8787_v23 = vcombine.high %v843_v4, %v847_v59  ;;  %v8786_v6 = vcombine.low %v843_v4, %v847_v59  ;;  %v890_v59 = vld [vmem:[#allocation8 + $0xbd0] sm:$0xff] }
 0x30f   :  { %7443 = vmatpush1.bf16.msra.mxu0 %v8736_v3  ;;  %7771 = vmatpush1.bf16.msra.mxu1 %v8738_v9  ;;  %v854_v3 = vld [vmem:[#allocation8 + $0xab0] sm:$0xff]  ;;  %v851_v9 = vld [vmem:[#allocation8 + $0xa98] sm:$0xff] }
 0x310   :  { %7444 = vmatprep.subr.bf16.mxu0 %v8745_v5  ;;  %7772 = vmatprep.subr.bf16.mxu1 %v8747_v15  ;;  %v855_v5 = vld [vmem:[#allocation8 + $0xab8] sm:$0xff]  ;;  %v8784_v15 = vcombine.low %v842_v45, %v846_v47  ;;  %v8793_v8 = vcombine.high %v850_v48, %v854_v3 }
 0x311   :  { %v8795_v19 = vcombine.high %v851_v9, %v855_v5  ;;  %v8794_v14 = vcombine.low %v851_v9, %v855_v5  ;;  %v898_v5 = vld [vmem:[#allocation8 + $0xc10] sm:$0xff] }
 0x313   :  { %7445 = vmatpush1.bf16.msra.mxu0 %v8744_v12  ;;  %7773 = vmatpush1.bf16.msra.mxu1 %v8746_v43  ;;  %v862_v12 = vld [vmem:[#allocation8 + $0xaf0] sm:$0xff]  ;;  %v859_v43 = vld [vmem:[#allocation8 + $0xad8] sm:$0xff] }
 0x314   :  { %7446 = vmatprep.subr.bf16.mxu0 %v8753_v61  ;;  %7774 = vmatprep.subr.bf16.mxu1 %v8755_v13  ;;  %v863_v61 = vld [vmem:[#allocation8 + $0xaf8] sm:$0xff]  ;;  %v8792_v13 = vcombine.low %v850_v48, %v854_v3  ;;  %v8801_v17 = vcombine.high %v858_v63, %v862_v12 }
 0x315   :  { %v8803_v49 = vcombine.high %v859_v43, %v863_v61  ;;  %v8802_v26 = vcombine.low %v859_v43, %v863_v61  ;;  %v906_v61 = vld [vmem:[#allocation8 + $0xc50] sm:$0xff] }
 0x317   :  { %7447 = vmatpush1.bf16.msra.mxu0 %v8752_v32  ;;  %7775 = vmatpush1.bf16.msra.mxu1 %v8754_v31  ;;  %v870_v32 = vld [vmem:[#allocation8 + $0xb30] sm:$0xff]  ;;  %v867_v31 = vld [vmem:[#allocation8 + $0xb18] sm:$0xff] }
 0x318   :  { %7448 = vmatprep.subr.bf16.mxu0 %v8761_v22  ;;  %7776 = vmatprep.subr.bf16.mxu1 %v8763_v25  ;;  %v871_v22 = vld [vmem:[#allocation8 + $0xb38] sm:$0xff]  ;;  %v8800_v25 = vcombine.low %v858_v63, %v862_v12  ;;  %v8809_v52 = vcombine.high %v866_v62, %v870_v32 }
 0x319   :  { %v8811_v27 = vcombine.high %v867_v31, %v871_v22  ;;  %v8810_v33 = vcombine.low %v867_v31, %v871_v22  ;;  %v914_v22 = vld [vmem:[#allocation8 + $0xc90] sm:$0xff] }
 0x31b   :  { %7449 = vmatpush1.bf16.msra.mxu0 %v8760_v18  ;;  %7777 = vmatpush1.bf16.msra.mxu1 %v8762_v51  ;;  %v878_v18 = vld [vmem:[#allocation8 + $0xb70] sm:$0xff]  ;;  %v875_v51 = vld [vmem:[#allocation8 + $0xb58] sm:$0xff] }
 0x31c   :  { %7450 = vmatprep.subr.bf16.mxu0 %v8769_v29  ;;  %7778 = vmatprep.subr.bf16.mxu1 %v8771_v30  ;;  %v879_v29 = vld [vmem:[#allocation8 + $0xb78] sm:$0xff]  ;;  %v8808_v30 = vcombine.low %v866_v62, %v870_v32  ;;  %v8817_v34 = vcombine.high %v874_v28, %v878_v18 }
 0x31d   :  { %v8819_v36 = vcombine.high %v875_v51, %v879_v29  ;;  %v8818_v45 = vcombine.low %v875_v51, %v879_v29  ;;  %v922_v29 = vld [vmem:[#allocation8 + $0xcd0] sm:$0xff] }
 0x31f   :  { %7451 = vmatpush1.bf16.msra.mxu0 %v8768_v37  ;;  %7779 = vmatpush1.bf16.msra.mxu1 %v8770_v38  ;;  %v886_v37 = vld [vmem:[#allocation8 + $0xbb0] sm:$0xff]  ;;  %v883_v38 = vld [vmem:[#allocation8 + $0xb98] sm:$0xff] }
 0x320   :  { %7452 = vmatprep.subr.bf16.mxu0 %v8777_v39  ;;  %7780 = vmatprep.subr.bf16.mxu1 %v8779_v44  ;;  %v887_v39 = vld [vmem:[#allocation8 + $0xbb8] sm:$0xff]  ;;  %v8816_v44 = vcombine.low %v874_v28, %v878_v18  ;;  %v8825_v47 = vcombine.high %v882_v35, %v886_v37 }
 0x321   :  { %v8827_v4 = vcombine.high %v883_v38, %v887_v39  ;;  %v8826_v48 = vcombine.low %v883_v38, %v887_v39  ;;  %v930_v38 = vld [vmem:[#allocation8 + $0xd10] sm:$0xff] }
 0x322   :  { %v934_v39 = vld [vmem:[#allocation8 + $0xd30] sm:$0xff] }
 0x323   :  { %7453 = vmatpush1.bf16.msra.mxu0 %v8776_v11  ;;  %7781 = vmatpush1.bf16.msra.mxu1 %v8778_v55  ;;  %v894_v11 = vld [vmem:[#allocation8 + $0xbf0] sm:$0xff]  ;;  %v891_v55 = vld [vmem:[#allocation8 + $0xbd8] sm:$0xff] }
 0x324   :  { %7454 = vmatprep.subr.bf16.mxu0 %v8785_v0  ;;  %7782 = vmatprep.subr.bf16.mxu1 %v8787_v23  ;;  %v895_v0 = vld [vmem:[#allocation8 + $0xbf8] sm:$0xff]  ;;  %v8824_v23 = vcombine.low %v882_v35, %v886_v37  ;;  %v8833_v3 = vcombine.high %v890_v59, %v894_v11 }
 0x325   :  { %v8835_v9 = vcombine.high %v891_v55, %v895_v0  ;;  %v8834_v63 = vcombine.low %v891_v55, %v895_v0  ;;  %v942_v55 = vld [vmem:[#allocation8 + $0xd70] sm:$0xff]  ;;  %v939_v0 = vld [vmem:[#allocation8 + $0xd58] sm:$0xff] }
 0x327   :  { %7455 = vmatpush1.bf16.msra.mxu0 %v8784_v15  ;;  %7783 = vmatpush1.bf16.msra.mxu1 %v8786_v6  ;;  %v902_v15 = vld [vmem:[#allocation8 + $0xc30] sm:$0xff]  ;;  %v899_v6 = vld [vmem:[#allocation8 + $0xc18] sm:$0xff] }
 0x328   :  { %7456 = vmatprep.subr.bf16.mxu0 %v8793_v8  ;;  %7784 = vmatprep.subr.bf16.mxu1 %v8795_v19  ;;  %v903_v8 = vld [vmem:[#allocation8 + $0xc38] sm:$0xff]  ;;  %v8832_v19 = vcombine.low %v890_v59, %v894_v11  ;;  %v8841_v12 = vcombine.high %v898_v5, %v902_v15  ;;  %v8873_v59 = vcombine.high %v930_v38, %v934_v39  ;;  %v938_v11 = vld [vmem:[#allocation8 + $0xd50] sm:$0xff] }
 0x329   :  { %v8843_v43 = vcombine.high %v899_v6, %v903_v8  ;;  %v8842_v62 = vcombine.low %v899_v6, %v903_v8  ;;  %v950_v6 = vld [vmem:[#allocation8 + $0xdb0] sm:$0xff]  ;;  %v947_v8 = vld [vmem:[#allocation8 + $0xd98] sm:$0xff] }
 0x32b   :  { %7457 = vmatpush1.bf16.msra.mxu0 %v8792_v13  ;;  %7785 = vmatpush1.bf16.msra.mxu1 %v8794_v14  ;;  %v910_v13 = vld [vmem:[#allocation8 + $0xc70] sm:$0xff]  ;;  %v907_v14 = vld [vmem:[#allocation8 + $0xc58] sm:$0xff] }
 0x32c   :  { %7458 = vmatprep.subr.bf16.mxu0 %v8801_v17  ;;  %7786 = vmatprep.subr.bf16.mxu1 %v8803_v49  ;;  %v911_v17 = vld [vmem:[#allocation8 + $0xc78] sm:$0xff]  ;;  %v8840_v49 = vcombine.low %v898_v5, %v902_v15  ;;  %v8849_v32 = vcombine.high %v906_v61, %v910_v13  ;;  %v946_v15 = vld [vmem:[#allocation8 + $0xd90] sm:$0xff] }
 0x32d   :  { %v8851_v31 = vcombine.high %v907_v14, %v911_v17  ;;  %v8850_v28 = vcombine.low %v907_v14, %v911_v17  ;;  %v954_v14 = vld [vmem:[#allocation8 + $0xdd0] sm:$0xff] }
 0x32e   :  { %v958_v17 = vld [vmem:[#allocation8 + $0xdf0] sm:$0xff] }
 0x32f   :  { %7459 = vmatpush1.bf16.msra.mxu0 %v8800_v25  ;;  %7787 = vmatpush1.bf16.msra.mxu1 %v8802_v26  ;;  %v918_v25 = vld [vmem:[#allocation8 + $0xcb0] sm:$0xff]  ;;  %v915_v26 = vld [vmem:[#allocation8 + $0xc98] sm:$0xff] }
 0x330   :  { %7460 = vmatprep.subr.bf16.mxu0 %v8809_v52  ;;  %7788 = vmatprep.subr.bf16.mxu1 %v8811_v27  ;;  %v919_v52 = vld [vmem:[#allocation8 + $0xcb8] sm:$0xff]  ;;  %v8848_v27 = vcombine.low %v906_v61, %v910_v13  ;;  %v8857_v18 = vcombine.high %v914_v22, %v918_v25 }
 0x331   :  { %v8859_v51 = vcombine.high %v915_v26, %v919_v52 }
 0x333   :  { %7461 = vmatpush1.bf16.msra.mxu0 %v8808_v30  ;;  %7789 = vmatpush1.bf16.msra.mxu1 %v8810_v33  ;;  %v926_v30 = vld [vmem:[#allocation8 + $0xcf0] sm:$0xff]  ;;  %v923_v33 = vld [vmem:[#allocation8 + $0xcd8] sm:$0xff] }
 0x334   :  { %7462 = vmatprep.subr.bf16.mxu0 %v8817_v34  ;;  %7790 = vmatprep.subr.bf16.mxu1 %v8819_v36  ;;  %v927_v34 = vld [vmem:[#allocation8 + $0xcf8] sm:$0xff]  ;;  %v8856_v36 = vcombine.low %v914_v22, %v918_v25  ;;  %v8865_v35 = vcombine.high %v922_v29, %v926_v30 }
 0x335   :  { %v8867_v37 = vcombine.high %v923_v33, %v927_v34 }
 0x337   :  { %7463 = vmatpush1.bf16.msra.mxu0 %v8816_v44  ;;  %7791 = vmatpush1.bf16.msra.mxu1 %v8818_v45  ;;  %v931_v44 = vld [vmem:[#allocation8 + $0xd18] sm:$0xff] }
 0x338   :  { %7464 = vmatprep.subr.bf16.mxu0 %v8825_v47  ;;  %7792 = vmatprep.subr.bf16.mxu1 %v8827_v4  ;;  %v935_v45 = vld [vmem:[#allocation8 + $0xd38] sm:$0xff]  ;;  %v8864_v47 = vcombine.low %v922_v29, %v926_v30  ;;  %v8866_v4 = vcombine.low %v923_v33, %v927_v34  ;;  %v962_v30 = vld [vmem:[#allocation8 + $0xe10] sm:$0xff] }
 0x339   :  { %v966_v33 = vld [vmem:[#allocation8 + $0xe30] sm:$0xff]  ;;  %v963_v34 = vld [vmem:[#allocation8 + $0xe18] sm:$0xff] }
 0x33b   :  { %7465 = vmatpush1.bf16.msra.mxu0 %v8824_v23  ;;  %7793 = vmatpush1.bf16.msra.mxu1 %v8826_v48  ;;  %v943_v23 = vld [vmem:[#allocation8 + $0xd78] sm:$0xff]  ;;  %v8872_v48 = vcombine.low %v930_v38, %v934_v39  ;;  %v970_v39 = vld [vmem:[#allocation8 + $0xe50] sm:$0xff] }
 0x33c   :  { %7466 = vmatprep.subr.bf16.mxu0 %v8833_v3  ;;  %7794 = vmatprep.subr.bf16.mxu1 %v8835_v9  ;;  %v8874_v3 = vcombine.low %v931_v44, %v935_v45  ;;  %v8881_v9 = vcombine.high %v938_v11, %v942_v55  ;;  %v8883_v5 = vcombine.high %v939_v0, %v943_v23 }
 0x33f   :  { %7467 = vmatpush1.bf16.msra.mxu0 %v8832_v19  ;;  %7795 = vmatpush1.bf16.msra.mxu1 %v8834_v63  ;;  %v951_v19 = vld [vmem:[#allocation8 + $0xdb8] sm:$0xff]  ;;  %v8880_v63 = vcombine.low %v938_v11, %v942_v55  ;;  %v978_v55 = vld [vmem:[#allocation8 + $0xe90] sm:$0xff] }
 0x340   :  { %7477 = vmatprep.subr.bf16.mxu0 %v8841_v12  ;;  %7805 = vmatprep.subr.bf16.mxu1 %v8843_v43  ;;  %v8882_v12 = vcombine.low %v939_v0, %v943_v23  ;;  %v8889_v43 = vcombine.high %v946_v15, %v950_v6  ;;  %v8891_v13 = vcombine.high %v947_v8, %v951_v19  ;;  %v982_v0 = vld [vmem:[#allocation8 + $0xeb0] sm:$0xff]  ;;  %v979_v23 = vld [vmem:[#allocation8 + $0xe98] sm:$0xff] }
 0x342   :  { %7469 = vmatmul.mubr.bf16.vlgmr.msra.gmra.mrb[4].mxu0 %v10340_v40  ;;  %7797 = vmatmul.mubr.bf16.vlgmr.msra.gmra.mrb[4].mxu1 %v10340_v40  ;;  %v8858_v40 = vcombine.low %v915_v26, %v919_v52  ;;  %v8888_v26 = vcombine.low %v946_v15, %v950_v6  ;;  %v986_v6 = vld [vmem:[#allocation8 + $0xed0] sm:$0xff] }
 0x343   :  { %7478 = vmatpush1.bf16.msra.mxu0 %v8840_v49  ;;  %7806 = vmatpush1.bf16.msra.mxu1 %v8842_v62 }
 0x344   :  { %7479 = vmatprep.subr.bf16.mxu0 %v8849_v32  ;;  %7807 = vmatprep.subr.bf16.mxu1 %v8851_v31  ;;  %v955_v32 = vld [vmem:[#allocation8 + $0xdd8] sm:$0xff] }
 0x345   :  { %7509 = vmatprep.mubr.bf16.mxu0 %v10342_v56  ;;  %7837 = vmatprep.mubr.bf16.mxu1 %v10342_v56  ;;  %v8875_v56 = vcombine.high %v931_v44, %v935_v45  ;;  %v959_v31 = vld [vmem:[#allocation8 + $0xdf8] sm:$0xff]  ;;  %v974_v44 = vld [vmem:[#allocation8 + $0xe70] sm:$0xff] }
 0x346   :  { %v8899_v29 = vcombine.high %v955_v32, %v959_v31  ;;  %v971_v45 = vld [vmem:[#allocation8 + $0xe58] sm:$0xff] }
 0x347   :  { %7480 = vmatpush1.bf16.msra.mxu0 %v8848_v27  ;;  %7808 = vmatpush1.bf16.msra.mxu1 %v8850_v28  ;;  %v8890_v28 = vcombine.low %v947_v8, %v951_v19  ;;  %v990_v8 = vld [vmem:[#allocation8 + $0xef0] sm:$0xff]  ;;  %v987_v19 = vld [vmem:[#allocation8 + $0xed8] sm:$0xff] }
 0x348   :  { %7481 = vmatprep.subr.bf16.mxu0 %v8857_v18  ;;  %7809 = vmatprep.subr.bf16.mxu1 %v8859_v51  ;;  %v8897_v18 = vcombine.high %v954_v14, %v958_v17 }
 0x34b   :  { %7482 = vmatpush1.bf16.msra.mxu0 %v8856_v36  ;;  %7810 = vmatpush1.bf16.msra.mxu1 %v8858_v40  ;;  %v967_v36 = vld [vmem:[#allocation8 + $0xe38] sm:$0xff]  ;;  %v8896_v40 = vcombine.low %v954_v14, %v958_v17  ;;  %v994_v17 = vld [vmem:[#allocation8 + $0xf10] sm:$0xff] }
 0x34c   :  { %7483 = vmatprep.subr.bf16.mxu0 %v8865_v35  ;;  %7811 = vmatprep.subr.bf16.mxu1 %v8867_v37  ;;  %v8898_v35 = vcombine.low %v955_v32, %v959_v31  ;;  %v8905_v37 = vcombine.high %v962_v30, %v966_v33  ;;  %v8907_v38 = vcombine.high %v963_v34, %v967_v36  ;;  %v998_v32 = vld [vmem:[#allocation8 + $0xf30] sm:$0xff]  ;;  %v995_v31 = vld [vmem:[#allocation8 + $0xf18] sm:$0xff] }
 0x34f   :  { %7484 = vmatpush1.bf16.msra.mxu0 %v8864_v47  ;;  %7812 = vmatpush1.bf16.msra.mxu1 %v8866_v4  ;;  %v975_v47 = vld [vmem:[#allocation8 + $0xe78] sm:$0xff]  ;;  %v8904_v4 = vcombine.low %v962_v30, %v966_v33  ;;  %v8936_v33 = vcombine.low %v994_v17, %v998_v32 }
 0x350   :  { %7485 = vmatprep.subr.bf16.mxu0 %v8873_v59  ;;  %7813 = vmatprep.subr.bf16.mxu1 %v8875_v56  ;;  %v8906_v59 = vcombine.low %v963_v34, %v967_v36  ;;  %v8913_v56 = vcombine.high %v970_v39, %v974_v44  ;;  %v8915_v11 = vcombine.high %v971_v45, %v975_v47  ;;  %v1007_v30 = vld [vmem:[#allocation8 + $0xf78] sm:$0xff] }
 0x353   :  { %7486 = vmatpush1.bf16.msra.mxu0 %v8872_v48  ;;  %7814 = vmatpush1.bf16.msra.mxu1 %v8874_v3  ;;  %v983_v48 = vld [vmem:[#allocation8 + $0xeb8] sm:$0xff]  ;;  %v8912_v3 = vcombine.low %v970_v39, %v974_v44 }
 0x354   :  { %7487 = vmatprep.subr.bf16.mxu0 %v8881_v9  ;;  %7815 = vmatprep.subr.bf16.mxu1 %v8883_v5  ;;  %v8914_v9 = vcombine.low %v971_v45, %v975_v47  ;;  %v8921_v5 = vcombine.high %v978_v55, %v982_v0  ;;  %v8923_v15 = vcombine.high %v979_v23, %v983_v48  ;;  %v1015_v39 = vld [vmem:[#allocation8 + $0xfb8] sm:$0xff] }
 0x355   :  { %v10482_v61 = vpop.f32.mrb[0].mxu0  ;;  %v10484_v49 = vpop.f32.mrb[0].mxu1 }
 0x356   :  { %v10486_v62 = vpop.f32.mrb[1].mxu0  ;;  %v10488_v22 = vpop.f32.mrb[1].mxu1 }
 0x357   :  { %v7023_v25 = vpop.f32.mrb[2].mxu0  ;;  %7488 = vmatpush1.bf16.msra.mxu0 %v8880_v63  ;;  %v7351_v52 = vpop.f32.mrb[2].mxu1  ;;  %7816 = vmatpush1.bf16.msra.mxu1 %v8882_v12  ;;  %v991_v63 = vld [vmem:[#allocation8 + $0xef8] sm:$0xff]  ;;  %v8920_v12 = vcombine.low %v978_v55, %v982_v0 }
 0x358   :  { %v7024_v27 = vpop.f32.mrb[3].mxu0  ;;  %7489 = vmatprep.subr.bf16.mxu0 %v8889_v43  ;;  %v7352_v51 = vpop.f32.mrb[3].mxu1  ;;  %7817 = vmatprep.subr.bf16.mxu1 %v8891_v13  ;;  %v8922_v43 = vcombine.low %v979_v23, %v983_v48  ;;  %v8929_v13 = vcombine.high %v986_v6, %v990_v8  ;;  %v8931_v14 = vcombine.high %v987_v19, %v991_v63  ;;  %v999_v25 = vld [vmem:[#allocation8 + $0xf38] sm:$0xff] }
 0x359   :  { %v8930_v52 = vcombine.low %v987_v19, %v991_v63  ;;  %v8937_v27 = vcombine.high %v994_v17, %v998_v32  ;;  %v1006_v51 = vld [vmem:[#allocation8 + $0xf70] sm:$0xff]  ;;  %v8938_v34 = vcombine.low %v995_v31, %v999_v25  ;;  %v1023_v55 = vld [vmem:[#allocation8 + $0xff8] sm:$0xff] }
 0x35a   :  { %v1039_v17 = vld [vmem:[#allocation8 + $0x1078] sm:$0xff] }
 0x35b   :  { %7490 = vmatpush1.bf16.msra.mxu0 %v8888_v26  ;;  %7818 = vmatpush1.bf16.msra.mxu1 %v8890_v28  ;;  %v8928_v26 = vcombine.low %v986_v6, %v990_v8  ;;  %v8939_v28 = vcombine.high %v995_v31, %v999_v25  ;;  %v1031_v6 = vld [vmem:[#allocation8 + $0x1038] sm:$0xff] }
 0x35c   :  { %7491 = vmatprep.subr.bf16.mxu0 %v8897_v18  ;;  %7819 = vmatprep.subr.bf16.mxu1 %v8899_v29  ;;  %v1002_v18 = vld [vmem:[#allocation8 + $0xf50] sm:$0xff]  ;;  %v1003_v29 = vld [vmem:[#allocation8 + $0xf58] sm:$0xff] }
 0x35d   :  { %v8945_v36 = vcombine.high %v1002_v18, %v1006_v51  ;;  %v8944_v44 = vcombine.low %v1002_v18, %v1006_v51  ;;  %v8946_v45 = vcombine.low %v1003_v29, %v1007_v30  ;;  %v1047_v18 = vld [vmem:[#allocation8 + $0x10b8] sm:$0xff] }
 0x35f   :  { %7492 = vmatpush1.bf16.msra.mxu0 %v8896_v40  ;;  %7820 = vmatpush1.bf16.msra.mxu1 %v8898_v35  ;;  %v8947_v40 = vcombine.high %v1003_v29, %v1007_v30  ;;  %v1010_v35 = vld [vmem:[#allocation8 + $0xf90] sm:$0xff] }
 0x360   :  { %7493 = vmatprep.subr.bf16.mxu0 %v8905_v37  ;;  %7821 = vmatprep.subr.bf16.mxu1 %v8907_v38  ;;  %v1014_v37 = vld [vmem:[#allocation8 + $0xfb0] sm:$0xff]  ;;  %v1011_v38 = vld [vmem:[#allocation8 + $0xf98] sm:$0xff] }
 0x361   :  { %v8953_v47 = vcombine.high %v1010_v35, %v1014_v37  ;;  %v8952_v0 = vcombine.low %v1010_v35, %v1014_v37  ;;  %v8954_v23 = vcombine.low %v1011_v38, %v1015_v39  ;;  %v1055_v35 = vld [vmem:[#allocation8 + $0x10f8] sm:$0xff] }
 0x363   :  { %7494 = vmatpush1.bf16.msra.mxu0 %v8904_v4  ;;  %7822 = vmatpush1.bf16.msra.mxu1 %v8906_v59  ;;  %v8955_v4 = vcombine.high %v1011_v38, %v1015_v39  ;;  %v1018_v59 = vld [vmem:[#allocation8 + $0xfd0] sm:$0xff] }
 0x364   :  { %7495 = vmatprep.subr.bf16.mxu0 %v8913_v56  ;;  %7823 = vmatprep.subr.bf16.mxu1 %v8915_v11  ;;  %v1022_v56 = vld [vmem:[#allocation8 + $0xff0] sm:$0xff]  ;;  %v1019_v11 = vld [vmem:[#allocation8 + $0xfd8] sm:$0xff] }
 0x365   :  { %v8961_v48 = vcombine.high %v1018_v59, %v1022_v56  ;;  %v8960_v8 = vcombine.low %v1018_v59, %v1022_v56  ;;  %v8962_v19 = vcombine.low %v1019_v11, %v1023_v55 }
 0x367   :  { %7496 = vmatpush1.bf16.msra.mxu0 %v8912_v3  ;;  %7824 = vmatpush1.bf16.msra.mxu1 %v8914_v9  ;;  %v8963_v3 = vcombine.high %v1019_v11, %v1023_v55  ;;  %v1026_v9 = vld [vmem:[#allocation8 + $0x1010] sm:$0xff] }
 0x368   :  { %7497 = vmatprep.subr.bf16.mxu0 %v8921_v5  ;;  %7825 = vmatprep.subr.bf16.mxu1 %v8923_v15  ;;  %v1030_v5 = vld [vmem:[#allocation8 + $0x1030] sm:$0xff]  ;;  %v1027_v15 = vld [vmem:[#allocation8 + $0x1018] sm:$0xff] }
 0x369   :  { %v8969_v63 = vcombine.high %v1026_v9, %v1030_v5  ;;  %v8968_v32 = vcombine.low %v1026_v9, %v1030_v5  ;;  %v8970_v31 = vcombine.low %v1027_v15, %v1031_v6  ;;  %v1066_v55 = vld [vmem:[#allocation8 + $0x1150] sm:$0xff] }
 0x36b   :  { %7498 = vmatpush1.bf16.msra.mxu0 %v8920_v12  ;;  %7826 = vmatpush1.bf16.msra.mxu1 %v8922_v43  ;;  %v8971_v12 = vcombine.high %v1027_v15, %v1031_v6  ;;  %v1034_v43 = vld [vmem:[#allocation8 + $0x1050] sm:$0xff] }
 0x36c   :  { %7499 = vmatprep.subr.bf16.mxu0 %v8929_v13  ;;  %7827 = vmatprep.subr.bf16.mxu1 %v8931_v14  ;;  %v1038_v13 = vld [vmem:[#allocation8 + $0x1070] sm:$0xff]  ;;  %v1035_v14 = vld [vmem:[#allocation8 + $0x1058] sm:$0xff] }
 0x36d   :  { %v8977_v25 = vcombine.high %v1034_v43, %v1038_v13  ;;  %v8976_v51 = vcombine.low %v1034_v43, %v1038_v13  ;;  %v8978_v29 = vcombine.low %v1035_v14, %v1039_v17  ;;  %v1074_v6 = vld [vmem:[#allocation8 + $0x1190] sm:$0xff] }
 0x36f   :  { %7500 = vmatpush1.bf16.msra.mxu0 %v8928_v26  ;;  %7828 = vmatpush1.bf16.msra.mxu1 %v8930_v52  ;;  %v8979_v26 = vcombine.high %v1035_v14, %v1039_v17  ;;  %v1042_v52 = vld [vmem:[#allocation8 + $0x1090] sm:$0xff] }
 0x370   :  { %7501 = vmatprep.subr.bf16.mxu0 %v8937_v27  ;;  %7829 = vmatprep.subr.bf16.mxu1 %v8939_v28  ;;  %v1046_v27 = vld [vmem:[#allocation8 + $0x10b0] sm:$0xff]  ;;  %v1043_v28 = vld [vmem:[#allocation8 + $0x1098] sm:$0xff] }
 0x371   :  { %v8985_v30 = vcombine.high %v1042_v52, %v1046_v27  ;;  %v8984_v37 = vcombine.low %v1042_v52, %v1046_v27  ;;  %v1082_v17 = vld [vmem:[#allocation8 + $0x11d0] sm:$0xff] }
 0x373   :  { %7502 = vmatpush1.bf16.msra.mxu0 %v8936_v33  ;;  %7830 = vmatpush1.bf16.msra.mxu1 %v8938_v34  ;;  %v8987_v33 = vcombine.high %v1043_v28, %v1047_v18  ;;  %v1050_v34 = vld [vmem:[#allocation8 + $0x10d0] sm:$0xff] }
 0x374   :  { %7503 = vmatprep.subr.bf16.mxu0 %v8945_v36  ;;  %7831 = vmatprep.subr.bf16.mxu1 %v8947_v40  ;;  %v1054_v36 = vld [vmem:[#allocation8 + $0x10f0] sm:$0xff]  ;;  %v1051_v40 = vld [vmem:[#allocation8 + $0x10d8] sm:$0xff] }
 0x375   :  { %v8993_v38 = vcombine.high %v1050_v34, %v1054_v36  ;;  %v8995_v39 = vcombine.high %v1051_v40, %v1055_v35  ;;  %v8992_v59 = vcombine.low %v1050_v34, %v1054_v36  ;;  %v8994_v56 = vcombine.low %v1051_v40, %v1055_v35  ;;  %v1098_v35 = vld [vmem:[#allocation8 + $0x1250] sm:$0xff] }
 0x377   :  { %7504 = vmatpush1.bf16.msra.mxu0 %v8944_v44  ;;  %7832 = vmatpush1.bf16.msra.mxu1 %v8946_v45  ;;  %v1058_v44 = vld [vmem:[#allocation8 + $0x1110] sm:$0xff] }
 0x378   :  { %7505 = vmatprep.subr.bf16.mxu0 %v8953_v47  ;;  %7833 = vmatprep.subr.bf16.mxu1 %v8955_v4  ;;  %v1062_v45 = vld [vmem:[#allocation8 + $0x1130] sm:$0xff]  ;;  %v1059_v47 = vld [vmem:[#allocation8 + $0x1118] sm:$0xff] }
 0x379   :  { %v1063_v4 = vld [vmem:[#allocation8 + $0x1138] sm:$0xff]  ;;  %v9001_v11 = vcombine.high %v1058_v44, %v1062_v45 }
 0x37a   :  { %v9002_v9 = vcombine.low %v1059_v47, %v1063_v4 }
 0x37b   :  { %7506 = vmatpush1.bf16.msra.mxu0 %v8952_v0  ;;  %7834 = vmatpush1.bf16.msra.mxu1 %v8954_v23  ;;  %v1070_v0 = vld [vmem:[#allocation8 + $0x1170] sm:$0xff]  ;;  %v1067_v23 = vld [vmem:[#allocation8 + $0x1158] sm:$0xff] }
 0x37c   :  { %7507 = vmatprep.subr.bf16.mxu0 %v8961_v48  ;;  %7835 = vmatprep.subr.bf16.mxu1 %v8963_v3  ;;  %v1071_v48 = vld [vmem:[#allocation8 + $0x1178] sm:$0xff]  ;;  %v9000_v3 = vcombine.low %v1058_v44, %v1062_v45  ;;  %v9009_v5 = vcombine.high %v1066_v55, %v1070_v0 }
 0x37d   :  { %v9011_v15 = vcombine.high %v1067_v23, %v1071_v48  ;;  %v9010_v43 = vcombine.low %v1067_v23, %v1071_v48  ;;  %v1114_v48 = vld [vmem:[#allocation8 + $0x12d0] sm:$0xff] }
 0x37f   :  { %7508 = vmatpush1.bf16.msra.mxu0 %v8960_v8  ;;  %7836 = vmatpush1.bf16.msra.mxu1 %v8962_v19  ;;  %v1078_v8 = vld [vmem:[#allocation8 + $0x11b0] sm:$0xff]  ;;  %v1075_v19 = vld [vmem:[#allocation8 + $0x1198] sm:$0xff] }
 0x380   :  { %7518 = vmatprep.subr.bf16.mxu0 %v8969_v63  ;;  %7846 = vmatprep.subr.bf16.mxu1 %v8971_v12  ;;  %v1079_v63 = vld [vmem:[#allocation8 + $0x11b8] sm:$0xff]  ;;  %v9008_v12 = vcombine.low %v1066_v55, %v1070_v0  ;;  %v9017_v13 = vcombine.high %v1074_v6, %v1078_v8 }
 0x381   :  { %v9019_v14 = vcombine.high %v1075_v19, %v1079_v63  ;;  %v9018_v52 = vcombine.low %v1075_v19, %v1079_v63  ;;  %v1122_v63 = vld [vmem:[#allocation8 + $0x1310] sm:$0xff] }
 0x382   :  { %7510 = vmatmul.mubr.bf16.vlgmr.msra.gmra.mrb[4].mxu0 %v10382_v10  ;;  %7838 = vmatmul.mubr.bf16.vlgmr.msra.gmra.mrb[4].mxu1 %v10382_v10  ;;  %v8986_v10 = vcombine.low %v1043_v28, %v1047_v18  ;;  %v1090_v18 = vld [vmem:[#allocation8 + $0x1210] sm:$0xff] }
 0x383   :  { %7519 = vmatpush1.bf16.msra.mxu0 %v8968_v32  ;;  %7847 = vmatpush1.bf16.msra.mxu1 %v8970_v31  ;;  %v1086_v32 = vld [vmem:[#allocation8 + $0x11f0] sm:$0xff]  ;;  %v1083_v31 = vld [vmem:[#allocation8 + $0x11d8] sm:$0xff] }
 0x384   :  { %7520 = vmatprep.subr.bf16.mxu0 %v8977_v25  ;;  %7848 = vmatprep.subr.bf16.mxu1 %v8979_v26  ;;  %v1087_v25 = vld [vmem:[#allocation8 + $0x11f8] sm:$0xff]  ;;  %v9016_v26 = vcombine.low %v1074_v6, %v1078_v8  ;;  %v9025_v27 = vcombine.high %v1082_v17, %v1086_v32 }
 0x385   :  { %7550 = vmatprep.mubr.bf16.mxu0 %v10384_v60  ;;  %7878 = vmatprep.mubr.bf16.mxu1 %v10384_v60  ;;  %v9003_v60 = vcombine.high %v1059_v47, %v1063_v4  ;;  %v9027_v28 = vcombine.high %v1083_v31, %v1087_v25  ;;  %v9026_v34 = vcombine.low %v1083_v31, %v1087_v25  ;;  %v1106_v4 = vld [vmem:[#allocation8 + $0x1290] sm:$0xff] }
 0x386   :  { %v1130_v25 = vld [vmem:[#allocation8 + $0x1350] sm:$0xff] }
 0x387   :  { %7521 = vmatpush1.bf16.msra.mxu0 %v8976_v51  ;;  %7849 = vmatpush1.bf16.msra.mxu1 %v8978_v29  ;;  %v1094_v51 = vld [vmem:[#allocation8 + $0x1230] sm:$0xff]  ;;  %v1091_v29 = vld [vmem:[#allocation8 + $0x1218] sm:$0xff] }
 0x388   :  { %7522 = vmatprep.subr.bf16.mxu0 %v8985_v30  ;;  %7850 = vmatprep.subr.bf16.mxu1 %v8987_v33  ;;  %v1095_v30 = vld [vmem:[#allocation8 + $0x1238] sm:$0xff]  ;;  %v9024_v33 = vcombine.low %v1082_v17, %v1086_v32  ;;  %v9033_v36 = vcombine.high %v1090_v18, %v1094_v51 }
 0x389   :  { %v9035_v40 = vcombine.high %v1091_v29, %v1095_v30  ;;  %v9034_v44 = vcombine.low %v1091_v29, %v1095_v30  ;;  %v1138_v30 = vld [vmem:[#allocation8 + $0x1390] sm:$0xff] }
 0x38b   :  { %7523 = vmatpush1.bf16.msra.mxu0 %v8984_v37  ;;  %7851 = vmatpush1.bf16.msra.mxu1 %v8986_v10  ;;  %v1102_v37 = vld [vmem:[#allocation8 + $0x1270] sm:$0xff]  ;;  %v1099_v10 = vld [vmem:[#allocation8 + $0x1258] sm:$0xff] }
 0x38c   :  { %7524 = vmatprep.subr.bf16.mxu0 %v8993_v38  ;;  %7852 = vmatprep.subr.bf16.mxu1 %v8995_v39  ;;  %v1103_v38 = vld [vmem:[#allocation8 + $0x1278] sm:$0xff]  ;;  %v9032_v39 = vcombine.low %v1090_v18, %v1094_v51  ;;  %v9041_v45 = vcombine.high %v1098_v35, %v1102_v37 }
 0x38d   :  { %v9043_v47 = vcombine.high %v1099_v10, %v1103_v38  ;;  %v9042_v55 = vcombine.low %v1099_v10, %v1103_v38  ;;  %v1146_v38 = vld [vmem:[#allocation8 + $0x13d0] sm:$0xff] }
 0x38f   :  { %7525 = vmatpush1.bf16.msra.mxu0 %v8992_v59  ;;  %7853 = vmatpush1.bf16.msra.mxu1 %v8994_v56  ;;  %v1110_v59 = vld [vmem:[#allocation8 + $0x12b0] sm:$0xff]  ;;  %v1107_v56 = vld [vmem:[#allocation8 + $0x1298] sm:$0xff] }
 0x390   :  { %7526 = vmatprep.subr.bf16.mxu0 %v9001_v11  ;;  %7854 = vmatprep.subr.bf16.mxu1 %v9003_v60  ;;  %v1111_v11 = vld [vmem:[#allocation8 + $0x12b8] sm:$0xff]  ;;  %v9040_v60 = vcombine.low %v1098_v35, %v1102_v37  ;;  %v9049_v0 = vcombine.high %v1106_v4, %v1110_v59 }
 0x391   :  { %v9051_v23 = vcombine.high %v1107_v56, %v1111_v11  ;;  %v9050_v6 = vcombine.low %v1107_v56, %v1111_v11  ;;  %v1154_v11 = vld [vmem:[#allocation8 + $0x1410] sm:$0xff] }
 0x393   :  { %7527 = vmatpush1.bf16.msra.mxu0 %v9000_v3  ;;  %7855 = vmatpush1.bf16.msra.mxu1 %v9002_v9  ;;  %v1118_v3 = vld [vmem:[#allocation8 + $0x12f0] sm:$0xff]  ;;  %v1115_v9 = vld [vmem:[#allocation8 + $0x12d8] sm:$0xff] }
 0x394   :  { %7528 = vmatprep.subr.bf16.mxu0 %v9009_v5  ;;  %7856 = vmatprep.subr.bf16.mxu1 %v9011_v15  ;;  %v1119_v5 = vld [vmem:[#allocation8 + $0x12f8] sm:$0xff]  ;;  %v9048_v15 = vcombine.low %v1106_v4, %v1110_v59  ;;  %v9057_v8 = vcombine.high %v1114_v48, %v1118_v3 }
 0x395   :  { %v9059_v19 = vcombine.high %v1115_v9, %v1119_v5  ;;  %v9058_v17 = vcombine.low %v1115_v9, %v1119_v5  ;;  %v1162_v5 = vld [vmem:[#allocation8 + $0x1450] sm:$0xff] }
 0x397   :  { %7529 = vmatpush1.bf16.msra.mxu0 %v9008_v12  ;;  %7857 = vmatpush1.bf16.msra.mxu1 %v9010_v43  ;;  %v1126_v12 = vld [vmem:[#allocation8 + $0x1330] sm:$0xff]  ;;  %v1123_v43 = vld [vmem:[#allocation8 + $0x1318] sm:$0xff] }
 0x398   :  { %7530 = vmatprep.subr.bf16.mxu0 %v9017_v13  ;;  %7858 = vmatprep.subr.bf16.mxu1 %v9019_v14  ;;  %v1127_v13 = vld [vmem:[#allocation8 + $0x1338] sm:$0xff]  ;;  %v9056_v14 = vcombine.low %v1114_v48, %v1118_v3  ;;  %v9065_v32 = vcombine.high %v1122_v63, %v1126_v12 }
 0x399   :  { %v9067_v31 = vcombine.high %v1123_v43, %v1127_v13  ;;  %v9066_v18 = vcombine.low %v1123_v43, %v1127_v13  ;;  %v1170_v13 = vld [vmem:[#allocation8 + $0x1490] sm:$0xff] }
 0x39b   :  { %7531 = vmatpush1.bf16.msra.mxu0 %v9016_v26  ;;  %7859 = vmatpush1.bf16.msra.mxu1 %v9018_v52  ;;  %v1134_v26 = vld [vmem:[#allocation8 + $0x1370] sm:$0xff]  ;;  %v1131_v52 = vld [vmem:[#allocation8 + $0x1358] sm:$0xff] }
 0x39c   :  { %7532 = vmatprep.subr.bf16.mxu0 %v9025_v27  ;;  %7860 = vmatprep.subr.bf16.mxu1 %v9027_v28  ;;  %v1135_v27 = vld [vmem:[#allocation8 + $0x1378] sm:$0xff]  ;;  %v9064_v28 = vcombine.low %v1122_v63, %v1126_v12  ;;  %v9073_v51 = vcombine.high %v1130_v25, %v1134_v26 }
 0x39d   :  { %v9075_v29 = vcombine.high %v1131_v52, %v1135_v27  ;;  %v9074_v35 = vcombine.low %v1131_v52, %v1135_v27  ;;  %v1178_v27 = vld [vmem:[#allocation8 + $0x14d0] sm:$0xff] }
 0x39f   :  { %7533 = vmatpush1.bf16.msra.mxu0 %v9024_v33  ;;  %7861 = vmatpush1.bf16.msra.mxu1 %v9026_v34  ;;  %v1142_v33 = vld [vmem:[#allocation8 + $0x13b0] sm:$0xff]  ;;  %v1139_v34 = vld [vmem:[#allocation8 + $0x1398] sm:$0xff] }
 0x3a0   :  { %7534 = vmatprep.subr.bf16.mxu0 %v9033_v36  ;;  %7862 = vmatprep.subr.bf16.mxu1 %v9035_v40  ;;  %v1143_v36 = vld [vmem:[#allocation8 + $0x13b8] sm:$0xff]  ;;  %v9072_v40 = vcombine.low %v1130_v25, %v1134_v26  ;;  %v9081_v37 = vcombine.high %v1138_v30, %v1142_v33 }
 0x3a1   :  { %v9083_v10 = vcombine.high %v1139_v34, %v1143_v36  ;;  %v9082_v4 = vcombine.low %v1139_v34, %v1143_v36  ;;  %v1186_v34 = vld [vmem:[#allocation8 + $0x1510] sm:$0xff] }
 0x3a2   :  { %v1190_v36 = vld [vmem:[#allocation8 + $0x1530] sm:$0xff] }
 0x3a3   :  { %7535 = vmatpush1.bf16.msra.mxu0 %v9032_v39  ;;  %7863 = vmatpush1.bf16.msra.mxu1 %v9034_v44  ;;  %v1150_v39 = vld [vmem:[#allocation8 + $0x13f0] sm:$0xff]  ;;  %v1147_v44 = vld [vmem:[#allocation8 + $0x13d8] sm:$0xff] }
 0x3a4   :  { %7536 = vmatprep.subr.bf16.mxu0 %v9041_v45  ;;  %7864 = vmatprep.subr.bf16.mxu1 %v9043_v47  ;;  %v1151_v45 = vld [vmem:[#allocation8 + $0x13f8] sm:$0xff]  ;;  %v9080_v47 = vcombine.low %v1138_v30, %v1142_v33  ;;  %v9089_v59 = vcombine.high %v1146_v38, %v1150_v39 }
 0x3a5   :  { %v9091_v56 = vcombine.high %v1147_v44, %v1151_v45  ;;  %v9090_v48 = vcombine.low %v1147_v44, %v1151_v45  ;;  %v1198_v44 = vld [vmem:[#allocation8 + $0x1570] sm:$0xff]  ;;  %v1195_v45 = vld [vmem:[#allocation8 + $0x1558] sm:$0xff] }
 0x3a7   :  { %7537 = vmatpush1.bf16.msra.mxu0 %v9040_v60  ;;  %7865 = vmatpush1.bf16.msra.mxu1 %v9042_v55  ;;  %v1158_v60 = vld [vmem:[#allocation8 + $0x1430] sm:$0xff]  ;;  %v1155_v55 = vld [vmem:[#allocation8 + $0x1418] sm:$0xff] }
 0x3a8   :  { %7538 = vmatprep.subr.bf16.mxu0 %v9049_v0  ;;  %7866 = vmatprep.subr.bf16.mxu1 %v9051_v23  ;;  %v1159_v0 = vld [vmem:[#allocation8 + $0x1438] sm:$0xff]  ;;  %v9088_v23 = vcombine.low %v1146_v38, %v1150_v39  ;;  %v9097_v3 = vcombine.high %v1154_v11, %v1158_v60  ;;  %v9129_v38 = vcombine.high %v1186_v34, %v1190_v36  ;;  %v1194_v39 = vld [vmem:[#allocation8 + $0x1550] sm:$0xff] }
 0x3a9   :  { %v9099_v9 = vcombine.high %v1155_v55, %v1159_v0  ;;  %v9098_v63 = vcombine.low %v1155_v55, %v1159_v0  ;;  %v1206_v55 = vld [vmem:[#allocation8 + $0x15b0] sm:$0xff]  ;;  %v1203_v0 = vld [vmem:[#allocation8 + $0x1598] sm:$0xff] }
 0x3ab   :  { %7539 = vmatpush1.bf16.msra.mxu0 %v9048_v15  ;;  %7867 = vmatpush1.bf16.msra.mxu1 %v9050_v6  ;;  %v1166_v15 = vld [vmem:[#allocation8 + $0x1470] sm:$0xff]  ;;  %v1163_v6 = vld [vmem:[#allocation8 + $0x1458] sm:$0xff] }
 0x3ac   :  { %7540 = vmatprep.subr.bf16.mxu0 %v9057_v8  ;;  %7868 = vmatprep.subr.bf16.mxu1 %v9059_v19  ;;  %v1167_v8 = vld [vmem:[#allocation8 + $0x1478] sm:$0xff]  ;;  %v9096_v19 = vcombine.low %v1154_v11, %v1158_v60  ;;  %v9105_v12 = vcombine.high %v1162_v5, %v1166_v15  ;;  %v1202_v60 = vld [vmem:[#allocation8 + $0x1590] sm:$0xff] }
 0x3ad   :  { %v9107_v43 = vcombine.high %v1163_v6, %v1167_v8  ;;  %v9106_v25 = vcombine.low %v1163_v6, %v1167_v8  ;;  %v1214_v6 = vld [vmem:[#allocation8 + $0x15f0] sm:$0xff]  ;;  %v1211_v8 = vld [vmem:[#allocation8 + $0x15d8] sm:$0xff] }
 0x3af   :  { %7541 = vmatpush1.bf16.msra.mxu0 %v9056_v14  ;;  %7869 = vmatpush1.bf16.msra.mxu1 %v9058_v17  ;;  %v1174_v14 = vld [vmem:[#allocation8 + $0x14b0] sm:$0xff]  ;;  %v1171_v17 = vld [vmem:[#allocation8 + $0x1498] sm:$0xff] }
 0x3b0   :  { %7542 = vmatprep.subr.bf16.mxu0 %v9065_v32  ;;  %7870 = vmatprep.subr.bf16.mxu1 %v9067_v31  ;;  %v1175_v32 = vld [vmem:[#allocation8 + $0x14b8] sm:$0xff]  ;;  %v9104_v31 = vcombine.low %v1162_v5, %v1166_v15  ;;  %v9113_v26 = vcombine.high %v1170_v13, %v1174_v14  ;;  %v1210_v15 = vld [vmem:[#allocation8 + $0x15d0] sm:$0xff] }
 0x3b1   :  { %v9115_v52 = vcombine.high %v1171_v17, %v1175_v32 }
 0x3b3   :  { %7543 = vmatpush1.bf16.msra.mxu0 %v9064_v28  ;;  %7871 = vmatpush1.bf16.msra.mxu1 %v9066_v18  ;;  %v1182_v28 = vld [vmem:[#allocation8 + $0x14f0] sm:$0xff]  ;;  %v1179_v18 = vld [vmem:[#allocation8 + $0x14d8] sm:$0xff] }
 0x3b4   :  { %7544 = vmatprep.subr.bf16.mxu0 %v9073_v51  ;;  %7872 = vmatprep.subr.bf16.mxu1 %v9075_v29  ;;  %v1183_v51 = vld [vmem:[#allocation8 + $0x14f8] sm:$0xff]  ;;  %v9112_v29 = vcombine.low %v1170_v13, %v1174_v14  ;;  %v9121_v30 = vcombine.high %v1178_v27, %v1182_v28  ;;  %v1218_v14 = vld [vmem:[#allocation8 + $0x1610] sm:$0xff] }
 0x3b5   :  { %v9123_v33 = vcombine.high %v1179_v18, %v1183_v51 }
 0x3b7   :  { %7545 = vmatpush1.bf16.msra.mxu0 %v9072_v40  ;;  %7873 = vmatpush1.bf16.msra.mxu1 %v9074_v35  ;;  %v1187_v40 = vld [vmem:[#allocation8 + $0x1518] sm:$0xff] }
 0x3b8   :  { %7546 = vmatprep.subr.bf16.mxu0 %v9081_v37  ;;  %7874 = vmatprep.subr.bf16.mxu1 %v9083_v10  ;;  %v1191_v35 = vld [vmem:[#allocation8 + $0x1538] sm:$0xff]  ;;  %v9120_v37 = vcombine.low %v1178_v27, %v1182_v28  ;;  %v9122_v10 = vcombine.low %v1179_v18, %v1183_v51  ;;  %v1226_v28 = vld [vmem:[#allocation8 + $0x1650] sm:$0xff] }
 0x3b9   :  { %v1230_v18 = vld [vmem:[#allocation8 + $0x1670] sm:$0xff]  ;;  %v1227_v51 = vld [vmem:[#allocation8 + $0x1658] sm:$0xff] }
 0x3bb   :  { %7547 = vmatpush1.bf16.msra.mxu0 %v9080_v47  ;;  %7875 = vmatpush1.bf16.msra.mxu1 %v9082_v4  ;;  %v1199_v47 = vld [vmem:[#allocation8 + $0x1578] sm:$0xff]  ;;  %v9128_v4 = vcombine.low %v1186_v34, %v1190_v36  ;;  %v1234_v36 = vld [vmem:[#allocation8 + $0x1690] sm:$0xff] }
 0x3bc   :  { %7548 = vmatprep.subr.bf16.mxu0 %v9089_v59  ;;  %7876 = vmatprep.subr.bf16.mxu1 %v9091_v56  ;;  %v9130_v59 = vcombine.low %v1187_v40, %v1191_v35  ;;  %v9137_v56 = vcombine.high %v1194_v39, %v1198_v44  ;;  %v9139_v11 = vcombine.high %v1195_v45, %v1199_v47 }
 0x3bf   :  { %7549 = vmatpush1.bf16.msra.mxu0 %v9088_v23  ;;  %7877 = vmatpush1.bf16.msra.mxu1 %v9090_v48  ;;  %v1207_v23 = vld [vmem:[#allocation8 + $0x15b8] sm:$0xff]  ;;  %v9136_v48 = vcombine.low %v1194_v39, %v1198_v44  ;;  %v1242_v44 = vld [vmem:[#allocation8 + $0x16d0] sm:$0xff] }
 0x3c0   :  { %7559 = vmatprep.subr.bf16.mxu0 %v9097_v3  ;;  %7887 = vmatprep.subr.bf16.mxu1 %v9099_v9  ;;  %v9138_v3 = vcombine.low %v1195_v45, %v1199_v47  ;;  %v9145_v9 = vcombine.high %v1202_v60, %v1206_v55  ;;  %v9147_v5 = vcombine.high %v1203_v0, %v1207_v23  ;;  %v1246_v45 = vld [vmem:[#allocation8 + $0x16f0] sm:$0xff]  ;;  %v1243_v47 = vld [vmem:[#allocation8 + $0x16d8] sm:$0xff] }
 0x3c2   :  { %7551 = vmatmul.mubr.bf16.vlgmr.msra.gmra.mrb[4].mxu0 %v10399_v16  ;;  %7879 = vmatmul.mubr.bf16.vlgmr.msra.gmra.mrb[4].mxu1 %v10399_v16  ;;  %v9114_v16 = vcombine.low %v1171_v17, %v1175_v32  ;;  %v1222_v17 = vld [vmem:[#allocation8 + $0x1630] sm:$0xff]  ;;  %v1219_v32 = vld [vmem:[#allocation8 + $0x1618] sm:$0xff] }
 0x3c3   :  { %7560 = vmatpush1.bf16.msra.mxu0 %v9096_v19  ;;  %7888 = vmatpush1.bf16.msra.mxu1 %v9098_v63  ;;  %v1215_v19 = vld [vmem:[#allocation8 + $0x15f8] sm:$0xff]  ;;  %v9144_v63 = vcombine.low %v1202_v60, %v1206_v55  ;;  %v1250_v55 = vld [vmem:[#allocation8 + $0x1710] sm:$0xff] }
 0x3c4   :  { %7561 = vmatprep.subr.bf16.mxu0 %v9105_v12  ;;  %7889 = vmatprep.subr.bf16.mxu1 %v9107_v43  ;;  %v9146_v12 = vcombine.low %v1203_v0, %v1207_v23  ;;  %v9153_v43 = vcombine.high %v1210_v15, %v1214_v6  ;;  %v9155_v13 = vcombine.high %v1211_v8, %v1215_v19  ;;  %v1254_v0 = vld [vmem:[#allocation8 + $0x1730] sm:$0xff]  ;;  %v1251_v23 = vld [vmem:[#allocation8 + $0x1718] sm:$0xff] }
 0x3c5   :  { %7591 = vmatprep.mubr.bf16.mxu0 %v10401_v24  ;;  %7919 = vmatprep.mubr.bf16.mxu1 %v10401_v24  ;;  %v9131_v24 = vcombine.high %v1187_v40, %v1191_v35  ;;  %v1238_v40 = vld [vmem:[#allocation8 + $0x16b0] sm:$0xff]  ;;  %v1235_v35 = vld [vmem:[#allocation8 + $0x1698] sm:$0xff] }
 0x3c7   :  { %7562 = vmatpush1.bf16.msra.mxu0 %v9104_v31  ;;  %7890 = vmatpush1.bf16.msra.mxu1 %v9106_v25  ;;  %v1223_v31 = vld [vmem:[#allocation8 + $0x1638] sm:$0xff]  ;;  %v9152_v25 = vcombine.low %v1210_v15, %v1214_v6  ;;  %v1258_v6 = vld [vmem:[#allocation8 + $0x1750] sm:$0xff] }
 0x3c8   :  { %7563 = vmatprep.subr.bf16.mxu0 %v9113_v26  ;;  %7891 = vmatprep.subr.bf16.mxu1 %v9115_v52  ;;  %v9154_v26 = vcombine.low %v1211_v8, %v1215_v19  ;;  %v9161_v52 = vcombine.high %v1218_v14, %v1222_v17  ;;  %v9163_v27 = vcombine.high %v1219_v32, %v1223_v31  ;;  %v1262_v8 = vld [vmem:[#allocation8 + $0x1770] sm:$0xff]  ;;  %v1259_v19 = vld [vmem:[#allocation8 + $0x1758] sm:$0xff] }
 0x3cb   :  { %7564 = vmatpush1.bf16.msra.mxu0 %v9112_v29  ;;  %7892 = vmatpush1.bf16.msra.mxu1 %v9114_v16  ;;  %v1231_v29 = vld [vmem:[#allocation8 + $0x1678] sm:$0xff]  ;;  %v9160_v16 = vcombine.low %v1218_v14, %v1222_v17  ;;  %v1266_v17 = vld [vmem:[#allocation8 + $0x1790] sm:$0xff] }
 0x3cc   :  { %7565 = vmatprep.subr.bf16.mxu0 %v9121_v30  ;;  %7893 = vmatprep.subr.bf16.mxu1 %v9123_v33  ;;  %v9162_v30 = vcombine.low %v1219_v32, %v1223_v31  ;;  %v9169_v33 = vcombine.high %v1226_v28, %v1230_v18  ;;  %v9171_v34 = vcombine.high %v1227_v51, %v1231_v29  ;;  %v1270_v32 = vld [vmem:[#allocation8 + $0x17b0] sm:$0xff]  ;;  %v1267_v31 = vld [vmem:[#allocation8 + $0x1798] sm:$0xff] }
 0x3cf   :  { %7566 = vmatpush1.bf16.msra.mxu0 %v9120_v37  ;;  %7894 = vmatpush1.bf16.msra.mxu1 %v9122_v10  ;;  %v1239_v37 = vld [vmem:[#allocation8 + $0x16b8] sm:$0xff]  ;;  %v9168_v10 = vcombine.low %v1226_v28, %v1230_v18  ;;  %v1274_v18 = vld [vmem:[#allocation8 + $0x17d0] sm:$0xff] }
 0x3d0   :  { %7567 = vmatprep.subr.bf16.mxu0 %v9129_v38  ;;  %7895 = vmatprep.subr.bf16.mxu1 %v9131_v24  ;;  %v9170_v38 = vcombine.low %v1227_v51, %v1231_v29  ;;  %v9177_v24 = vcombine.high %v1234_v36, %v1238_v40  ;;  %v9179_v39 = vcombine.high %v1235_v35, %v1239_v37  ;;  %v1278_v51 = vld [vmem:[#allocation8 + $0x17f0] sm:$0xff]  ;;  %v1275_v29 = vld [vmem:[#allocation8 + $0x17d8] sm:$0xff] }
 0x3d3   :  { %7568 = vmatpush1.bf16.msra.mxu0 %v9128_v4  ;;  %7896 = vmatpush1.bf16.msra.mxu1 %v9130_v59  ;;  %v1247_v4 = vld [vmem:[#allocation8 + $0x16f8] sm:$0xff]  ;;  %v9176_v59 = vcombine.low %v1234_v36, %v1238_v40  ;;  %v1282_v40 = vld [vmem:[#allocation8 + $0x1810] sm:$0xff] }
 0x3d4   :  { %7569 = vmatprep.subr.bf16.mxu0 %v9137_v56  ;;  %7897 = vmatprep.subr.bf16.mxu1 %v9139_v11  ;;  %v9178_v56 = vcombine.low %v1235_v35, %v1239_v37  ;;  %v9185_v11 = vcombine.high %v1242_v44, %v1246_v45  ;;  %v9187_v60 = vcombine.high %v1243_v47, %v1247_v4  ;;  %v1286_v35 = vld [vmem:[#allocation8 + $0x1830] sm:$0xff]  ;;  %v1283_v37 = vld [vmem:[#allocation8 + $0x1818] sm:$0xff] }
 0x3d7   :  { %7570 = vmatpush1.bf16.msra.mxu0 %v9136_v48  ;;  %7898 = vmatpush1.bf16.msra.mxu1 %v9138_v3  ;;  %v1255_v48 = vld [vmem:[#allocation8 + $0x1738] sm:$0xff]  ;;  %v9184_v3 = vcombine.low %v1242_v44, %v1246_v45  ;;  %v1290_v45 = vld [vmem:[#allocation8 + $0x1850] sm:$0xff] }
 0x3d8   :  { %7571 = vmatprep.subr.bf16.mxu0 %v9145_v9  ;;  %7899 = vmatprep.subr.bf16.mxu1 %v9147_v5  ;;  %v9186_v9 = vcombine.low %v1243_v47, %v1247_v4  ;;  %v9193_v5 = vcombine.high %v1250_v55, %v1254_v0  ;;  %v9195_v15 = vcombine.high %v1251_v23, %v1255_v48  ;;  %v1294_v47 = vld [vmem:[#allocation8 + $0x1870] sm:$0xff]  ;;  %v1291_v4 = vld [vmem:[#allocation8 + $0x1858] sm:$0xff] }
 0x3db   :  { %7572 = vmatpush1.bf16.msra.mxu0 %v9144_v63  ;;  %7900 = vmatpush1.bf16.msra.mxu1 %v9146_v12  ;;  %v1263_v63 = vld [vmem:[#allocation8 + $0x1778] sm:$0xff]  ;;  %v9192_v12 = vcombine.low %v1250_v55, %v1254_v0  ;;  %v1298_v0 = vld [vmem:[#allocation8 + $0x1890] sm:$0xff] }
 0x3dc   :  { %7573 = vmatprep.subr.bf16.mxu0 %v9153_v43  ;;  %7901 = vmatprep.subr.bf16.mxu1 %v9155_v13  ;;  %v9194_v43 = vcombine.low %v1251_v23, %v1255_v48  ;;  %v9201_v13 = vcombine.high %v1258_v6, %v1262_v8  ;;  %v9203_v14 = vcombine.high %v1259_v19, %v1263_v63  ;;  %v1302_v23 = vld [vmem:[#allocation8 + $0x18b0] sm:$0xff]  ;;  %v1299_v48 = vld [vmem:[#allocation8 + $0x1898] sm:$0xff] }
 0x3df   :  { %7574 = vmatpush1.bf16.msra.mxu0 %v9152_v25  ;;  %7902 = vmatpush1.bf16.msra.mxu1 %v9154_v26  ;;  %v1271_v25 = vld [vmem:[#allocation8 + $0x17b8] sm:$0xff]  ;;  %v9200_v26 = vcombine.low %v1258_v6, %v1262_v8  ;;  %v1306_v8 = vld [vmem:[#allocation8 + $0x18d0] sm:$0xff] }
 0x3e0   :  { %7575 = vmatprep.subr.bf16.mxu0 %v9161_v52  ;;  %7903 = vmatprep.subr.bf16.mxu1 %v9163_v27  ;;  %v9202_v52 = vcombine.low %v1259_v19, %v1263_v63  ;;  %v9209_v27 = vcombine.high %v1266_v17, %v1270_v32  ;;  %v9211_v28 = vcombine.high %v1267_v31, %v1271_v25  ;;  %v1310_v19 = vld [vmem:[#allocation8 + $0x18f0] sm:$0xff]  ;;  %v1307_v63 = vld [vmem:[#allocation8 + $0x18d8] sm:$0xff] }
 0x3e3   :  { %7576 = vmatpush1.bf16.msra.mxu0 %v9160_v16  ;;  %7904 = vmatpush1.bf16.msra.mxu1 %v9162_v30  ;;  %v1279_v16 = vld [vmem:[#allocation8 + $0x17f8] sm:$0xff]  ;;  %v9208_v30 = vcombine.low %v1266_v17, %v1270_v32  ;;  %v1314_v17 = vld [vmem:[#allocation8 + $0x1910] sm:$0xff] }
 0x3e4   :  { %7577 = vmatprep.subr.bf16.mxu0 %v9169_v33  ;;  %7905 = vmatprep.subr.bf16.mxu1 %v9171_v34  ;;  %v9210_v33 = vcombine.low %v1267_v31, %v1271_v25  ;;  %v9217_v34 = vcombine.high %v1274_v18, %v1278_v51  ;;  %v9219_v36 = vcombine.high %v1275_v29, %v1279_v16  ;;  %v1318_v32 = vld [vmem:[#allocation8 + $0x1930] sm:$0xff]  ;;  %v1315_v31 = vld [vmem:[#allocation8 + $0x1918] sm:$0xff] }
 0x3e5   :  { %v1319_v25 = vld [vmem:[#allocation8 + $0x1938] sm:$0xff] }
 0x3e7   :  { %7578 = vmatpush1.bf16.msra.mxu0 %v9168_v10  ;;  %7906 = vmatpush1.bf16.msra.mxu1 %v9170_v38  ;;  %v1287_v10 = vld [vmem:[#allocation8 + $0x1838] sm:$0xff]  ;;  %v9216_v38 = vcombine.low %v1274_v18, %v1278_v51  ;;  %v1326_v18 = vld [vmem:[#allocation8 + $0x1970] sm:$0xff] }
 0x3e8   :  { %7579 = vmatprep.subr.bf16.mxu0 %v9177_v24  ;;  %7907 = vmatprep.subr.bf16.mxu1 %v9179_v39  ;;  %v9218_v24 = vcombine.low %v1275_v29, %v1279_v16  ;;  %v9225_v39 = vcombine.high %v1282_v40, %v1286_v35  ;;  %v9227_v44 = vcombine.high %v1283_v37, %v1287_v10  ;;  %v1323_v51 = vld [vmem:[#allocation8 + $0x1958] sm:$0xff] }
 0x3e9   :  { %v1327_v29 = vld [vmem:[#allocation8 + $0x1978] sm:$0xff]  ;;  %v9256_v16 = vcombine.low %v1314_v17, %v1318_v32 }
 0x3eb   :  { %7580 = vmatpush1.bf16.msra.mxu0 %v9176_v59  ;;  %7908 = vmatpush1.bf16.msra.mxu1 %v9178_v56  ;;  %v1295_v59 = vld [vmem:[#allocation8 + $0x1878] sm:$0xff]  ;;  %v9224_v56 = vcombine.low %v1282_v40, %v1286_v35  ;;  %v1334_v40 = vld [vmem:[#allocation8 + $0x19b0] sm:$0xff] }
 0x3ec   :  { %7581 = vmatprep.subr.bf16.mxu0 %v9185_v11  ;;  %7909 = vmatprep.subr.bf16.mxu1 %v9187_v60  ;;  %v9226_v11 = vcombine.low %v1283_v37, %v1287_v10  ;;  %v9233_v60 = vcombine.high %v1290_v45, %v1294_v47  ;;  %v9235_v55 = vcombine.high %v1291_v4, %v1295_v59  ;;  %v1331_v35 = vld [vmem:[#allocation8 + $0x1998] sm:$0xff] }
 0x3ed   :  { %v1335_v37 = vld [vmem:[#allocation8 + $0x19b8] sm:$0xff] }
 0x3ef   :  { %7582 = vmatpush1.bf16.msra.mxu0 %v9184_v3  ;;  %7910 = vmatpush1.bf16.msra.mxu1 %v9186_v9  ;;  %v1303_v3 = vld [vmem:[#allocation8 + $0x18b8] sm:$0xff]  ;;  %v9232_v9 = vcombine.low %v1290_v45, %v1294_v47  ;;  %v1342_v45 = vld [vmem:[#allocation8 + $0x19f0] sm:$0xff] }
 0x3f0   :  { %7583 = vmatprep.subr.bf16.mxu0 %v9193_v5  ;;  %7911 = vmatprep.subr.bf16.mxu1 %v9195_v15  ;;  %v9234_v5 = vcombine.low %v1291_v4, %v1295_v59  ;;  %v9241_v15 = vcombine.high %v1298_v0, %v1302_v23  ;;  %v9243_v6 = vcombine.high %v1299_v48, %v1303_v3  ;;  %v1339_v47 = vld [vmem:[#allocation8 + $0x19d8] sm:$0xff] }
 0x3f1   :  { %v1343_v4 = vld [vmem:[#allocation8 + $0x19f8] sm:$0xff] }
 0x3f3   :  { %7584 = vmatpush1.bf16.msra.mxu0 %v9192_v12  ;;  %7912 = vmatpush1.bf16.msra.mxu1 %v9194_v43  ;;  %v1311_v12 = vld [vmem:[#allocation8 + $0x18f8] sm:$0xff]  ;;  %v9240_v43 = vcombine.low %v1298_v0, %v1302_v23  ;;  %v1350_v0 = vld [vmem:[#allocation8 + $0x1a30] sm:$0xff] }
 0x3f4   :  { %7585 = vmatprep.subr.bf16.mxu0 %v9201_v13  ;;  %7913 = vmatprep.subr.bf16.mxu1 %v9203_v14  ;;  %v9249_v13 = vcombine.high %v1306_v8, %v1310_v19  ;;  %v9251_v14 = vcombine.high %v1307_v63, %v1311_v12  ;;  %v1347_v23 = vld [vmem:[#allocation8 + $0x1a18] sm:$0xff] }
 0x3f7   :  { %7586 = vmatpush1.bf16.msra.mxu0 %v9200_v26  ;;  %7914 = vmatpush1.bf16.msra.mxu1 %v9202_v52  ;;  %v9248_v26 = vcombine.low %v1306_v8, %v1310_v19  ;;  %v9250_v52 = vcombine.low %v1307_v63, %v1311_v12  ;;  %v1358_v8 = vld [vmem:[#allocation8 + $0x1a70] sm:$0xff]  ;;  %v1355_v19 = vld [vmem:[#allocation8 + $0x1a58] sm:$0xff] }
 0x3f8   :  { %7587 = vmatprep.subr.bf16.mxu0 %v9209_v27  ;;  %7915 = vmatprep.subr.bf16.mxu1 %v9211_v28  ;;  %v9257_v27 = vcombine.high %v1314_v17, %v1318_v32  ;;  %v1322_v28 = vld [vmem:[#allocation8 + $0x1950] sm:$0xff]  ;;  %v1359_v63 = vld [vmem:[#allocation8 + $0x1a78] sm:$0xff] }
 0x3f9   :  { %v9264_v10 = vcombine.low %v1322_v28, %v1326_v18  ;;  %v1366_v17 = vld [vmem:[#allocation8 + $0x1ab0] sm:$0xff]  ;;  %v1363_v32 = vld [vmem:[#allocation8 + $0x1a98] sm:$0xff] }
 0x3fb   :  { %7588 = vmatpush1.bf16.msra.mxu0 %v9208_v30  ;;  %7916 = vmatpush1.bf16.msra.mxu1 %v9210_v33  ;;  %v9258_v30 = vcombine.low %v1315_v31, %v1319_v25  ;;  %v9265_v33 = vcombine.high %v1322_v28, %v1326_v18  ;;  %v1374_v28 = vld [vmem:[#allocation8 + $0x1af0] sm:$0xff]  ;;  %v1371_v18 = vld [vmem:[#allocation8 + $0x1ad8] sm:$0xff] }
 0x3fc   :  { %7589 = vmatprep.subr.bf16.mxu0 %v9217_v34  ;;  %7917 = vmatprep.subr.bf16.mxu1 %v9219_v36  ;;  %v9267_v34 = vcombine.high %v1323_v51, %v1327_v29  ;;  %v1330_v36 = vld [vmem:[#allocation8 + $0x1990] sm:$0xff] }
 0x3fd   :  { %v9272_v59 = vcombine.low %v1330_v36, %v1334_v40 }
 0x3ff   :  { %7590 = vmatpush1.bf16.msra.mxu0 %v9216_v38  ;;  %7918 = vmatpush1.bf16.msra.mxu1 %v9218_v24  ;;  %v9266_v38 = vcombine.low %v1323_v51, %v1327_v29  ;;  %v9273_v24 = vcombine.high %v1330_v36, %v1334_v40  ;;  %v1375_v51 = vld [vmem:[#allocation8 + $0x1af8] sm:$0xff]  ;;  %v1382_v36 = vld [vmem:[#allocation8 + $0x1b30] sm:$0xff] }
 0x400   :  { %7600 = vmatprep.subr.bf16.mxu0 %v9225_v39  ;;  %7928 = vmatprep.subr.bf16.mxu1 %v9227_v44  ;;  %v9275_v39 = vcombine.high %v1331_v35, %v1335_v37  ;;  %v1338_v44 = vld [vmem:[#allocation8 + $0x19d0] sm:$0xff]  ;;  %v1379_v40 = vld [vmem:[#allocation8 + $0x1b18] sm:$0xff] }
 0x402   :  { %7592 = vmatmul.mubr.bf16.vlgmr.msra.gmra.mrb[4].mxu0 %v10437_v46  ;;  %7920 = vmatmul.mubr.bf16.vlgmr.msra.gmra.mrb[4].mxu1 %v10437_v46  ;;  %v9242_v46 = vcombine.low %v1299_v48, %v1303_v3  ;;  %v1351_v48 = vld [vmem:[#allocation8 + $0x1a38] sm:$0xff]  ;;  %v9280_v3 = vcombine.low %v1338_v44, %v1342_v45 }
 0x403   :  { %7601 = vmatpush1.bf16.msra.mxu0 %v9224_v56  ;;  %7929 = vmatpush1.bf16.msra.mxu1 %v9226_v11  ;;  %v9274_v56 = vcombine.low %v1331_v35, %v1335_v37  ;;  %v9281_v11 = vcombine.high %v1338_v44, %v1342_v45  ;;  %v1383_v35 = vld [vmem:[#allocation8 + $0x1b38] sm:$0xff]  ;;  %v1390_v44 = vld [vmem:[#allocation8 + $0x1b70] sm:$0xff] }
 0x404   :  { %7602 = vmatprep.subr.bf16.mxu0 %v9233_v60  ;;  %7930 = vmatprep.subr.bf16.mxu1 %v9235_v55  ;;  %v9283_v60 = vcombine.high %v1339_v47, %v1343_v4  ;;  %v1346_v55 = vld [vmem:[#allocation8 + $0x1a10] sm:$0xff]  ;;  %v1387_v45 = vld [vmem:[#allocation8 + $0x1b58] sm:$0xff] }
 0x405   :  { %7632 = vmatprep.mubr.bf16.mxu0 %v10439_v7  ;;  %7960 = vmatprep.mubr.bf16.mxu1 %v10439_v7  ;;  %v9259_v7 = vcombine.high %v1315_v31, %v1319_v25  ;;  %v9288_v12 = vcombine.low %v1346_v55, %v1350_v0  ;;  %v1367_v31 = vld [vmem:[#allocation8 + $0x1ab8] sm:$0xff] }
 0x407   :  { %7603 = vmatpush1.bf16.msra.mxu0 %v9232_v9  ;;  %7931 = vmatpush1.bf16.msra.mxu1 %v9234_v5  ;;  %v9282_v9 = vcombine.low %v1339_v47, %v1343_v4  ;;  %v9289_v5 = vcombine.high %v1346_v55, %v1350_v0  ;;  %v1391_v47 = vld [vmem:[#allocation8 + $0x1b78] sm:$0xff]  ;;  %v1398_v55 = vld [vmem:[#allocation8 + $0x1bb0] sm:$0xff] }
 0x408   :  { %7604 = vmatprep.subr.bf16.mxu0 %v9241_v15  ;;  %7932 = vmatprep.subr.bf16.mxu1 %v9243_v6  ;;  %v9291_v15 = vcombine.high %v1347_v23, %v1351_v48  ;;  %v1354_v6 = vld [vmem:[#allocation8 + $0x1a50] sm:$0xff]  ;;  %v1395_v0 = vld [vmem:[#allocation8 + $0x1b98] sm:$0xff] }
 0x409   :  { %v9296_v25 = vcombine.low %v1354_v6, %v1358_v8 }
 0x40b   :  { %7605 = vmatpush1.bf16.msra.mxu0 %v9240_v43  ;;  %7933 = vmatpush1.bf16.msra.mxu1 %v9242_v46  ;;  %v9290_v43 = vcombine.low %v1347_v23, %v1351_v48  ;;  %v9297_v46 = vcombine.high %v1354_v6, %v1358_v8  ;;  %v1399_v23 = vld [vmem:[#allocation8 + $0x1bb8] sm:$0xff]  ;;  %v1406_v6 = vld [vmem:[#allocation8 + $0x1bf0] sm:$0xff] }
 0x40c   :  { %7606 = vmatprep.subr.bf16.mxu0 %v9249_v13  ;;  %7934 = vmatprep.subr.bf16.mxu1 %v9251_v14  ;;  %v9299_v13 = vcombine.high %v1355_v19, %v1359_v63  ;;  %v1362_v14 = vld [vmem:[#allocation8 + $0x1a90] sm:$0xff]  ;;  %v1403_v8 = vld [vmem:[#allocation8 + $0x1bd8] sm:$0xff] }
 0x40d   :  { %v9304_v29 = vcombine.low %v1362_v14, %v1366_v17 }
 0x40f   :  { %7607 = vmatpush1.bf16.msra.mxu0 %v9248_v26  ;;  %7935 = vmatpush1.bf16.msra.mxu1 %v9250_v52  ;;  %v9298_v26 = vcombine.low %v1355_v19, %v1359_v63  ;;  %v9305_v52 = vcombine.high %v1362_v14, %v1366_v17  ;;  %v1407_v19 = vld [vmem:[#allocation8 + $0x1bf8] sm:$0xff]  ;;  %v1414_v14 = vld [vmem:[#allocation8 + $0x1c30] sm:$0xff] }
 0x410   :  { %7608 = vmatprep.subr.bf16.mxu0 %v9257_v27  ;;  %7936 = vmatprep.subr.bf16.mxu1 %v9259_v7  ;;  %v9307_v27 = vcombine.high %v1363_v32, %v1367_v31  ;;  %v1370_v7 = vld [vmem:[#allocation8 + $0x1ad0] sm:$0xff]  ;;  %v1411_v17 = vld [vmem:[#allocation8 + $0x1c18] sm:$0xff] }
 0x411   :  { %v9312_v37 = vcombine.low %v1370_v7, %v1374_v28 }
 0x413   :  { %7609 = vmatpush1.bf16.msra.mxu0 %v9256_v16  ;;  %7937 = vmatpush1.bf16.msra.mxu1 %v9258_v30  ;;  %v9306_v16 = vcombine.low %v1363_v32, %v1367_v31  ;;  %v9313_v30 = vcombine.high %v1370_v7, %v1374_v28  ;;  %v1415_v32 = vld [vmem:[#allocation8 + $0x1c38] sm:$0xff]  ;;  %v1422_v7 = vld [vmem:[#allocation8 + $0x1c70] sm:$0xff] }
 0x414   :  { %7610 = vmatprep.subr.bf16.mxu0 %v9265_v33  ;;  %7938 = vmatprep.subr.bf16.mxu1 %v9267_v34  ;;  %v9315_v33 = vcombine.high %v1371_v18, %v1375_v51  ;;  %v1378_v34 = vld [vmem:[#allocation8 + $0x1b10] sm:$0xff]  ;;  %v1419_v28 = vld [vmem:[#allocation8 + $0x1c58] sm:$0xff] }
 0x415   :  { %v9320_v4 = vcombine.low %v1378_v34, %v1382_v36 }
 0x417   :  { %7611 = vmatpush1.bf16.msra.mxu0 %v9264_v10  ;;  %7939 = vmatpush1.bf16.msra.mxu1 %v9266_v38  ;;  %v9314_v10 = vcombine.low %v1371_v18, %v1375_v51  ;;  %v9321_v38 = vcombine.high %v1378_v34, %v1382_v36  ;;  %v1423_v18 = vld [vmem:[#allocation8 + $0x1c78] sm:$0xff]  ;;  %v1430_v34 = vld [vmem:[#allocation8 + $0x1cb0] sm:$0xff] }
 0x418   :  { %7612 = vmatprep.subr.bf16.mxu0 %v9273_v24  ;;  %7940 = vmatprep.subr.bf16.mxu1 %v9275_v39  ;;  %v9323_v24 = vcombine.high %v1379_v40, %v1383_v35  ;;  %v1386_v39 = vld [vmem:[#allocation8 + $0x1b50] sm:$0xff]  ;;  %v1427_v36 = vld [vmem:[#allocation8 + $0x1c98] sm:$0xff] }
 0x419   :  { %v9328_v48 = vcombine.low %v1386_v39, %v1390_v44 }
 0x41b   :  { %7613 = vmatpush1.bf16.msra.mxu0 %v9272_v59  ;;  %7941 = vmatpush1.bf16.msra.mxu1 %v9274_v56  ;;  %v9322_v59 = vcombine.low %v1379_v40, %v1383_v35  ;;  %v9329_v56 = vcombine.high %v1386_v39, %v1390_v44  ;;  %v1431_v40 = vld [vmem:[#allocation8 + $0x1cb8] sm:$0xff]  ;;  %v1438_v39 = vld [vmem:[#allocation8 + $0x1cf0] sm:$0xff] }
 0x41c   :  { %7614 = vmatprep.subr.bf16.mxu0 %v9281_v11  ;;  %7942 = vmatprep.subr.bf16.mxu1 %v9283_v60  ;;  %v9331_v11 = vcombine.high %v1387_v45, %v1391_v47  ;;  %v1394_v60 = vld [vmem:[#allocation8 + $0x1b90] sm:$0xff]  ;;  %v1435_v44 = vld [vmem:[#allocation8 + $0x1cd8] sm:$0xff] }
 0x41d   :  { %v9336_v63 = vcombine.low %v1394_v60, %v1398_v55 }
 0x41f   :  { %7615 = vmatpush1.bf16.msra.mxu0 %v9280_v3  ;;  %7943 = vmatpush1.bf16.msra.mxu1 %v9282_v9  ;;  %v9330_v3 = vcombine.low %v1387_v45, %v1391_v47  ;;  %v9337_v9 = vcombine.high %v1394_v60, %v1398_v55  ;;  %v1439_v45 = vld [vmem:[#allocation8 + $0x1cf8] sm:$0xff] }
 0x420   :  { %7616 = vmatprep.subr.bf16.mxu0 %v9289_v5  ;;  %7944 = vmatprep.subr.bf16.mxu1 %v9291_v15  ;;  %v9339_v5 = vcombine.high %v1395_v0, %v1399_v23  ;;  %v1402_v15 = vld [vmem:[#allocation8 + $0x1bd0] sm:$0xff]  ;;  %v1443_v60 = vld [vmem:[#allocation8 + $0x1d18] sm:$0xff] }
 0x421   :  { %v9344_v31 = vcombine.low %v1402_v15, %v1406_v6  ;;  %v1447_v55 = vld [vmem:[#allocation8 + $0x1d38] sm:$0xff] }
 0x423   :  { %7617 = vmatpush1.bf16.msra.mxu0 %v9288_v12  ;;  %7945 = vmatpush1.bf16.msra.mxu1 %v9290_v43  ;;  %v9338_v12 = vcombine.low %v1395_v0, %v1399_v23  ;;  %v9345_v43 = vcombine.high %v1402_v15, %v1406_v6  ;;  %v9378_v23 = vcombine.low %v1435_v44, %v1439_v45  ;;  %v1455_v15 = vld [vmem:[#allocation8 + $0x1d78] sm:$0xff] }
 0x424   :  { %7618 = vmatprep.subr.bf16.mxu0 %v9297_v46  ;;  %7946 = vmatprep.subr.bf16.mxu1 %v9299_v13  ;;  %v9347_v46 = vcombine.high %v1403_v8, %v1407_v19  ;;  %v1410_v13 = vld [vmem:[#allocation8 + $0x1c10] sm:$0xff] }
 0x425   :  { %v9352_v51 = vcombine.low %v1410_v13, %v1414_v14 }
 0x427   :  { %7619 = vmatpush1.bf16.msra.mxu0 %v9296_v25  ;;  %7947 = vmatpush1.bf16.msra.mxu1 %v9298_v26  ;;  %v9346_v25 = vcombine.low %v1403_v8, %v1407_v19  ;;  %v9353_v26 = vcombine.high %v1410_v13, %v1414_v14  ;;  %v9386_v8 = vcombine.low %v1443_v60, %v1447_v55  ;;  %v1463_v13 = vld [vmem:[#allocation8 + $0x1db8] sm:$0xff] }
 0x428   :  { %7620 = vmatprep.subr.bf16.mxu0 %v9305_v52  ;;  %7948 = vmatprep.subr.bf16.mxu1 %v9307_v27  ;;  %v9355_v52 = vcombine.high %v1411_v17, %v1415_v32  ;;  %v1418_v27 = vld [vmem:[#allocation8 + $0x1c50] sm:$0xff] }
 0x429   :  { %v9360_v35 = vcombine.low %v1418_v27, %v1422_v7 }
 0x42b   :  { %7621 = vmatpush1.bf16.msra.mxu0 %v9304_v29  ;;  %7949 = vmatpush1.bf16.msra.mxu1 %v9306_v16  ;;  %v9354_v29 = vcombine.low %v1411_v17, %v1415_v32  ;;  %v9361_v16 = vcombine.high %v1418_v27, %v1422_v7  ;;  %v1471_v27 = vld [vmem:[#allocation8 + $0x1df8] sm:$0xff] }
 0x42c   :  { %7622 = vmatprep.subr.bf16.mxu0 %v9313_v30  ;;  %7950 = vmatprep.subr.bf16.mxu1 %v9315_v33  ;;  %v9363_v30 = vcombine.high %v1419_v28, %v1423_v18  ;;  %v1426_v33 = vld [vmem:[#allocation8 + $0x1c90] sm:$0xff] }
 0x42d   :  { %v9368_v47 = vcombine.low %v1426_v33, %v1430_v34 }
 0x42f   :  { %7623 = vmatpush1.bf16.msra.mxu0 %v9312_v37  ;;  %7951 = vmatpush1.bf16.msra.mxu1 %v9314_v10  ;;  %v9362_v37 = vcombine.low %v1419_v28, %v1423_v18  ;;  %v9369_v10 = vcombine.high %v1426_v33, %v1430_v34  ;;  %v1479_v33 = vld [vmem:[#allocation8 + $0x1e38] sm:$0xff] }
 0x430   :  { %7624 = vmatprep.subr.bf16.mxu0 %v9321_v38  ;;  %7952 = vmatprep.subr.bf16.mxu1 %v9323_v24  ;;  %v9371_v38 = vcombine.high %v1427_v36, %v1431_v40  ;;  %v1434_v24 = vld [vmem:[#allocation8 + $0x1cd0] sm:$0xff] }
 0x431   :  { %v9376_v0 = vcombine.low %v1434_v24, %v1438_v39 }
 0x433   :  { %7625 = vmatpush1.bf16.msra.mxu0 %v9320_v4  ;;  %7953 = vmatpush1.bf16.msra.mxu1 %v9322_v59  ;;  %v9377_v4 = vcombine.high %v1434_v24, %v1438_v39  ;;  %v9379_v59 = vcombine.high %v1435_v44, %v1439_v45  ;;  %v1487_v24 = vld [vmem:[#allocation8 + $0x1e78] sm:$0xff] }
 0x434   :  { %7626 = vmatprep.subr.bf16.mxu0 %v9329_v56  ;;  %7954 = vmatprep.subr.bf16.mxu1 %v9331_v11  ;;  %v1442_v56 = vld [vmem:[#allocation8 + $0x1d10] sm:$0xff] }
 0x435   :  { %v1446_v11 = vld [vmem:[#allocation8 + $0x1d30] sm:$0xff] }
 0x436   :  { %v9384_v6 = vcombine.low %v1442_v56, %v1446_v11 }
 0x437   :  { %7627 = vmatpush1.bf16.msra.mxu0 %v9328_v48  ;;  %7955 = vmatpush1.bf16.msra.mxu1 %v9330_v3  ;;  %v9385_v48 = vcombine.high %v1442_v56, %v1446_v11  ;;  %v1450_v3 = vld [vmem:[#allocation8 + $0x1d50] sm:$0xff]  ;;  %v1495_v56 = vld [vmem:[#allocation8 + $0x1eb8] sm:$0xff] }
 0x438   :  { %7628 = vmatprep.subr.bf16.mxu0 %v9337_v9  ;;  %7956 = vmatprep.subr.bf16.mxu1 %v9339_v5  ;;  %v1454_v9 = vld [vmem:[#allocation8 + $0x1d70] sm:$0xff]  ;;  %v1451_v5 = vld [vmem:[#allocation8 + $0x1d58] sm:$0xff] }
 0x439   :  { %v9393_v19 = vcombine.high %v1450_v3, %v1454_v9  ;;  %v9392_v14 = vcombine.low %v1450_v3, %v1454_v9  ;;  %v9394_v17 = vcombine.low %v1451_v5, %v1455_v15  ;;  %v1503_v3 = vld [vmem:[#allocation8 + $0x1ef8] sm:$0xff] }
 0x43b   :  { %7629 = vmatpush1.bf16.msra.mxu0 %v9336_v63  ;;  %7957 = vmatpush1.bf16.msra.mxu1 %v9338_v12  ;;  %v9395_v63 = vcombine.high %v1451_v5, %v1455_v15  ;;  %v1458_v12 = vld [vmem:[#allocation8 + $0x1d90] sm:$0xff] }
 0x43c   :  { %7630 = vmatprep.subr.bf16.mxu0 %v9345_v43  ;;  %7958 = vmatprep.subr.bf16.mxu1 %v9347_v46  ;;  %v1462_v43 = vld [vmem:[#allocation8 + $0x1db0] sm:$0xff]  ;;  %v1459_v46 = vld [vmem:[#allocation8 + $0x1d98] sm:$0xff] }
 0x43d   :  { %v9401_v32 = vcombine.high %v1458_v12, %v1462_v43  ;;  %v9400_v7 = vcombine.low %v1458_v12, %v1462_v43  ;;  %v9402_v28 = vcombine.low %v1459_v46, %v1463_v13  ;;  %v1511_v12 = vld [vmem:[#allocation8 + $0x1f38] sm:$0xff] }
 0x43f   :  { %7631 = vmatpush1.bf16.msra.mxu0 %v9344_v31  ;;  %7959 = vmatpush1.bf16.msra.mxu1 %v9346_v25  ;;  %v9403_v31 = vcombine.high %v1459_v46, %v1463_v13  ;;  %v1466_v25 = vld [vmem:[#allocation8 + $0x1dd0] sm:$0xff] }
 0x440   :  { %7641 = vmatprep.subr.bf16.mxu0 %v9353_v26  ;;  %7969 = vmatprep.subr.bf16.mxu1 %v9355_v52  ;;  %v1470_v26 = vld [vmem:[#allocation8 + $0x1df0] sm:$0xff]  ;;  %v1467_v52 = vld [vmem:[#allocation8 + $0x1dd8] sm:$0xff] }
 0x441   :  { %v9409_v18 = vcombine.high %v1466_v25, %v1470_v26  ;;  %v9408_v34 = vcombine.low %v1466_v25, %v1470_v26  ;;  %v1519_v25 = vld [vmem:[#allocation8 + $0x1f78] sm:$0xff] }
 0x442   :  { %7633 = vmatmul.mubr.bf16.vlgmr.msra.gmra.mrb[4].mxu0 %v10454_v1  ;;  %7961 = vmatmul.mubr.bf16.vlgmr.msra.gmra.mrb[4].mxu1 %v10454_v1  ;;  %v9370_v1 = vcombine.low %v1427_v36, %v1431_v40  ;;  %v9410_v36 = vcombine.low %v1467_v52, %v1471_v27 }
 0x443   :  { %7642 = vmatpush1.bf16.msra.mxu0 %v9352_v51  ;;  %7970 = vmatpush1.bf16.msra.mxu1 %v9354_v29  ;;  %v9411_v51 = vcombine.high %v1467_v52, %v1471_v27  ;;  %v1474_v29 = vld [vmem:[#allocation8 + $0x1e10] sm:$0xff] }
 0x444   :  { %7643 = vmatprep.subr.bf16.mxu0 %v9361_v16  ;;  %7971 = vmatprep.subr.bf16.mxu1 %v9363_v30  ;;  %v1478_v16 = vld [vmem:[#allocation8 + $0x1e30] sm:$0xff]  ;;  %v1475_v30 = vld [vmem:[#allocation8 + $0x1e18] sm:$0xff] }
 0x445   :  { %7673 = vmatprep.mubr.bf16.mxu0 %v10456_v20  ;;  %8001 = vmatprep.mubr.bf16.mxu1 %v10456_v20  ;;  %v9387_v20 = vcombine.high %v1443_v60, %v1447_v55  ;;  %v9417_v40 = vcombine.high %v1474_v29, %v1478_v16  ;;  %v9416_v39 = vcombine.low %v1474_v29, %v1478_v16  ;;  %v1527_v29 = vld [vmem:[#allocation8 + $0x1fb8] sm:$0xff] }
 0x446   :  { %v9418_v44 = vcombine.low %v1475_v30, %v1479_v33 }
 0x447   :  { %7644 = vmatpush1.bf16.msra.mxu0 %v9360_v35  ;;  %7972 = vmatpush1.bf16.msra.mxu1 %v9362_v37  ;;  %v9419_v35 = vcombine.high %v1475_v30, %v1479_v33  ;;  %v1482_v37 = vld [vmem:[#allocation8 + $0x1e50] sm:$0xff] }
 0x448   :  { %7645 = vmatprep.subr.bf16.mxu0 %v9369_v10  ;;  %7973 = vmatprep.subr.bf16.mxu1 %v9371_v38  ;;  %v1486_v10 = vld [vmem:[#allocation8 + $0x1e70] sm:$0xff]  ;;  %v1483_v38 = vld [vmem:[#allocation8 + $0x1e58] sm:$0xff] }
 0x449   :  { %v9425_v45 = vcombine.high %v1482_v37, %v1486_v10  ;;  %v9424_v11 = vcombine.low %v1482_v37, %v1486_v10  ;;  %v9426_v60 = vcombine.low %v1483_v38, %v1487_v24  ;;  %v1535_v37 = vld [vmem:[#allocation8 + $0x1ff8] sm:$0xff]  ;;  %v10506_v10 = vld [vmem:[#allocation10] sm:$0xff] }
 0x44b   :  { %7646 = vmatpush1.bf16.msra.mxu0 %v9368_v47  ;;  %7974 = vmatpush1.bf16.msra.mxu1 %v9370_v1  ;;  %v9427_v47 = vcombine.high %v1483_v38, %v1487_v24  ;;  %v1490_v1 = vld [vmem:[#allocation8 + $0x1e90] sm:$0xff] }
 0x44c   :  { %7647 = vmatprep.subr.bf16.mxu0 %v9377_v4  ;;  %7975 = vmatprep.subr.bf16.mxu1 %v9379_v59  ;;  %v1494_v4 = vld [vmem:[#allocation8 + $0x1eb0] sm:$0xff]  ;;  %v1491_v59 = vld [vmem:[#allocation8 + $0x1e98] sm:$0xff] }
 0x44d   :  { %v9433_v55 = vcombine.high %v1490_v1, %v1494_v4  ;;  %v9432_v9 = vcombine.low %v1490_v1, %v1494_v4  ;;  %v9434_v5 = vcombine.low %v1491_v59, %v1495_v56  ;;  %v1545_v1 = vrot.slane %v10506_v10, %v10214_v54  ;;  %v8066_v4 = vld [vmem:[#allocation11 + $0x180] sm:$0xff]  ;;  %v8036_v54 = vld [vmem:[#allocation11 + $0x90] sm:$0xff] }
 0x44f   :  { %7648 = vmatpush1.bf16.msra.mxu0 %v9376_v0  ;;  %7976 = vmatpush1.bf16.msra.mxu1 %v9378_v23  ;;  %v9435_v0 = vcombine.high %v1491_v59, %v1495_v56  ;;  %v1498_v23 = vld [vmem:[#allocation8 + $0x1ed0] sm:$0xff]  ;;  %v1553_v56 = vrot.slane %v10506_v10, %v10220_v58 }
 0x450   :  { %7649 = vmatprep.subr.bf16.mxu0 %v9385_v48  ;;  %7977 = vmatprep.subr.bf16.mxu1 %v9387_v20  ;;  %v1502_v48 = vld [vmem:[#allocation8 + $0x1ef0] sm:$0xff]  ;;  %v1499_v20 = vld [vmem:[#allocation8 + $0x1ed8] sm:$0xff] }
 0x451   :  { %v9441_v15 = vcombine.high %v1498_v23, %v1502_v48  ;;  %v9440_v43 = vcombine.low %v1498_v23, %v1502_v48  ;;  %v9442_v46 = vcombine.low %v1499_v20, %v1503_v3  ;;  %v8067_v59 = vld [vmem:[#allocation11 + $0x188] sm:$0xff] }
 0x452   :  { %v8019_v23 = vld [vmem:[#allocation11 + $0x8] sm:$0xff]  ;;  %v9649_v48 = vpack.c.bf16 %v8067_v59, %v8066_v4 }
 0x453   :  { %7650 = vmatpush1.bf16.msra.mxu0 %v9384_v6  ;;  %7978 = vmatpush1.bf16.msra.mxu1 %v9386_v8  ;;  %v9443_v6 = vcombine.high %v1499_v20, %v1503_v3  ;;  %v1506_v8 = vld [vmem:[#allocation8 + $0x1f10] sm:$0xff]  ;;  %v8050_v20 = vld [vmem:[#allocation11 + $0x100] sm:$0xff] }
 0x454   :  { %7651 = vmatprep.subr.bf16.mxu0 %v9393_v19  ;;  %7979 = vmatprep.subr.bf16.mxu1 %v9395_v63  ;;  %v1510_v19 = vld [vmem:[#allocation8 + $0x1f30] sm:$0xff]  ;;  %v1507_v63 = vld [vmem:[#allocation8 + $0x1f18] sm:$0xff] }
 0x455   :  { %v9449_v13 = vcombine.high %v1506_v8, %v1510_v19  ;;  %v9448_v26 = vcombine.low %v1506_v8, %v1510_v19  ;;  %v9450_v52 = vcombine.low %v1507_v63, %v1511_v12  ;;  %v8051_v3 = vld [vmem:[#allocation11 + $0x108] sm:$0xff]  ;;  %v8069_v8 = vld [vmem:[#allocation11 + $0x198] sm:$0xff] }
 0x456   :  { %v9651_v19 = vpack.c.bf16 %v8051_v3, %v8050_v20  ;;  %v8045_v20 = vld [vmem:[#allocation11 + $0xd8] sm:$0xff]  ;;  %v8076_v3 = vld [vmem:[#allocation11 + $0x1d0] sm:$0xff] }
 0x457   :  { %7652 = vmatpush1.bf16.msra.mxu0 %v9392_v14  ;;  %7980 = vmatpush1.bf16.msra.mxu1 %v9394_v17  ;;  %v9451_v14 = vcombine.high %v1507_v63, %v1511_v12  ;;  %v1514_v17 = vld [vmem:[#allocation8 + $0x1f50] sm:$0xff]  ;;  %v8020_v63 = vld [vmem:[#allocation11 + $0x10] sm:$0xff]  ;;  %v8021_v12 = vld [vmem:[#allocation11 + $0x18] sm:$0xff] }
 0x458   :  { %7653 = vmatprep.subr.bf16.mxu0 %v9401_v32  ;;  %7981 = vmatprep.subr.bf16.mxu1 %v9403_v31  ;;  %v1518_v32 = vld [vmem:[#allocation8 + $0x1f70] sm:$0xff]  ;;  %v1515_v31 = vld [vmem:[#allocation8 + $0x1f58] sm:$0xff] }
 0x459   :  { %v9457_v27 = vcombine.high %v1514_v17, %v1518_v32  ;;  %v9456_v16 = vcombine.low %v1514_v17, %v1518_v32  ;;  %v9458_v30 = vcombine.low %v1515_v31, %v1519_v25  ;;  %v8039_v17 = vld [vmem:[#allocation11 + $0xa8] sm:$0xff] }
 0x45b   :  { %7654 = vmatpush1.bf16.msra.mxu0 %v9400_v7  ;;  %7982 = vmatpush1.bf16.msra.mxu1 %v9402_v28  ;;  %v9459_v7 = vcombine.high %v1515_v31, %v1519_v25  ;;  %v1522_v28 = vld [vmem:[#allocation8 + $0x1f90] sm:$0xff] }
 0x45c   :  { %7655 = vmatprep.subr.bf16.mxu0 %v9409_v18  ;;  %7983 = vmatprep.subr.bf16.mxu1 %v9411_v51  ;;  %v1526_v18 = vld [vmem:[#allocation8 + $0x1fb0] sm:$0xff]  ;;  %v1523_v51 = vld [vmem:[#allocation8 + $0x1f98] sm:$0xff] }
 0x45d   :  { %v9465_v33 = vcombine.high %v1522_v28, %v1526_v18  ;;  %v9464_v38 = vcombine.low %v1522_v28, %v1526_v18  ;;  %v9466_v24 = vcombine.low %v1523_v51, %v1527_v29  ;;  %v8071_v31 = vld [vmem:[#allocation11 + $0x1a8] sm:$0xff]  ;;  %v8054_v18 = vld [vmem:[#allocation11 + $0x120] sm:$0xff] }
 0x45e   :  { %v8023_v28 = vld [vmem:[#allocation11 + $0x28] sm:$0xff] }
 0x45f   :  { %7656 = vmatpush1.bf16.msra.mxu0 %v9408_v34  ;;  %7984 = vmatpush1.bf16.msra.mxu1 %v9410_v36  ;;  %v9467_v34 = vcombine.high %v1523_v51, %v1527_v29  ;;  %v1530_v36 = vld [vmem:[#allocation8 + $0x1fd0] sm:$0xff] }
 0x460   :  { %7657 = vmatprep.subr.bf16.mxu0 %v9417_v40  ;;  %7985 = vmatprep.subr.bf16.mxu1 %v9419_v35  ;;  %v1534_v40 = vld [vmem:[#allocation8 + $0x1ff0] sm:$0xff]  ;;  %v1531_v35 = vld [vmem:[#allocation8 + $0x1fd8] sm:$0xff] }
 0x461   :  { %v8055_v29 = vld [vmem:[#allocation11 + $0x128] sm:$0xff] }
 0x463   :  { %7658 = vmatpush1.bf16.msra.mxu0 %v9416_v39  ;;  %7986 = vmatpush1.bf16.msra.mxu1 %v9418_v44  ;;  %v9473_v39 = vcombine.high %v1530_v36, %v1534_v40  ;;  %v9475_v44 = vcombine.high %v1531_v35, %v1535_v37 }
 0x464   :  { %7659 = vmatprep.subr.bf16.mxu0 %v9425_v45  ;;  %7987 = vmatprep.subr.bf16.mxu1 %v9427_v47  ;;  %v8034_v45 = vld [vmem:[#allocation11 + $0x80] sm:$0xff]  ;;  %v8035_v47 = vld [vmem:[#allocation11 + $0x88] sm:$0xff] }
 0x467   :  { %7660 = vmatpush1.bf16.msra.mxu0 %v9424_v11  ;;  %7988 = vmatpush1.bf16.msra.mxu1 %v9426_v60  ;;  %v9472_v11 = vcombine.low %v1530_v36, %v1534_v40  ;;  %v9474_v60 = vcombine.low %v1531_v35, %v1535_v37  ;;  %v9659_v36 = vpack.c.bf16 %v8055_v29, %v8054_v18  ;;  %v8024_v35 = vld [vmem:[#allocation11 + $0x30] sm:$0xff]  ;;  %v8025_v37 = vld [vmem:[#allocation11 + $0x38] sm:$0xff] }
 0x468   :  { %7661 = vmatprep.subr.bf16.mxu0 %v9433_v55  ;;  %7989 = vmatprep.subr.bf16.mxu1 %v9435_v0  ;;  %v9617_v55 = vpack.c.bf16 %v8035_v47, %v8034_v45  ;;  %v8018_v0 = vld [vmem:[#allocation11] sm:$0xff]  ;;  %v8043_v45 = vld [vmem:[#allocation11 + $0xc8] sm:$0xff]  ;;  %v9631_v4 = vpack.c.bf16 %v8025_v37, %v8024_v35 }
 0x469   :  { %v9619_v58 = vpack.c.bf16 %v8019_v23, %v8018_v0  ;;  %v8074_v47 = vld [vmem:[#allocation11 + $0x1c0] sm:$0xff]  ;;  %v8059_v23 = vld [vmem:[#allocation11 + $0x148] sm:$0xff] }
 0x46a   :  { %v8098_v35 = vld [vmem:[#allocation11 + $0x280] sm:$0xff]  ;;  %v8099_v37 = vld [vmem:[#allocation11 + $0x288] sm:$0xff] }
 0x46b   :  { %7662 = vmatpush1.bf16.msra.mxu0 %v9432_v9  ;;  %7990 = vmatpush1.bf16.msra.mxu1 %v9434_v5  ;;  %v9746_v9 = vadd.f32 %v10486_v62, %v1545_v1  ;;  %v8037_v5 = vld [vmem:[#allocation11 + $0x98] sm:$0xff]  ;;  %v8075_v1 = vld [vmem:[#allocation11 + $0x1c8] sm:$0xff] }
 0x46c   :  { %7663 = vmatprep.subr.bf16.mxu0 %v9441_v15  ;;  %7991 = vmatprep.subr.bf16.mxu1 %v9443_v6  ;;  %v9748_v15 = vadd.f32 %v10488_v22, %v1553_v56  ;;  %v8068_v6 = vld [vmem:[#allocation11 + $0x190] sm:$0xff]  ;;  %v8070_v22 = vld [vmem:[#allocation11 + $0x1a0] sm:$0xff]  ;;  %v9665_v0 = vpack.c.bf16 %v8075_v1, %v8074_v47  ;;  %v8083_v1 = vld [vmem:[#allocation11 + $0x208] sm:$0xff] }
 0x46d   :  { %v8011_v62 = vmax.f32 %v9746_v9, 0.0  ;;  %v9653_v32 = vpack.c.bf16 %v8069_v8, %v8068_v6  ;;  %v9657_v51 = vpack.c.bf16 %v8071_v31, %v8070_v22  ;;  %v8077_v9 = vld [vmem:[#allocation11 + $0x1d8] sm:$0xff]  ;;  %v8060_v8 = vld [vmem:[#allocation11 + $0x150] sm:$0xff]  ;;  %v8031_v22 = vld [vmem:[#allocation11 + $0x68] sm:$0xff] }
 0x46e   :  { %v8013_v25 = vmax.f32 %v9748_v15, 0.0  ;;  %v8029_v6 = vld [vmem:[#allocation11 + $0x58] sm:$0xff]  ;;  %v8062_v31 = vld [vmem:[#allocation11 + $0x160] sm:$0xff] }
 0x46f   :  { %7664 = vmatpush1.bf16.msra.mxu0 %v9440_v43  ;;  %7992 = vmatpush1.bf16.msra.mxu1 %v9442_v46  ;;  %v8052_v43 = vld [vmem:[#allocation11 + $0x110] sm:$0xff]  ;;  %v9621_v46 = vpack.c.bf16 %v8037_v5, %v8036_v54  ;;  %v8082_v47 = vld [vmem:[#allocation11 + $0x200] sm:$0xff] }
 0x470   :  { %7665 = vmatprep.subr.bf16.mxu0 %v9449_v13  ;;  %7993 = vmatprep.subr.bf16.mxu1 %v9451_v14  ;;  %v8053_v13 = vld [vmem:[#allocation11 + $0x118] sm:$0xff]  ;;  %v8038_v14 = vld [vmem:[#allocation11 + $0xa0] sm:$0xff] }
 0x473   :  { %7666 = vmatpush1.bf16.msra.mxu0 %v9448_v26  ;;  %7994 = vmatpush1.bf16.msra.mxu1 %v9450_v52  ;;  %v9623_v26 = vpack.c.bf16 %v8021_v12, %v8020_v63  ;;  %v9655_v52 = vpack.c.bf16 %v8053_v13, %v8052_v43  ;;  %v8061_v63 = vld [vmem:[#allocation11 + $0x158] sm:$0xff]  ;;  %v8046_v12 = vld [vmem:[#allocation11 + $0xe0] sm:$0xff]  ;;  %v8047_v43 = vld [vmem:[#allocation11 + $0xe8] sm:$0xff] }
 0x474   :  { %7667 = vmatprep.subr.bf16.mxu0 %v9457_v27  ;;  %7995 = vmatprep.subr.bf16.mxu1 %v9459_v7  ;;  %v9625_v27 = vpack.c.bf16 %v8039_v17, %v8038_v14  ;;  %v8022_v7 = vld [vmem:[#allocation11 + $0x20] sm:$0xff]  ;;  %v8079_v13 = vld [vmem:[#allocation11 + $0x1e8] sm:$0xff]  ;;  %v9671_v17 = vpack.c.bf16 %v8061_v63, %v8060_v8 }
 0x475   :  { %v8134_v8 = vld [vmem:[#allocation11 + $0x3a0] sm:$0xff] }
 0x477   :  { %7668 = vmatpush1.bf16.msra.mxu0 %v9456_v16  ;;  %7996 = vmatpush1.bf16.msra.mxu1 %v9458_v30  ;;  %v8040_v16 = vld [vmem:[#allocation11 + $0xb0] sm:$0xff]  ;;  %v8041_v30 = vld [vmem:[#allocation11 + $0xb8] sm:$0xff] }
 0x478   :  { %7669 = vmatprep.subr.bf16.mxu0 %v9465_v33  ;;  %7997 = vmatprep.subr.bf16.mxu1 %v9467_v34  ;;  %v8072_v33 = vld [vmem:[#allocation11 + $0x1b0] sm:$0xff]  ;;  %v8073_v34 = vld [vmem:[#allocation11 + $0x1b8] sm:$0xff]  ;;  %v9629_v40 = vpack.c.bf16 %v8041_v30, %v8040_v16 }
 0x479   :  { %v8032_v30 = vld [vmem:[#allocation11 + $0x70] sm:$0xff] }
 0x47b   :  { %7670 = vmatpush1.bf16.msra.mxu0 %v9464_v38  ;;  %7998 = vmatpush1.bf16.msra.mxu1 %v9466_v24  ;;  %v8056_v38 = vld [vmem:[#allocation11 + $0x130] sm:$0xff]  ;;  %v9661_v24 = vpack.c.bf16 %v8073_v34, %v8072_v33  ;;  %v8033_v33 = vld [vmem:[#allocation11 + $0x78] sm:$0xff] }
 0x47c   :  { %7671 = vmatprep.subr.bf16.mxu0 %v9473_v39  ;;  %7999 = vmatprep.subr.bf16.mxu1 %v9475_v44  ;;  %v8057_v39 = vld [vmem:[#allocation11 + $0x138] sm:$0xff]  ;;  %v8042_v44 = vld [vmem:[#allocation11 + $0xc0] sm:$0xff]  ;;  %v8064_v34 = vld [vmem:[#allocation11 + $0x170] sm:$0xff] }
 0x47d   :  { %v9663_v59 = vpack.c.bf16 %v8057_v39, %v8056_v38  ;;  %v9633_v56 = vpack.c.bf16 %v8043_v45, %v8042_v44  ;;  %v8130_v38 = vld [vmem:[#allocation11 + $0x380] sm:$0xff]  ;;  %v9647_v39 = vpack.c.bf16 %v8033_v33, %v8032_v30  ;;  %v9681_v45 = vpack.c.bf16 %v8099_v37, %v8098_v35  ;;  %v8107_v30 = vld [vmem:[#allocation11 + $0x2c8] sm:$0xff] }
 0x47e   :  { %v8138_v33 = vld [vmem:[#allocation11 + $0x3c0] sm:$0xff]  ;;  %v8091_v37 = vld [vmem:[#allocation11 + $0x248] sm:$0xff] }
 0x47f   :  { %7672 = vmatpush1.bf16.msra.mxu0 %v9472_v11  ;;  %8000 = vmatpush1.bf16.msra.mxu1 %v9474_v60  ;;  %v8026_v11 = vld [vmem:[#allocation11 + $0x40] sm:$0xff]  ;;  %v8027_v60 = vld [vmem:[#allocation11 + $0x48] sm:$0xff] }
 0x480   :  { %9618 = vmatprep.subr.bf16.mxu0 %v9617_v55  ;;  %9650 = vmatprep.subr.bf16.mxu1 %v9649_v48  ;;  %v8058_v55 = vld [vmem:[#allocation11 + $0x140] sm:$0xff]  ;;  %v8044_v48 = vld [vmem:[#allocation11 + $0xd0] sm:$0xff]  ;;  %v9635_v54 = vpack.c.bf16 %v8027_v60, %v8026_v11  ;;  %v8101_v60 = vld [vmem:[#allocation11 + $0x298] sm:$0xff] }
 0x481   :  { %v9667_v5 = vpack.c.bf16 %v8059_v23, %v8058_v55  ;;  %v9637_v15 = vpack.c.bf16 %v8045_v20, %v8044_v48  ;;  %v8100_v11 = vld [vmem:[#allocation11 + $0x290] sm:$0xff]  ;;  %v9683_v23 = vpack.c.bf16 %v8083_v1, %v8082_v47  ;;  %v8090_v35 = vld [vmem:[#allocation11 + $0x240] sm:$0xff]  ;;  %v8141_v47 = vld [vmem:[#allocation11 + $0x3d8] sm:$0xff] }
 0x482   :  { %7674 = vmatmul.mubr.bf16.vlgmr.msra.gmra.mrb[4].mxu0 %v10464_v21  ;;  %8002 = vmatmul.mubr.bf16.vlgmr.msra.gmra.mrb[4].mxu1 %v10464_v21  ;;  %v9627_v21 = vpack.c.bf16 %v8023_v28, %v8022_v7  ;;  %v8080_v7 = vld [vmem:[#allocation11 + $0x1f0] sm:$0xff]  ;;  %v8081_v28 = vld [vmem:[#allocation11 + $0x1f8] sm:$0xff]  ;;  %v9685_v20 = vpack.c.bf16 %v8101_v60, %v8100_v11  ;;  %v9699_v1 = vpack.c.bf16 %v8091_v37, %v8090_v35 }
 0x483   :  { %9620 = vmatpush3.bf16.msra.mxu0 %v9619_v58  ;;  %8217 = vmatprep.mubr.f32.mxu0 %v8011_v62  ;;  %v8028_v58 = vld [vmem:[#allocation11 + $0x50] sm:$0xff]  ;;  %v9641_v62 = vpack.c.bf16 %v8047_v43, %v8046_v12 }
 0x484   :  { %9652 = vmatpush3.bf16.msra.mxu1 %v9651_v19  ;;  %8287 = vmatprep.mubr.f32.mxu1 %v8013_v25  ;;  %v9669_v19 = vpack.c.bf16 %v8077_v9, %v8076_v3  ;;  %v9639_v14 = vpack.c.bf16 %v8029_v6, %v8028_v58  ;;  %v8132_v55 = vld [vmem:[#allocation11 + $0x390] sm:$0xff]  ;;  %v8085_v9 = vld [vmem:[#allocation11 + $0x218] sm:$0xff]  ;;  %v8102_v58 = vld [vmem:[#allocation11 + $0x2a0] sm:$0xff] }
 0x485   :  { %9622 = vmatprep.subr.bf16.mxu0 %v9621_v46  ;;  %9654 = vmatprep.subr.bf16.mxu1 %v9653_v32  ;;  %v8078_v46 = vld [vmem:[#allocation11 + $0x1e0] sm:$0xff]  ;;  %v8084_v3 = vld [vmem:[#allocation11 + $0x210] sm:$0xff]  ;;  %v8103_v6 = vld [vmem:[#allocation11 + $0x2a8] sm:$0xff] }
 0x486   :  { %v8030_v32 = vld [vmem:[#allocation11 + $0x60] sm:$0xff]  ;;  %v9673_v25 = vpack.c.bf16 %v8079_v13, %v8078_v46  ;;  %v9687_v63 = vpack.c.bf16 %v8085_v9, %v8084_v3  ;;  %v9689_v43 = vpack.c.bf16 %v8103_v6, %v8102_v58  ;;  %v8087_v13 = vld [vmem:[#allocation11 + $0x228] sm:$0xff]  ;;  %v8124_v11 = vld [vmem:[#allocation11 + $0x350] sm:$0xff] }
 0x487   :  { %9624 = vmatpush3.bf16.msra.mxu0 %v9623_v26  ;;  %v8063_v26 = vld [vmem:[#allocation11 + $0x168] sm:$0xff]  ;;  %v9643_v18 = vpack.c.bf16 %v8031_v22, %v8030_v32  ;;  %v8086_v46 = vld [vmem:[#allocation11 + $0x220] sm:$0xff]  ;;  %v8104_v32 = vld [vmem:[#allocation11 + $0x2b0] sm:$0xff] }
 0x488   :  { %9656 = vmatpush3.bf16.msra.mxu1 %v9655_v52  ;;  %9626 = vmatprep.subr.bf16.mxu0 %v9625_v27  ;;  %v8048_v52 = vld [vmem:[#allocation11 + $0xf0] sm:$0xff]  ;;  %v8049_v27 = vld [vmem:[#allocation11 + $0xf8] sm:$0xff]  ;;  %v9675_v29 = vpack.c.bf16 %v8063_v26, %v8062_v31  ;;  %v9691_v26 = vpack.c.bf16 %v8087_v13, %v8086_v46  ;;  %v8127_v6 = vld [vmem:[#allocation11 + $0x368] sm:$0xff] }
 0x489   :  { %9658 = vmatprep.subr.bf16.mxu1 %v9657_v51  ;;  %v1541_v51 = vrot.slane %v10506_v10, %v10211_v53  ;;  %v9645_v16 = vpack.c.bf16 %v8049_v27, %v8048_v52  ;;  %v8105_v22 = vld [vmem:[#allocation11 + $0x2b8] sm:$0xff]  ;;  %v8136_v31 = vld [vmem:[#allocation11 + $0x3b0] sm:$0xff] }
 0x48a   :  { %v9693_v27 = vpack.c.bf16 %v8105_v22, %v8104_v32  ;;  %v8145_v46 = vld [vmem:[#allocation11 + $0x3f8] sm:$0xff]  ;;  %v8096_v13 = vld [vmem:[#allocation11 + $0x270] sm:$0xff] }
 0x48b   :  { %9628 = vmatpush3.bf16.msra.mxu0 %v9627_v21  ;;  %v1549_v21 = vrot.slane %v10506_v10, %v10217_v57  ;;  %v9745_v53 = vadd.f32 %v10482_v61, %v1541_v51  ;;  %v8128_v32 = vld [vmem:[#allocation11 + $0x370] sm:$0xff]  ;;  %v8129_v22 = vld [vmem:[#allocation11 + $0x378] sm:$0xff] }
 0x48c   :  { %9660 = vmatpush3.bf16.msra.mxu1 %v9659_v36  ;;  %9630 = vmatprep.subr.bf16.mxu0 %v9629_v40  ;;  %v9677_v36 = vpack.c.bf16 %v8081_v28, %v8080_v7  ;;  %v8065_v40 = vld [vmem:[#allocation11 + $0x178] sm:$0xff]  ;;  %v8088_v7 = vld [vmem:[#allocation11 + $0x230] sm:$0xff] }
 0x48d   :  { %9662 = vmatprep.subr.bf16.mxu1 %v9661_v24  ;;  %v8131_v24 = vld [vmem:[#allocation11 + $0x388] sm:$0xff]  ;;  %v9679_v44 = vpack.c.bf16 %v8065_v40, %v8064_v34  ;;  %v9747_v57 = vadd.f32 %v10484_v49, %v1549_v21  ;;  %v8010_v48 = vmax.f32 %v9745_v53, 0.0  ;;  %v8089_v28 = vld [vmem:[#allocation11 + $0x238] sm:$0xff]  ;;  %v8108_v53 = vld [vmem:[#allocation11 + $0x2d0] sm:$0xff] }
 0x48e   :  { %v8139_v34 = vld [vmem:[#allocation11 + $0x3c8] sm:$0xff]  ;;  %v9695_v21 = vpack.c.bf16 %v8089_v28, %v8088_v7 }
 0x48f   :  { %9632 = vmatpush3.bf16.msra.mxu0 %v9631_v4  ;;  %v8114_v4 = vld [vmem:[#allocation11 + $0x300] sm:$0xff] }
 0x490   :  { %9664 = vmatpush3.bf16.msra.mxu1 %v9663_v59  ;;  %9634 = vmatprep.subr.bf16.mxu0 %v9633_v56  ;;  %v9713_v59 = vpack.c.bf16 %v8131_v24, %v8130_v38  ;;  %v8115_v56 = vld [vmem:[#allocation11 + $0x308] sm:$0xff]  ;;  %v8122_v38 = vld [vmem:[#allocation11 + $0x340] sm:$0xff]  ;;  %v9729_v24 = vpack.c.bf16 %v8139_v34, %v8138_v33 }
 0x491   :  { %9666 = vmatprep.subr.bf16.mxu1 %v9665_v0  ;;  %v8133_v0 = vld [vmem:[#allocation11 + $0x398] sm:$0xff]  ;;  %v9715_v61 = vpack.c.bf16 %v8115_v56, %v8114_v4 }
 0x492   :  { %v9717_v49 = vpack.c.bf16 %v8133_v0, %v8132_v55  ;;  %v8093_v56 = vld [vmem:[#allocation11 + $0x258] sm:$0xff]  ;;  %v8110_v0 = vld [vmem:[#allocation11 + $0x2e0] sm:$0xff] }
 0x493   :  { %9636 = vmatpush3.bf16.msra.mxu0 %v9635_v54  ;;  %v8116_v54 = vld [vmem:[#allocation11 + $0x310] sm:$0xff]  ;;  %v8125_v55 = vld [vmem:[#allocation11 + $0x358] sm:$0xff] }
 0x494   :  { %9668 = vmatpush3.bf16.msra.mxu1 %v9667_v5  ;;  %9638 = vmatprep.subr.bf16.mxu0 %v9637_v15  ;;  %v8012_v5 = vmax.f32 %v9747_v57, 0.0  ;;  %v8117_v15 = vld [vmem:[#allocation11 + $0x318] sm:$0xff]  ;;  %v9735_v3 = vpack.c.bf16 %v8125_v55, %v8124_v11 }
 0x495   :  { %9670 = vmatprep.subr.bf16.mxu1 %v9669_v19  ;;  %v8135_v19 = vld [vmem:[#allocation11 + $0x3a8] sm:$0xff]  ;;  %v9719_v12 = vpack.c.bf16 %v8117_v15, %v8116_v54  ;;  %v8126_v15 = vld [vmem:[#allocation11 + $0x360] sm:$0xff] }
 0x497   :  { %9640 = vmatpush3.bf16.msra.mxu0 %v9639_v14  ;;  %v8118_v14 = vld [vmem:[#allocation11 + $0x320] sm:$0xff] }
 0x498   :  { %9672 = vmatpush3.bf16.msra.mxu1 %v9671_v17  ;;  %9642 = vmatprep.subr.bf16.mxu0 %v9641_v62  ;;  %v9721_v17 = vpack.c.bf16 %v8135_v19, %v8134_v8  ;;  %v8119_v62 = vld [vmem:[#allocation11 + $0x328] sm:$0xff]  ;;  %v9739_v8 = vpack.c.bf16 %v8127_v6, %v8126_v15  ;;  %v8112_v19 = vld [vmem:[#allocation11 + $0x2f0] sm:$0xff] }
 0x499   :  { %9674 = vmatprep.subr.bf16.mxu1 %v9673_v25  ;;  %v8137_v25 = vld [vmem:[#allocation11 + $0x3b8] sm:$0xff]  ;;  %v9723_v52 = vpack.c.bf16 %v8119_v62, %v8118_v14 }
 0x49a   :  { %v9725_v51 = vpack.c.bf16 %v8137_v25, %v8136_v31  ;;  %v8097_v14 = vld [vmem:[#allocation11 + $0x278] sm:$0xff]  ;;  %v9743_v31 = vpack.c.bf16 %v8129_v22, %v8128_v32  ;;  %v1557_v25 = vrot.slane %v10506_v10, %v10264_v41 }
 0x49b   :  { %9644 = vmatpush3.bf16.msra.mxu0 %v9643_v18  ;;  %v8120_v18 = vld [vmem:[#allocation11 + $0x330] sm:$0xff]  ;;  %v9711_v62 = vpack.c.bf16 %v8097_v14, %v8096_v13 }
 0x49c   :  { %9676 = vmatpush3.bf16.msra.mxu1 %v9675_v29  ;;  %9646 = vmatprep.subr.bf16.mxu0 %v9645_v16  ;;  %v8121_v29 = vld [vmem:[#allocation11 + $0x338] sm:$0xff]  ;;  %v8106_v16 = vld [vmem:[#allocation11 + $0x2c0] sm:$0xff] }
 0x49d   :  { %9678 = vmatprep.subr.bf16.mxu1 %v9677_v36  ;;  %v9727_v36 = vpack.c.bf16 %v8121_v29, %v8120_v18  ;;  %v9697_v40 = vpack.c.bf16 %v8107_v30, %v8106_v16 }
 0x49f   :  { %9648 = vmatpush3.bf16.msra.mxu0 %v9647_v39  ;;  %v8123_v39 = vld [vmem:[#allocation11 + $0x348] sm:$0xff] }
 0x4a0   :  { %9680 = vmatpush3.bf16.msra.mxu1 %v9679_v44  ;;  %9682 = vmatprep.subr.bf16.mxu0 %v9681_v45  ;;  %v8109_v44 = vld [vmem:[#allocation11 + $0x2d8] sm:$0xff]  ;;  %v8140_v45 = vld [vmem:[#allocation11 + $0x3d0] sm:$0xff]  ;;  %v9731_v4 = vpack.c.bf16 %v8123_v39, %v8122_v38 }
 0x4a1   :  { %9714 = vmatprep.subr.bf16.mxu1 %v9713_v59  ;;  %v9701_v57 = vpack.c.bf16 %v8109_v44, %v8108_v53  ;;  %v8092_v59 = vld [vmem:[#allocation11 + $0x250] sm:$0xff]  ;;  %v9733_v60 = vpack.c.bf16 %v8141_v47, %v8140_v45 }
 0x4a2   :  { %8218 = vmatmul.mubr.f32.vlgmr.msra.gmra.mrb[8].mxu0 %v8010_v48  ;;  %v8142_v48 = vld [vmem:[#allocation11 + $0x3e0] sm:$0xff] }
 0x4a3   :  { %8288 = vmatmul.mubr.f32.vlgmr.msra.gmra.mrb[8].mxu1 %v8012_v5  ;;  %9684 = vmatpush3.bf16.msra.mxu0 %v9683_v23  ;;  %v8111_v23 = vld [vmem:[#allocation11 + $0x2e8] sm:$0xff]  ;;  %v8094_v5 = vld [vmem:[#allocation11 + $0x260] sm:$0xff] }
 0x4a4   :  { %9716 = vmatpush3.bf16.msra.mxu1 %v9715_v61  ;;  %9686 = vmatprep.subr.bf16.mxu0 %v9685_v20  ;;  %v8143_v61 = vld [vmem:[#allocation11 + $0x3e8] sm:$0xff]  ;;  %v9703_v20 = vpack.c.bf16 %v8093_v56, %v8092_v59  ;;  %v9705_v9 = vpack.c.bf16 %v8111_v23, %v8110_v0 }
 0x4a5   :  { %9718 = vmatprep.subr.bf16.mxu1 %v9717_v49  ;;  %v9737_v54 = vpack.c.bf16 %v8143_v61, %v8142_v48  ;;  %v8095_v49 = vld [vmem:[#allocation11 + $0x268] sm:$0xff] }
 0x4a6   :  { %v9707_v58 = vpack.c.bf16 %v8095_v49, %v8094_v5 }
 0x4a7   :  { %9688 = vmatpush3.bf16.msra.mxu0 %v9687_v63  ;;  %v8113_v63 = vld [vmem:[#allocation11 + $0x2f8] sm:$0xff] }
 0x4a8   :  { %9720 = vmatpush3.bf16.msra.mxu1 %v9719_v12  ;;  %9690 = vmatprep.subr.bf16.mxu0 %v9689_v43  ;;  %v8144_v12 = vld [vmem:[#allocation11 + $0x3f0] sm:$0xff]  ;;  %v9709_v43 = vpack.c.bf16 %v8113_v63, %v8112_v19 }
 0x4a9   :  { %9722 = vmatprep.subr.bf16.mxu1 %v9721_v17  ;;  %v9741_v17 = vpack.c.bf16 %v8145_v46, %v8144_v12 }
 0x4ab   :  { %9692 = vmatpush3.bf16.msra.mxu0 %v9691_v26  ;;  %v1565_v26 = vrot.slane %v10506_v10, %v10273_v50 }
 0x4ac   :  { %9724 = vmatpush3.bf16.msra.mxu1 %v9723_v52  ;;  %9694 = vmatprep.subr.bf16.mxu0 %v9693_v27  ;;  %v1561_v52 = vrot.slane %v10506_v10, %v10267_v42  ;;  %v1569_v27 = vrot.slane %v10506_v10, %v10280_v2  ;;  %v9476_v10 = vld [vmem:[#allocation13] ss:$0 sm:$0xff] }
 0x4ad   :  { %9726 = vmatprep.subr.bf16.mxu1 %v9725_v51 }
 0x4af   :  { %9696 = vmatpush3.bf16.msra.mxu0 %v9695_v21 }
 0x4b0   :  { %9728 = vmatpush3.bf16.msra.mxu1 %v9727_v36  ;;  %9698 = vmatprep.subr.bf16.mxu0 %v9697_v40 }
 0x4b1   :  { %9730 = vmatprep.subr.bf16.mxu1 %v9729_v24 }
 0x4b3   :  { %9700 = vmatpush3.bf16.msra.mxu0 %v9699_v1 }
 0x4b4   :  { %9732 = vmatpush3.bf16.msra.mxu1 %v9731_v4  ;;  %9702 = vmatprep.subr.bf16.mxu0 %v9701_v57 }
 0x4b5   :  { %9734 = vmatprep.subr.bf16.mxu1 %v9733_v60 }
 0x4b7   :  { %9704 = vmatpush3.bf16.msra.mxu0 %v9703_v20 }
 0x4b8   :  { %9736 = vmatpush3.bf16.msra.mxu1 %v9735_v3  ;;  %9706 = vmatprep.subr.bf16.mxu0 %v9705_v9 }
 0x4b9   :  { %9738 = vmatprep.subr.bf16.mxu1 %v9737_v54 }
 0x4bb   :  { %9708 = vmatpush3.bf16.msra.mxu0 %v9707_v58 }
 0x4bc   :  { %9740 = vmatpush3.bf16.msra.mxu1 %v9739_v8  ;;  %9710 = vmatprep.subr.bf16.mxu0 %v9709_v43 }
 0x4bd   :  { %9742 = vmatprep.subr.bf16.mxu1 %v9741_v17 }
 0x4bf   :  { %9712 = vmatpush3.bf16.msra.mxu0 %v9711_v62 }
 0x4c0   :  { %9744 = vmatpush3.bf16.msra.mxu1 %v9743_v31 }
 0x555   :  { %v7675_v7 = vpop.f32.mrb[4].mxu0  ;;  %v8003_v18 = vpop.f32.mrb[4].mxu1 }
 0x556   :  { %v9749_v28 = vadd.f32 %v7675_v7, %v1557_v25  ;;  %v7677_v51 = vpop.f32.mrb[5].mxu0  ;;  %v9751_v29 = vadd.f32 %v8003_v18, %v1565_v26  ;;  %v8005_v30 = vpop.f32.mrb[5].mxu1 }
 0x557   :  { %v9750_v16 = vadd.f32 %v7677_v51, %v1561_v52  ;;  %v7679_v33 = vpop.f32.mrb[6].mxu0  ;;  %v9752_v34 = vadd.f32 %v8005_v30, %v1569_v27  ;;  %v8007_v21 = vpop.f32.mrb[6].mxu1 }
 0x558   :  { %v7680_v41 = vpop.f32.mrb[7].mxu0  ;;  %v8008_v40 = vpop.f32.mrb[7].mxu1  ;;  %v8014_v50 = vmax.f32 %v9749_v28, 0.0  ;;  %v8016_v37 = vmax.f32 %v9751_v29, 0.0 }
 0x559   :  { %v8015_v36 = vmax.f32 %v9750_v16, 0.0  ;;  %v8017_v35 = vmax.f32 %v9752_v34, 0.0 }
 0x55b   :  { %8357 = vmatprep.mubr.f32.mxu0 %v8015_v36  ;;  %8427 = vmatprep.mubr.f32.mxu1 %v8017_v35 }
 0x55c   :  { %8358 = vmatmul.mubr.f32.vlgmr.msra.gmra.mrb[10].mxu0 %v8014_v50  ;;  %8428 = vmatmul.mubr.f32.vlgmr.msra.gmra.mrb[10].mxu1 %v8016_v37 }
 0x575   :  { %v9509_v42 = vpop.f32.mrb[8].mxu0 }
 0x576   :  { %v9544_v2 = vpop.f32.mrb[8].mxu1  ;;  %v9510_v38 = vpop.f32.mrb[9].mxu0 }
 0x577   :  { %v9511_v24 = vadd.f32 %v9510_v38, %v9509_v42  ;;  %v9545_v39 = vpop.f32.mrb[9].mxu1 }
 0x578   :  { %v9546_v53 = vadd.f32 %v9545_v39, %v9544_v2 }
 0x579   :  { %v8220_v44 = vadd.f32 %v9511_v24, %v9476_v10 }
 0x57b   :  { %v8290_v45 = vadd.f32 %v9546_v53, %v8220_v44 }
 0x62f   :  { %v9579_v47 = vpop.f32.mrb[10].mxu0  ;;  %v9614_v1 = vpop.f32.mrb[10].mxu1 }
 0x630   :  { %v9580_v4 = vpop.f32.mrb[11].mxu0  ;;  %v9615_v59 = vpop.f32.mrb[11].mxu1 }
 0x631   :  { %v9581_v57 = vadd.f32 %v9580_v4, %v9579_v47  ;;  %v9616_v56 = vadd.f32 %v9615_v59, %v9614_v1 }
 0x633   :  { %v8360_v11 = vadd.f32 %v9581_v57, %v8290_v45 }
 0x635   :  { %v8430_v60 = vadd.f32 %v9616_v56, %v8360_v11 }
 0x637   :  { %8433 = vst [vmem:[#allocation14] sm:$0x3] %v8430_v60 }
 0x638   :  { %10043 = shalt.err (!%p10040_p4)
}
 0x639   :  { %s10044_s27 = scalar_lea.hbm %s10549_s7, 32 }
 0x63a   :  { %p10045_p5 = scmp.ne.s32.totalorder %s10549_s7, %s10044_s27  ;;  %p10048_p6 = scmp.lt.u32.totalorder %s10044_s27, %s10549_s7 }
 0x63c   :  { %p10050_p7 = pnand %p10048_p6, %p10045_p5 }
 0x63e   :  { %10053 = shalt.err (!%p10050_p7)
}
 0x63f   :  { %8443 = dma.vmem_to_hbm [thread:$0]  %s8441_s12, 32, %s10549_s7, [#allocation4]  }
 0x640   :  { %10062 = dma.done.wait [#allocation4], 32  }
 0x641   :  { %10063 = vsyncadd [#allocation4], 4294967264 }
 0x642   :  { %8447 = vsyncpa [#allocation3], 1 }
 0x643   :  { %8448 = vsyncpa [#allocation6], 1 }
 0x644   :  { %8449 = vsyncpa [#allocation9], 1 }
 0x645   :  { %8450 = vsyncpa [#allocation12], 1 }
 0x646   :  { %8451 = vsyncpa [#allocation4], 1 }

</bundles_post_ra>
